<compile_context>
chip_gen: v7x
topology: tpu7x:2x2x1
jax: 0.10.0
libtpu: 0.0.40
codegen_flags: <defaults>
</compile_context>

<pallas_src>
import functools
import math

import numpy as np

import jax
import jax.numpy as jnp
from jax.experimental import pallas as pl
from jax.experimental.pallas import tpu as pltpu


def _round_up(x, m):
    return ((x + m - 1) // m) * m


# ----------------------------- 1x1 conv kernel ------------------------------

def _conv1x1_kernel(x_ref, w_ref, o_ref, *, use_mxu):
    # x_ref: (C, TP) bf16 pixels-on-lanes, w_ref: (3*OC, C) bf16, o_ref: (3*OC, TP) f32
    if use_mxu:
        o_ref[...] = jnp.dot(w_ref[...], x_ref[...],
                             preferred_element_type=jnp.float32).astype(o_ref.dtype)
    else:
        # Tiny-C path: K=C would leave the MXU ~1-3% utilized, so do the C
        # multiply-adds on the VPU instead (perf-review item).
        C = x_ref.shape[0]
        acc = None
        for c in range(C):
            contrib = (w_ref[:, c:c + 1].astype(jnp.float32) *
                       x_ref[c:c + 1, :].astype(jnp.float32))
            acc = contrib if acc is None else acc + contrib
        o_ref[...] = acc.astype(o_ref.dtype)


def _conv_pixel_tile(HW_pad, C, OC3):
    # Pixel tile from an explicit VMEM byte budget (bf16 input block + f32 out block).
    budget = 6 * 1024 * 1024
    m = HW_pad // 128
    for d in range(m, 0, -1):
        if m % d:
            continue
        tp = d * 128
        if tp > 8192:
            continue
        if tp * (C * 2 + OC3 * 4) <= budget:
            return tp
    return 128


def conv1x1_pallas(x, w):
    """1x1 conv. x: (B, C, H, W), w: (3*OC, C) -> f32 (B, 3*OC, H, W)."""
    B, C, H, W = x.shape
    OC3 = w.shape[0]
    HW = H * W
    HW_pad = _round_up(HW, 128)
    x3 = x.reshape(B, C, HW)
    if HW_pad != HW:
        x3 = jnp.pad(x3, ((0, 0), (0, 0), (0, HW_pad - HW)))
    x3 = x3.astype(jnp.bfloat16)
    w_b = w.astype(jnp.bfloat16)
    TP = _conv_pixel_tile(HW_pad, C, OC3)
    kernel = functools.partial(_conv1x1_kernel, use_mxu=(C >= 16))
    cost = pl.CostEstimate(
        flops=2 * B * C * OC3 * HW_pad,
        transcendentals=0,
        bytes_accessed=B * HW_pad * (2 * C + 4 * OC3) + 2 * OC3 * C)

    y = pl.pallas_call(
        kernel,
        out_shape=jax.ShapeDtypeStruct((B, OC3, HW_pad), jnp.float32),
        grid=(B, HW_pad // TP),
        in_specs=[
            pl.BlockSpec((pl.Squeezed(), C, TP), lambda b, t: (b, 0, t)),
            pl.BlockSpec((OC3, C), lambda b, t: (0, 0)),
        ],
        out_specs=pl.BlockSpec((pl.Squeezed(), OC3, TP), lambda b, t: (b, 0, t)),
        compiler_params=pltpu.CompilerParams(
            dimension_semantics=("parallel", "parallel"),
            vmem_limit_bytes=48 * 1024 * 1024),
        cost_estimate=cost,
    )(x3, w_b)
    return y[:, :, :HW].reshape(B, OC3, H, W)


# ----------------------------- attention kernel -----------------------------

def _attn_kernel(q_ref, k_ref, v_ref, o_ref, *, gc, klen):
    # q_ref: (BB, gc, TP) bf16
    # k_ref/v_ref: (BB, gc*klen, TP) bf16, packed gc-major (row = c*klen + kk)
    # o_ref: (BB, gc, TP) f32
    f32 = jnp.float32
    # logits[b, kk, p] = sum_c q[b, c, p] * k[b, c*klen + kk, p]
    logits = None
    for c in range(gc):
        qc = q_ref[:, c:c + 1, :].astype(f32)                       # (BB, 1, TP)
        kc = k_ref[:, c * klen:(c + 1) * klen, :].astype(f32)       # (BB, klen, TP)
        contrib = qc * kc
        logits = contrib if logits is None else logits + contrib
    m = jnp.max(logits, axis=1, keepdims=True)                      # (BB, 1, TP)
    e = jnp.exp(logits - m)                                         # EUP
    denom = jnp.sum(e, axis=1, keepdims=True)
    attn = e * pl.reciprocal(denom, approx=True)                    # EUP recip
    outs = []
    for c in range(gc):
        vc = v_ref[:, c * klen:(c + 1) * klen, :].astype(f32)
        outs.append(jnp.sum(attn * vc, axis=1, keepdims=True))      # (BB, 1, TP)
    o_ref[...] = jnp.concatenate(outs, axis=1).astype(o_ref.dtype)


def _attn_tiles(BG, P_pad, T, gc):
    # Bytes moved per (BG-row, pixel) per step: q/k/v bf16 + out f32.
    per_px = (gc + 2 * T) * 2 + gc * 4
    budget = 6 * 1024 * 1024           # per buffer set; ~2x with double-buffering
    TP = 128
    for cand in (8192, 4096, 2048, 1024, 512, 256, 128):
        if P_pad % cand == 0 and cand * per_px <= budget:
            TP = cand
            break
    BB = 1
    for cand in (8, 4, 2, 1):
        if BG % cand == 0 and cand * TP * per_px <= budget:
            BB = cand
            break
    return BB, TP


def attention_pallas(q, k, v, *, gc, klen):
    """q: (BG, gc, P) bf16, k/v: (BG, gc*klen, P) bf16 -> f32 (BG, gc, P)."""
    BG, _, P = q.shape
    T = gc * klen
    P_pad = _round_up(P, 128)
    if P_pad != P:
        pad = ((0, 0), (0, 0), (0, P_pad - P))
        q, k, v = jnp.pad(q, pad), jnp.pad(k, pad), jnp.pad(v, pad)
    BB, TP = _attn_tiles(BG, P_pad, T, gc)
    kern = functools.partial(_attn_kernel, gc=gc, klen=klen)
    cost = pl.CostEstimate(
        flops=BG * P_pad * (4 * T + 3 * klen),
        transcendentals=BG * P_pad * (klen + 1),
        bytes_accessed=BG * P_pad * (2 * gc + 4 * T + 4 * gc))

    out = pl.pallas_call(
        kern,
        out_shape=jax.ShapeDtypeStruct((BG, gc, P_pad), jnp.float32),
        grid=(BG // BB, P_pad // TP),
        in_specs=[
            pl.BlockSpec((BB, gc, TP), lambda i, t: (i, 0, t)),
            pl.BlockSpec((BB, T, TP), lambda i, t: (i, 0, t)),
            pl.BlockSpec((BB, T, TP), lambda i, t: (i, 0, t)),
        ],
        out_specs=pl.BlockSpec((BB, gc, TP), lambda i, t: (i, 0, t)),
        compiler_params=pltpu.CompilerParams(
            dimension_semantics=("parallel", "parallel"),
            vmem_limit_bytes=48 * 1024 * 1024),
        cost_estimate=cost,
    )(q, k, v)
    return out[:, :, :P]


# ------------------------------- Module glue --------------------------------

def init_attention_conv(key, in_channels, out_channels, kernel_size, groups):
    KH, KW = kernel_size
    gc = out_channels // groups
    k1, k2, k3 = jax.random.split(key, 3)
    # kaiming_normal_(mode='fan_out', nonlinearity='relu') on a 1x1 conv
    fan_out = 3 * out_channels
    std = math.sqrt(2.0 / fan_out)
    w = std * jax.random.normal(k1, (3 * out_channels, in_channels), jnp.float32)
    rpe_h = jax.random.normal(k2, (groups, 1, KH, 1, gc // 2), jnp.float32)
    rpe_w = jax.random.normal(k3, (groups, 1, 1, KW, gc // 2), jnp.float32)
    return {"w": w, "rpe_h": rpe_h, "rpe_w": rpe_w}


def attention_conv_forward(params, x, *, out_channels, kernel_size,
                           stride=(1, 1), padding=(0, 0), dilation=(1, 1),
                           groups=4, use_pallas=True):
    B, C, H, W = x.shape
    KH, KW = kernel_size
    SH, SW = stride
    PH, PW = padding
    DH, DW = dilation
    G = groups
    OC = out_channels
    gc = OC // G
    Klen = KH * KW
    T = Klen * gc
    center = (Klen - 1) // 2
    chh, cww = center // KW, center % KW
    Hn = (H + 2 * PH - DH * (KH - 1) - 1) // SH + 1
    Wn = (W + 2 * PW - DW * (KW - 1) - 1) // SW + 1
    P = Hn * Wn
    f32 = jnp.float32

    w_b = params["w"].astype(jnp.bfloat16)
    x_b = x.astype(jnp.bfloat16)

    # ---- 1x1 conv.  Conv2d(padding=p, k=1, bias=False) == zero-pad after conv. ----
    if use_pallas:
        y = conv1x1_pallas(x_b, w_b)
    else:
        y = jnp.einsum("oc,bchw->bohw", w_b, x_b, preferred_element_type=f32)
    y = y.astype(jnp.bfloat16)                       # bf16 inter-stage storage
    y = jnp.pad(y, ((0, 0), (0, 0), (PH, PH), (PW, PW)))   # (B, 3OC, Hp, Wp)

    def tap(block, kh, kw):
        return block[:, :,
                     kh * DH: kh * DH + (Hn - 1) * SH + 1: SH,
                     kw * DW: kw * DW + (Wn - 1) * SW + 1: SW]

    if not use_pallas:
        # -------- pure-JAX reference: faithful reproduction of the PyTorch ops
        # (same bf16 quantization points as the pallas path, so the comparison
        # isolates kernel / layout / permutation correctness). --------
        q_r = tap(y[:, :OC], chh, cww).reshape(B, G, gc, P).astype(f32)
        k_taps = [tap(y[:, OC:2 * OC], kh, kw) for kh in range(KH) for kw in range(KW)]
        ku = jnp.stack(k_taps, axis=2).reshape(B, G, gc, Klen, P)
        ku = jnp.transpose(ku, (0, 1, 4, 3, 2)).reshape(B, G, P, KH, KW, gc)
        ks = jnp.concatenate(
            [ku[..., :gc // 2].astype(f32) + params["rpe_h"],
             ku[..., gc // 2:].astype(f32) + params["rpe_w"]], axis=1)
        ks = ks.reshape(B, G, P, Klen, gc)
        ks = ks.astype(jnp.bfloat16).astype(f32)     # same quantization as pallas path
        v_taps = [tap(y[:, 2 * OC:], kh, kw) for kh in range(KH) for kw in range(KW)]
        vu = jnp.stack(v_taps, axis=1).reshape(B, Klen, G, gc, P)
        vu = jnp.transpose(vu, (0, 2, 4, 1, 3)).astype(f32)        # (B,G,P,Klen,gc)
        logits = jnp.einsum("bgcp,bgpkc->bgpk", q_r, ks)
        attn = jax.nn.softmax(logits, axis=-1)
        outr = jnp.einsum("bgpk,bgpkc->bgcp", attn, vu)
        return outr.reshape(B, OC, Hn, Wn)

    # ---------------------------- pallas fast path ----------------------------
    # query: center tap only (never 9x-expanded)
    q_pk = tap(y[:, :OC], chh, cww).reshape(B * G, gc, P)

    # value: ONE-pass construction straight into the packed (BG, gc*Klen, P) layout
    v_taps = [tap(y[:, 2 * OC:], kh, kw).reshape(B, G, gc, P)
              for kh in range(KH) for kw in range(KW)]
    v_pk = jnp.stack(v_taps, axis=3).reshape(B * G, T, P)

    # key: the reference's buggy concat(groups)+reshape (which mixes groups, taps,
    # channels AND pixel parity) applied as a precomputed static permutation plus an
    # additive rpe bias table -> the 9x key tensor is written exactly once, already
    # in the packed kernel layout.
    half_t = T // 2
    rpe_h_s = params["rpe_h"][:, 0, :, 0, :]         # (G, KH, gc//2)
    rpe_w_s = params["rpe_w"][:, 0, 0, :, :]         # (G, KW, gc//2)

    if P % 2 != 0:
        # TODO(synk): odd pixel counts fall back to the faithful multi-pass
        # construction; the fused stride-2 pixel split below needs P even.
        k_taps = [tap(y[:, OC:2 * OC], kh, kw) for kh in range(KH) for kw in range(KW)]
        ku = jnp.stack(k_taps, axis=2).reshape(B, G, gc, Klen, P)
        ku = jnp.transpose(ku, (0, 1, 4, 3, 2)).reshape(B, G, P, KH, KW, gc)
        ks = jnp.concatenate(
            [ku[..., :gc // 2].astype(f32) + params["rpe_h"],
             ku[..., gc // 2:].astype(f32) + params["rpe_w"]], axis=1)
        ks = ks.reshape(B, G, P, Klen, gc)
        k_pk = jnp.transpose(ks, (0, 1, 4, 3, 2)).reshape(B * G, T, P)
        k_pk = k_pk.astype(jnp.bfloat16)
    else:
        t_idx = np.arange(T)
        r_idx = t_idx % half_t
        c2_a = r_idx % (gc // 2)
        kw_a = (r_idx // (gc // 2)) % KW
        kh_a = r_idx // (KW * (gc // 2))
        # bias_tab[j, t]: j<G -> rpe_h of group j, j>=G -> rpe_w of group j-G
        bias_tab = jnp.concatenate([rpe_h_s[:, kh_a, c2_a],
                                    rpe_w_s[:, kw_a, c2_a]], axis=0)   # (2G, T) f32
        slabs = []
        for c in range(gc):                # packed row order t' = c*Klen + kk
            for kk in range(Klen):
                t = kk * gc + c            # reference flat index inside (Klen, gc)
                delta = t // half_t
                r = t % half_t
                kh_s = r // (KW * (gc // 2))
                kw_s = (r // (gc // 2)) % KW
                c2 = r % (gc // 2)
                chans = np.array(
                    [OC + (j * gc + c2) if j < G
                     else OC + ((j - G) * gc + gc // 2 + c2)
                     for j in range(2 * G)], dtype=np.int32)
                slab = jnp.take(y, chans, axis=1)                  # (B, 2G, Hp, Wp)
                slab = tap(slab, kh_s, kw_s).reshape(B, 2 * G, P)  # (B, 2G, P)
                slab = slab[:, :, delta::2].astype(f32)            # (B, 2G, P//2)
                slab = slab + bias_tab[:, t][None, :, None]
                # j = 2g + branch  ->  (g, branch-major pixels) via plain reshape
                slabs.append(slab.reshape(B, G, P))
        k_pk = jnp.stack(slabs, axis=2).reshape(B * G, T, P).astype(jnp.bfloat16)

    out = attention_pallas(q_pk, k_pk, v_pk, gc=gc, klen=Klen)     # (BG, gc, P) f32
    # Channels-major, pixels-last layout -> no transpose needed here.
    return out.reshape(B, OC, Hn, Wn)


# --------------------------------- Driver ------------------------------------

if __name__ == "__main__":
    B, Cin, H, W = 2, 4, 16, 16
    out_channels, groups = 16, 4
    kernel_size = (3, 3)
    stride = (1, 1)
    padding = (1, 1)
    dilation = (1, 1)

    root = jax.random.PRNGKey(0)
    kp, kx = jax.random.split(root)
    params = init_attention_conv(kp, Cin, out_channels, kernel_size, groups)
    x = jax.random.normal(kx, (B, Cin, H, W), jnp.float32)

    common = dict(out_channels=out_channels, kernel_size=kernel_size,
                  stride=stride, padding=padding, dilation=dilation, groups=groups)
    fwd_pallas = jax.jit(functools.partial(attention_conv_forward, use_pallas=True, **common))
    fwd_ref = jax.jit(functools.partial(attention_conv_forward, use_pallas=False, **common))

    out = jax.block_until_ready(fwd_pallas(params, x))
    ref = jax.block_until_ready(fwd_ref(params, x))

    assert out.shape == (B, out_channels, H, W), out.shape
    # Tolerance budget (reference shares all bf16 quantization points with the
    # pallas path): approx EUP reciprocal in the softmax denominator (~1e-3) plus
    # rare single-ulp bf16 requantization differences between the Pallas conv and
    # the XLA reference conv (~2e-3 worst case).
    max_err = float(jnp.max(jnp.abs(out - ref)))
    assert jnp.allclose(out, ref, atol=5e-3, rtol=5e-3), max_err
    print("KERNEL_OK")
</pallas_src>

<mosaic_0001>
module attributes {stable_mosaic.version = 11 : i64} {
  func.func @_conv1x1_kernel(%arg0: i32, %arg1: i32, %arg2: memref<1x4x256xbf16, #tpu.memory_space<vmem>>, %arg3: memref<48x4xbf16, #tpu.memory_space<vmem>>, %arg4: memref<1x48x256xf32, #tpu.memory_space<vmem>>) attributes {dimension_semantics = [#tpu.dimension_semantics<parallel>, #tpu.dimension_semantics<parallel>], iteration_bounds = array<i64: 2, 1>, scalar_prefetch = 0 : i64, scratch_operands = 0 : i64, tpu.core_type = #tpu.core_type<tc>, window_params = [{transform_indices = @transform_0, window_bounds = array<i64: 1, 4, 256>}, {pipeline_mode = #tpu.pipeline_mode<synchronous>, transform_indices = @transform_1, window_bounds = array<i64: 48, 4>}, {transform_indices = @transform_2, window_bounds = array<i64: 1, 48, 256>}]} {
    %c0 = arith.constant 0 : index
    %c0_0 = arith.constant 0 : index
    %0 = vector.load %arg3[%c0, %c0_0] : memref<48x4xbf16, #tpu.memory_space<vmem>>, vector<48x1xbf16>
    %1 = arith.extf %0 : vector<48x1xbf16> to vector<48x1xf32>
    %c0_1 = arith.constant 0 : index
    %c0_2 = arith.constant 0 : index
    %c0_3 = arith.constant 0 : index
    %2 = vector.load %arg2[%c0_1, %c0_2, %c0_3] : memref<1x4x256xbf16, #tpu.memory_space<vmem>>, vector<1x1x256xbf16>
    %3 = vector.shape_cast %2 : vector<1x1x256xbf16> to vector<1x256xbf16>
    %4 = arith.extf %3 : vector<1x256xbf16> to vector<1x256xf32>
    %5 = vector.broadcast %1 : vector<48x1xf32> to vector<48x256xf32>
    %6 = vector.broadcast %4 : vector<1x256xf32> to vector<48x256xf32>
    %7 = arith.mulf %5, %6 : vector<48x256xf32>
    %c0_4 = arith.constant 0 : index
    %c1 = arith.constant 1 : index
    %8 = vector.load %arg3[%c0_4, %c1] : memref<48x4xbf16, #tpu.memory_space<vmem>>, vector<48x1xbf16>
    %9 = arith.extf %8 : vector<48x1xbf16> to vector<48x1xf32>
    %c0_5 = arith.constant 0 : index
    %c1_6 = arith.constant 1 : index
    %c0_7 = arith.constant 0 : index
    %10 = vector.load %arg2[%c0_5, %c1_6, %c0_7] : memref<1x4x256xbf16, #tpu.memory_space<vmem>>, vector<1x1x256xbf16>
    %11 = vector.shape_cast %10 : vector<1x1x256xbf16> to vector<1x256xbf16>
    %12 = arith.extf %11 : vector<1x256xbf16> to vector<1x256xf32>
    %13 = vector.broadcast %9 : vector<48x1xf32> to vector<48x256xf32>
    %14 = vector.broadcast %12 : vector<1x256xf32> to vector<48x256xf32>
    %15 = arith.mulf %13, %14 : vector<48x256xf32>
    %16 = arith.addf %7, %15 : vector<48x256xf32>
    %c0_8 = arith.constant 0 : index
    %c2 = arith.constant 2 : index
    %17 = vector.load %arg3[%c0_8, %c2] : memref<48x4xbf16, #tpu.memory_space<vmem>>, vector<48x1xbf16>
    %18 = arith.extf %17 : vector<48x1xbf16> to vector<48x1xf32>
    %c0_9 = arith.constant 0 : index
    %c2_10 = arith.constant 2 : index
    %c0_11 = arith.constant 0 : index
    %19 = vector.load %arg2[%c0_9, %c2_10, %c0_11] : memref<1x4x256xbf16, #tpu.memory_space<vmem>>, vector<1x1x256xbf16>
    %20 = vector.shape_cast %19 : vector<1x1x256xbf16> to vector<1x256xbf16>
    %21 = arith.extf %20 : vector<1x256xbf16> to vector<1x256xf32>
    %22 = vector.broadcast %18 : vector<48x1xf32> to vector<48x256xf32>
    %23 = vector.broadcast %21 : vector<1x256xf32> to vector<48x256xf32>
    %24 = arith.mulf %22, %23 : vector<48x256xf32>
    %25 = arith.addf %16, %24 : vector<48x256xf32>
    %c0_12 = arith.constant 0 : index
    %c3 = arith.constant 3 : index
    %26 = vector.load %arg3[%c0_12, %c3] : memref<48x4xbf16, #tpu.memory_space<vmem>>, vector<48x1xbf16>
    %27 = arith.extf %26 : vector<48x1xbf16> to vector<48x1xf32>
    %c0_13 = arith.constant 0 : index
    %c3_14 = arith.constant 3 : index
    %c0_15 = arith.constant 0 : index
    %28 = vector.load %arg2[%c0_13, %c3_14, %c0_15] : memref<1x4x256xbf16, #tpu.memory_space<vmem>>, vector<1x1x256xbf16>
    %29 = vector.shape_cast %28 : vector<1x1x256xbf16> to vector<1x256xbf16>
    %30 = arith.extf %29 : vector<1x256xbf16> to vector<1x256xf32>
    %31 = vector.broadcast %27 : vector<48x1xf32> to vector<48x256xf32>
    %32 = vector.broadcast %30 : vector<1x256xf32> to vector<48x256xf32>
    %33 = arith.mulf %31, %32 : vector<48x256xf32>
    %34 = arith.addf %25, %33 : vector<48x256xf32>
    %c0_16 = arith.constant 0 : index
    %c0_17 = arith.constant 0 : index
    %c0_18 = arith.constant 0 : index
    %35 = vector.load %arg4[%c0_16, %c0_17, %c0_18] : memref<1x48x256xf32, #tpu.memory_space<vmem>>, vector<1x48x256xf32>
    %36 = vector.shape_cast %35 : vector<1x48x256xf32> to vector<48x256xf32>
    %37 = vector.shape_cast %34 : vector<48x256xf32> to vector<1x48x256xf32>
    tpu.vector_store %arg4[%c0_16, %c0_17, %c0_18], %37 {strides = array<i32>} : memref<1x48x256xf32, #tpu.memory_space<vmem>>, vector<1x48x256xf32>,
    return
  }
  func.func @transform_0(%arg0: i32, %arg1: i32) -> (i32, i32, i32) {
    %c0_i32 = arith.constant 0 : i32
    %c0_i32_0 = arith.constant 0 : i32
    return %arg0, %c0_i32, %arg1 : i32, i32, i32
  }
  func.func @transform_1(%arg0: i32, %arg1: i32) -> (i32, i32) {
    %c0_i32 = arith.constant 0 : i32
    %c0_i32_0 = arith.constant 0 : i32
    %c0_i32_1 = arith.constant 0 : i32
    return %c0_i32, %c0_i32_0 : i32, i32
  }
  func.func @transform_2(%arg0: i32, %arg1: i32) -> (i32, i32, i32) {
    %c0_i32 = arith.constant 0 : i32
    %c0_i32_0 = arith.constant 0 : i32
    return %arg0, %c0_i32, %arg1 : i32, i32, i32
  }
}

module attributes {stable_mosaic.version = 11 : i64} {
  func.func @_attn_kernel(%arg0: i32, %arg1: i32, %arg2: memref<8x4x256xbf16, #tpu.memory_space<vmem>>, %arg3: memref<8x36x256xbf16, #tpu.memory_space<vmem>>, %arg4: memref<8x36x256xbf16, #tpu.memory_space<vmem>>, %arg5: memref<8x4x256xf32, #tpu.memory_space<vmem>>) attributes {dimension_semantics = [#tpu.dimension_semantics<parallel>, #tpu.dimension_semantics<parallel>], iteration_bounds = array<i64: 1, 1>, scalar_prefetch = 0 : i64, scratch_operands = 0 : i64, tpu.core_type = #tpu.core_type<tc>, window_params = [{transform_indices = @transform_0, window_bounds = array<i64: 8, 4, 256>}, {transform_indices = @transform_1, window_bounds = array<i64: 8, 36, 256>}, {transform_indices = @transform_2, window_bounds = array<i64: 8, 36, 256>}, {transform_indices = @transform_3, window_bounds = array<i64: 8, 4, 256>}]} {
    %c0 = arith.constant 0 : index
    %c0_0 = arith.constant 0 : index
    %c0_1 = arith.constant 0 : index
    %0 = vector.load %arg2[%c0, %c0_0, %c0_1] : memref<8x4x256xbf16, #tpu.memory_space<vmem>>, vector<8x1x256xbf16>
    %1 = arith.extf %0 : vector<8x1x256xbf16> to vector<8x1x256xf32>
    %c0_2 = arith.constant 0 : index
    %c0_3 = arith.constant 0 : index
    %c0_4 = arith.constant 0 : index
    %2 = vector.load %arg3[%c0_2, %c0_3, %c0_4] : memref<8x36x256xbf16, #tpu.memory_space<vmem>>, vector<8x9x256xbf16>
    %3 = arith.extf %2 : vector<8x9x256xbf16> to vector<8x9x256xf32>
    %4 = vector.broadcast %1 : vector<8x1x256xf32> to vector<8x9x256xf32>
    %5 = arith.mulf %4, %3 : vector<8x9x256xf32>
    %c0_5 = arith.constant 0 : index
    %c1 = arith.constant 1 : index
    %c0_6 = arith.constant 0 : index
    %6 = vector.load %arg2[%c0_5, %c1, %c0_6] : memref<8x4x256xbf16, #tpu.memory_space<vmem>>, vector<8x1x256xbf16>
    %7 = arith.extf %6 : vector<8x1x256xbf16> to vector<8x1x256xf32>
    %c0_7 = arith.constant 0 : index
    %c9 = arith.constant 9 : index
    %c0_8 = arith.constant 0 : index
    %8 = vector.load %arg3[%c0_7, %c9, %c0_8] : memref<8x36x256xbf16, #tpu.memory_space<vmem>>, vector<8x9x256xbf16>
    %9 = arith.extf %8 : vector<8x9x256xbf16> to vector<8x9x256xf32>
    %10 = vector.broadcast %7 : vector<8x1x256xf32> to vector<8x9x256xf32>
    %11 = arith.mulf %10, %9 : vector<8x9x256xf32>
    %12 = arith.addf %5, %11 : vector<8x9x256xf32>
    %c0_9 = arith.constant 0 : index
    %c2 = arith.constant 2 : index
    %c0_10 = arith.constant 0 : index
    %13 = vector.load %arg2[%c0_9, %c2, %c0_10] : memref<8x4x256xbf16, #tpu.memory_space<vmem>>, vector<8x1x256xbf16>
    %14 = arith.extf %13 : vector<8x1x256xbf16> to vector<8x1x256xf32>
    %c0_11 = arith.constant 0 : index
    %c18 = arith.constant 18 : index
    %c0_12 = arith.constant 0 : index
    %15 = vector.load %arg3[%c0_11, %c18, %c0_12] : memref<8x36x256xbf16, #tpu.memory_space<vmem>>, vector<8x9x256xbf16>
    %16 = arith.extf %15 : vector<8x9x256xbf16> to vector<8x9x256xf32>
    %17 = vector.broadcast %14 : vector<8x1x256xf32> to vector<8x9x256xf32>
    %18 = arith.mulf %17, %16 : vector<8x9x256xf32>
    %19 = arith.addf %12, %18 : vector<8x9x256xf32>
    %c0_13 = arith.constant 0 : index
    %c3 = arith.constant 3 : index
    %c0_14 = arith.constant 0 : index
    %20 = vector.load %arg2[%c0_13, %c3, %c0_14] : memref<8x4x256xbf16, #tpu.memory_space<vmem>>, vector<8x1x256xbf16>
    %21 = arith.extf %20 : vector<8x1x256xbf16> to vector<8x1x256xf32>
    %c0_15 = arith.constant 0 : index
    %c27 = arith.constant 27 : index
    %c0_16 = arith.constant 0 : index
    %22 = vector.load %arg3[%c0_15, %c27, %c0_16] : memref<8x36x256xbf16, #tpu.memory_space<vmem>>, vector<8x9x256xbf16>
    %23 = arith.extf %22 : vector<8x9x256xbf16> to vector<8x9x256xf32>
    %24 = vector.broadcast %21 : vector<8x1x256xf32> to vector<8x9x256xf32>
    %25 = arith.mulf %24, %23 : vector<8x9x256xf32>
    %26 = arith.addf %19, %25 : vector<8x9x256xf32>
    %cst = arith.constant dense<0xFF800000> : vector<8x256xf32>
    %27 = vector.multi_reduction <maximumf>, %26, %cst [1] : vector<8x9x256xf32> to vector<8x256xf32>
    %28 = vector.shape_cast %27 : vector<8x256xf32> to vector<8x1x256xf32>
    %29 = vector.broadcast %28 : vector<8x1x256xf32> to vector<8x9x256xf32>
    %30 = arith.subf %26, %29 : vector<8x9x256xf32>
    %31 = math.exp %30 : vector<8x9x256xf32>
    %cst_17 = arith.constant dense<0.000000e+00> : vector<8x256xf32>
    %32 = vector.multi_reduction <add>, %31, %cst_17 [1] : vector<8x9x256xf32> to vector<8x256xf32>
    %33 = vector.shape_cast %32 : vector<8x256xf32> to vector<8x1x256xf32>
    %34 = tpu.reciprocal %33 {approx = true} : vector<8x1x256xf32> -> vector<8x1x256xf32>
    %35 = vector.broadcast %34 : vector<8x1x256xf32> to vector<8x9x256xf32>
    %36 = arith.mulf %31, %35 : vector<8x9x256xf32>
    %c0_18 = arith.constant 0 : index
    %c0_19 = arith.constant 0 : index
    %c0_20 = arith.constant 0 : index
    %37 = vector.load %arg4[%c0_18, %c0_19, %c0_20] : memref<8x36x256xbf16, #tpu.memory_space<vmem>>, vector<8x9x256xbf16>
    %38 = arith.extf %37 : vector<8x9x256xbf16> to vector<8x9x256xf32>
    %39 = arith.mulf %36, %38 : vector<8x9x256xf32>
    %cst_21 = arith.constant dense<0.000000e+00> : vector<8x256xf32>
    %40 = vector.multi_reduction <add>, %39, %cst_21 [1] : vector<8x9x256xf32> to vector<8x256xf32>
    %41 = vector.shape_cast %40 : vector<8x256xf32> to vector<8x1x256xf32>
    %c0_22 = arith.constant 0 : index
    %c9_23 = arith.constant 9 : index
    %c0_24 = arith.constant 0 : index
    %42 = vector.load %arg4[%c0_22, %c9_23, %c0_24] : memref<8x36x256xbf16, #tpu.memory_space<vmem>>, vector<8x9x256xbf16>
    %43 = arith.extf %42 : vector<8x9x256xbf16> to vector<8x9x256xf32>
    %44 = arith.mulf %36, %43 : vector<8x9x256xf32>
    %cst_25 = arith.constant dense<0.000000e+00> : vector<8x256xf32>
    %45 = vector.multi_reduction <add>, %44, %cst_25 [1] : vector<8x9x256xf32> to vector<8x256xf32>
    %46 = vector.shape_cast %45 : vector<8x256xf32> to vector<8x1x256xf32>
    %c0_26 = arith.constant 0 : index
    %c18_27 = arith.constant 18 : index
    %c0_28 = arith.constant 0 : index
    %47 = vector.load %arg4[%c0_26, %c18_27, %c0_28] : memref<8x36x256xbf16, #tpu.memory_space<vmem>>, vector<8x9x256xbf16>
    %48 = arith.extf %47 : vector<8x9x256xbf16> to vector<8x9x256xf32>
    %49 = arith.mulf %36, %48 : vector<8x9x256xf32>
    %cst_29 = arith.constant dense<0.000000e+00> : vector<8x256xf32>
    %50 = vector.multi_reduction <add>, %49, %cst_29 [1] : vector<8x9x256xf32> to vector<8x256xf32>
    %51 = vector.shape_cast %50 : vector<8x256xf32> to vector<8x1x256xf32>
    %c0_30 = arith.constant 0 : index
    %c27_31 = arith.constant 27 : index
    %c0_32 = arith.constant 0 : index
    %52 = vector.load %arg4[%c0_30, %c27_31, %c0_32] : memref<8x36x256xbf16, #tpu.memory_space<vmem>>, vector<8x9x256xbf16>
    %53 = arith.extf %52 : vector<8x9x256xbf16> to vector<8x9x256xf32>
    %54 = arith.mulf %36, %53 : vector<8x9x256xf32>
    %cst_33 = arith.constant dense<0.000000e+00> : vector<8x256xf32>
    %55 = vector.multi_reduction <add>, %54, %cst_33 [1] : vector<8x9x256xf32> to vector<8x256xf32>
    %56 = vector.shape_cast %55 : vector<8x256xf32> to vector<8x1x256xf32>
    %57 = tpu.concatenate %41, %46, %51, %56 in 1 : vector<8x1x256xf32>, vector<8x1x256xf32>, vector<8x1x256xf32>, vector<8x1x256xf32> -> vector<8x4x256xf32>
    %c0_34 = arith.constant 0 : index
    %c0_35 = arith.constant 0 : index
    %c0_36 = arith.constant 0 : index
    %58 = vector.load %arg5[%c0_34, %c0_35, %c0_36] : memref<8x4x256xf32, #tpu.memory_space<vmem>>, vector<8x4x256xf32>
    tpu.vector_store %arg5[%c0_34, %c0_35, %c0_36], %57 {strides = array<i32>} : memref<8x4x256xf32, #tpu.memory_space<vmem>>, vector<8x4x256xf32>,
    return
  }
  func.func @transform_0(%arg0: i32, %arg1: i32) -> (i32, i32, i32) {
    %c0_i32 = arith.constant 0 : i32
    %c0_i32_0 = arith.constant 0 : i32
    return %arg0, %c0_i32, %arg1 : i32, i32, i32
  }
  func.func @transform_1(%arg0: i32, %arg1: i32) -> (i32, i32, i32) {
    %c0_i32 = arith.constant 0 : i32
    %c0_i32_0 = arith.constant 0 : i32
    return %arg0, %c0_i32, %arg1 : i32, i32, i32
  }
  func.func @transform_2(%arg0: i32, %arg1: i32) -> (i32, i32, i32) {
    %c0_i32 = arith.constant 0 : i32
    %c0_i32_0 = arith.constant 0 : i32
    return %arg0, %c0_i32, %arg1 : i32, i32, i32
  }
  func.func @transform_3(%arg0: i32, %arg1: i32) -> (i32, i32, i32) {
    %c0_i32 = arith.constant 0 : i32
    %c0_i32_0 = arith.constant 0 : i32
    return %arg0, %c0_i32, %arg1 : i32, i32, i32
  }
}

</mosaic_0001>

<bundles_post_ra>
// kernel: attention_conv_forward.2
= control target key start
LH: loop header
LB: loop body
LE: loop exit
PB: predicated region body
PF: predicated region fallthrough
CT: control target
= control target key end

     0   :  { %s723_s9 = smov 0   ;;  %s725_s10 = smov 0   ;;  %s819_s0 = inlined_call_operand.vmem [shape: bf16[2,4,256], index: 0, kind: input, shape index: {}]   ;;  %s820_s1 = inlined_call_operand.vmem [shape: bf16[48,4], index: 1, kind: input, shape index: {}]   ;;  %s821_s2 = inlined_call_operand.vmem [shape: f32[2,48,256], index: 2, kind: output, shape index: {}]  }
   0x1   :  { %s727_s11 = smov 0  }
   0x2 LB: > { %s24_s12 = sadd.s32 1, %s698_s10  ;;  %p562_p0 = scmp.ge.s32.totalorder %s702_s11, 1  ;;  %s702_s11 = sphi %s727_s11, %s12_s11   ;;  %s698_s10 = sphi %s725_s10, %s823_s10   ;;  %s694_s9 = sphi %s723_s9, %s822_s9  }
   0x3   : > { %p26_p1 = scmp.ge.s32.totalorder %s24_s12, 2  ;;  %p133_p2 = scmp.lt.s32.totalorder %s702_s11, 3 }
   0x5   : > { %s825_s12 = smov (%p26_p1, %s24_s12), 0  ;;  %p134_p3 = pnand %p562_p0, %p133_p2 }
   0x6   : > { %v582_v0 = vld [vmem:[%s820_s1 + $0x10] sm:$0xff] (!%p134_p3)   ;;  %v570_v1 = vld [vmem:[%s820_s1] sm:$0xff] (!%p134_p3)   ;;  %v581_v2 = vld [vmem:[%s820_s1 + $0x8] sm:$0xff] (!%p134_p3)   ;;  %v704_v3 = vmov (!%p134_p3), 0   ;;  %v705_v13 = vmov (!%p134_p3), 1   ;;  %v706_v14 = vmov (!%p134_p3), 2   ;;  %v228_v16 = vlaneseq (!%p134_p3) }
   0x7   : > { %137 = sbr.rel (%p134_p3) target bundleno = 174 (0xae), region = 28  ;;  %623 = vset.pattern.permute.xlu1 (!%p134_p3), %v704_v3  ;;  %612 = vset.pattern.permute.xlu0 (!%p134_p3), %v704_v3  ;;  %v579_v4 = vunpack.c.l.bf16 (!%p134_p3), %v582_v0  ;;  %v580_v5 = vunpack.c.h.bf16 (!%p134_p3), %v582_v0  ;;  %v571_v6 = vunpack.c.l.bf16 (!%p134_p3), %v570_v1  ;;  %v572_v7 = vunpack.c.h.bf16 (!%p134_p3), %v570_v1  ;;  %p164_p4 = scmp.lt.s32.totalorder (!%p134_p3), %s694_s9, 1 }
   0x8   : > { %v575_v8 = vunpack.c.l.bf16 (!%p134_p3), %v581_v2  ;;  %v576_v9 = vunpack.c.h.bf16 (!%p134_p3), %v581_v2  ;;  %v707_v15 = vmov (!%p134_p3), 3   ;;  %v229_v17 = vshrl.u32 (!%p134_p3), %v228_v16, 7 }
   0x9   : > { %v624_v10 = vpack.i.bf16 (!%p134_p3), %v580_v5, %v579_v4  ;;  %v613_v11 = vpack.i.bf16 (!%p134_p3), %v572_v7, %v571_v6 }
   0xa   : > { %v618_v12 = vpack.i.bf16 (!%p134_p3), %v576_v9, %v575_v8  ;;  %v230_v19 = vsub.s32 (!%p134_p3), 0, %v229_v17  ;;  %v234_v20 = vsub.s32 (!%p134_p3), 4, %v229_v17  ;;  %v284_v23 = vsub.s32 (!%p134_p3), 1, %v229_v17 }
   0xb   : > { %625 = vperm.xlu1 (!%p134_p3), %623, %v624_v10   ;;  %614 = vperm.xlu0 (!%p134_p3), %612, %v613_v11   ;;  %v288_v24 = vsub.s32 (!%p134_p3), 5, %v229_v17  ;;  %v353_v25 = vsub.s32 (!%p134_p3), 2, %v229_v17  ;;  %v357_v26 = vsub.s32 (!%p134_p3), 6, %v229_v17  ;;  %v419_v28 = vsub.s32 (!%p134_p3), 3, %v229_v17 }
   0xc   : > { %v423_v33 = vsub.s32 (!%p134_p3), 7, %v229_v17 }
   0xe   : > { %s827_s9 = smov (!%p164_p4, %s694_s9), 1 }
   0xf   : > { %629 = vset.pattern.permute.xlu1 %v705_v13  ;;  %619 = vperm.xlu0 %612, %v618_v12   ;;  %s568_s19 = sshll.u32 %s827_s9, 2  ;;  %s583_s23 = smul.u32 96, %s827_s9 }
  0x10   : > { %631 = vperm.xlu1 %629, %v613_v11   ;;  %s171_s22 = scalar_lea.vmem %s819_s0, %s568_s19 }
  0x11   : > { %v195_v18 = vld [vmem:[%s171_s22] sm:$0x5]  ;;  %v324_v22 = vld [vmem:[%s171_s22] sm:$0xa]  ;;  %s788_s26 = scalar_lea.vmem %s821_s2, %s583_s23 }
  0x12   : > { %v196_v21 = vunpack.c.l.bf16 %v195_v18  ;;  %v325_v27 = vunpack.c.l.bf16 %v324_v22 }
  0x13   : > { %635 = vset.pattern.permute.xlu0 %v705_v13 }
  0x14   : > { %642 = vperm.xlu1 %629, %v624_v10   ;;  %637 = vperm.xlu0 %635, %v618_v12   ;;  %v231_v30 = vrot.slane %v196_v21, %v230_v19  ;;  %v235_v31 = vrot.slane %v196_v21, %v234_v20  ;;  %v285_v34 = vrot.slane %v196_v21, %v284_v23 }
  0x15   : > { %v289_v35 = vrot.slane %v196_v21, %v288_v24  ;;  %v354_v36 = vrot.slane %v325_v27, %v353_v25  ;;  %v358_v37 = vrot.slane %v325_v27, %v357_v26  ;;  %v420_v38 = vrot.slane %v325_v27, %v419_v28 }
  0x16   : > { %v241_v40 = vrot.slane %v231_v30, %v230_v19  ;;  %v245_v41 = vrot.slane %v235_v31, %v230_v19  ;;  %v424_v43 = vrot.slane %v325_v27, %v423_v33  ;;  %v295_v49 = vrot.slane %v285_v34, %v284_v23 }
  0x17   : > { %v299_v50 = vrot.slane %v289_v35, %v284_v23  ;;  %v760_v51 = vrot.slane %v354_v36, %v353_v25  ;;  %v762_v52 = vrot.slane %v358_v37, %v353_v25  ;;  %v764_v53 = vrot.slane %v420_v38, %v419_v28 }
  0x18   : > { %646 = vset.pattern.permute.xlu1 %v706_v14  ;;  %652 = vset.pattern.permute.xlu0 %v706_v14  ;;  %v766_v57 = vrot.slane %v424_v43, %v419_v28 }
  0x19   : > { %648 = vperm.xlu1 %646, %v613_v11   ;;  %654 = vperm.xlu0 %652, %v618_v12  }
  0x1d   : > { %659 = vperm.xlu1 %646, %v624_v10   ;;  %669 = vset.pattern.permute.xlu0 %v707_v15 }
  0x1e   : > { %671 = vperm.xlu0 %669, %v618_v12  }
  0x21   : > { %663 = vset.pattern.permute.xlu1 %v707_v15 }
  0x22   : > { %665 = vperm.xlu1 %663, %v613_v11  }
  0x26   : > { %676 = vperm.xlu1 %663, %v624_v10  }
  0x8a   : > { %v626_v29 = vpop.permute.xlu1 %625  ;;  %v615_v32 = vpop.permute.xlu0 %614 }
  0x8b   : > { %v627_v39 = vunpack.i.l.bf16 %v626_v29  ;;  %v628_v44 = vunpack.i.h.bf16 %v626_v29  ;;  %v617_v46 = vunpack.i.h.bf16 %v615_v32  ;;  %v616_v47 = vunpack.i.l.bf16 %v615_v32 }
  0x8d   : > { %v254_v54 = vmul.f32 %v627_v39, %v241_v40  ;;  %v255_v55 = vmul.f32 %v627_v39, %v245_v41  ;;  %v256_v58 = vmul.f32 %v628_v44, %v241_v40  ;;  %v257_v59 = vmul.f32 %v628_v44, %v245_v41 }
  0x8e   : > { %v620_v42 = vpop.permute.xlu0 %619  ;;  %v246_v0 = vmul.f32 %v616_v47, %v241_v40  ;;  %v247_v1 = vmul.f32 %v616_v47, %v245_v41  ;;  %v248_v2 = vmul.f32 %v617_v46, %v241_v40  ;;  %v249_v8 = vmul.f32 %v617_v46, %v245_v41 }
  0x8f   : > { %v632_v45 = vpop.permute.xlu1 %631  ;;  %v622_v60 = vunpack.i.h.bf16 %v620_v42  ;;  %v621_v61 = vunpack.i.l.bf16 %v620_v42 }
  0x90   : > { %v633_v48 = vunpack.i.l.bf16 %v632_v45  ;;  %v634_v56 = vunpack.i.h.bf16 %v632_v45 }
  0x91   : > { %v250_v12 = vmul.f32 %v621_v61, %v241_v40  ;;  %v251_v13 = vmul.f32 %v621_v61, %v245_v41  ;;  %v252_v14 = vmul.f32 %v622_v60, %v241_v40  ;;  %v253_v15 = vmul.f32 %v622_v60, %v245_v41 }
  0x92   : > { %v300_v3 = vmul.f32 %v633_v48, %v295_v49  ;;  %v301_v4 = vmul.f32 %v633_v48, %v299_v50  ;;  %v302_v9 = vmul.f32 %v634_v56, %v295_v49  ;;  %v303_v10 = vmul.f32 %v634_v56, %v299_v50 }
  0x93   : > { %v643_v62 = vpop.permute.xlu1 %642  ;;  %v638_v63 = vpop.permute.xlu0 %637 }
  0x94   : > { %v645_v5 = vunpack.i.h.bf16 %v643_v62  ;;  %v644_v6 = vunpack.i.l.bf16 %v643_v62  ;;  %v639_v7 = vunpack.i.l.bf16 %v638_v63  ;;  %v640_v11 = vunpack.i.h.bf16 %v638_v63 }
  0x95   : > { %v312_v22 = vadd.f32 %v300_v3, %v246_v0  ;;  %v313_v23 = vadd.f32 %v301_v4, %v247_v1  ;;  %v314_v26 = vadd.f32 %v302_v9, %v248_v2  ;;  %v315_v27 = vadd.f32 %v303_v10, %v249_v8 }
  0x96   : > { %v308_v16 = vmul.f32 %v644_v6, %v295_v49  ;;  %v309_v17 = vmul.f32 %v644_v6, %v299_v50  ;;  %v310_v18 = vmul.f32 %v645_v5, %v295_v49  ;;  %v311_v19 = vmul.f32 %v645_v5, %v299_v50 }
  0x97   : > { %v304_v24 = vmul.f32 %v639_v7, %v295_v49  ;;  %v305_v25 = vmul.f32 %v639_v7, %v299_v50  ;;  %v306_v28 = vmul.f32 %v640_v11, %v295_v49  ;;  %v307_v29 = vmul.f32 %v640_v11, %v299_v50 }
  0x98   : > { %v649_v20 = vpop.permute.xlu1 %648  ;;  %v655_v21 = vpop.permute.xlu0 %654  ;;  %v320_v34 = vadd.f32 %v308_v16, %v254_v54  ;;  %v321_v35 = vadd.f32 %v309_v17, %v255_v55  ;;  %v322_v36 = vadd.f32 %v310_v18, %v256_v58  ;;  %v323_v37 = vadd.f32 %v311_v19, %v257_v59 }
  0x99   : > { %v651_v30 = vunpack.i.h.bf16 %v649_v20  ;;  %v650_v31 = vunpack.i.l.bf16 %v649_v20  ;;  %v657_v32 = vunpack.i.h.bf16 %v655_v21  ;;  %v656_v33 = vunpack.i.l.bf16 %v655_v21 }
  0x9a   : > { %v316_v39 = vadd.f32 %v304_v24, %v250_v12  ;;  %v317_v40 = vadd.f32 %v305_v25, %v251_v13  ;;  %v318_v48 = vadd.f32 %v306_v28, %v252_v14  ;;  %v319_v49 = vadd.f32 %v307_v29, %v253_v15 }
  0x9b   : > { %v369_v41 = vmul.f32 %v650_v31, %v760_v51  ;;  %v370_v42 = vmul.f32 %v650_v31, %v762_v52  ;;  %v373_v43 = vmul.f32 %v656_v33, %v760_v51  ;;  %v374_v44 = vmul.f32 %v656_v33, %v762_v52 }
  0x9c   : > { %v660_v38 = vpop.permute.xlu1 %659  ;;  %v375_v45 = vmul.f32 %v657_v32, %v760_v51  ;;  %v376_v46 = vmul.f32 %v657_v32, %v762_v52  ;;  %v371_v50 = vmul.f32 %v651_v30, %v760_v51  ;;  %v372_v54 = vmul.f32 %v651_v30, %v762_v52 }
  0x9d   : > { %v672_v47 = vpop.permute.xlu0 %671  ;;  %v381_v55 = vadd.f32 %v369_v41, %v312_v22  ;;  %v382_v56 = vadd.f32 %v370_v42, %v313_v23  ;;  %v385_v58 = vadd.f32 %v373_v43, %v316_v39  ;;  %v386_v59 = vadd.f32 %v374_v44, %v317_v40 }
  0x9e   : > { %v662_v60 = vunpack.i.h.bf16 %v660_v38  ;;  %v661_v61 = vunpack.i.l.bf16 %v660_v38  ;;  %v674_v62 = vunpack.i.h.bf16 %v672_v47  ;;  %v673_v63 = vunpack.i.l.bf16 %v672_v47 }
  0x9f   : > { %v387_v1 = vadd.f32 %v375_v45, %v318_v48  ;;  %v388_v2 = vadd.f32 %v376_v46, %v319_v49  ;;  %v383_v13 = vadd.f32 %v371_v50, %v314_v26  ;;  %v384_v14 = vadd.f32 %v372_v54, %v315_v27 }
  0xa0   : > { %v377_v5 = vmul.f32 %v661_v61, %v760_v51  ;;  %v378_v6 = vmul.f32 %v661_v61, %v762_v52  ;;  %v379_v7 = vmul.f32 %v662_v60, %v760_v51  ;;  %v380_v8 = vmul.f32 %v662_v60, %v762_v52 }
  0xa1   : > { %v666_v0 = vpop.permute.xlu1 %665  ;;  %v439_v9 = vmul.f32 %v673_v63, %v764_v53  ;;  %v440_v10 = vmul.f32 %v673_v63, %v766_v57  ;;  %v441_v11 = vmul.f32 %v674_v62, %v764_v53  ;;  %v442_v12 = vmul.f32 %v674_v62, %v766_v57 }
  0xa2   : > { %v668_v3 = vunpack.i.h.bf16 %v666_v0  ;;  %v667_v4 = vunpack.i.l.bf16 %v666_v0  ;;  %v389_v51 = vadd.f32 %v377_v5, %v320_v34  ;;  %v390_v52 = vadd.f32 %v378_v6, %v321_v35 }
  0xa3   : > { %v451_v16 = vadd.f32 %v439_v9, %v385_v58  ;;  %v452_v17 = vadd.f32 %v440_v10, %v386_v59  ;;  %v453_v18 = vadd.f32 %v441_v11, %v387_v1  ;;  %v454_v19 = vadd.f32 %v442_v12, %v388_v2 }
  0xa4   : > { %v435_v20 = vmul.f32 %v667_v4, %v764_v53  ;;  %v436_v21 = vmul.f32 %v667_v4, %v766_v57  ;;  %v437_v22 = vmul.f32 %v668_v3, %v764_v53  ;;  %v438_v23 = vmul.f32 %v668_v3, %v766_v57 }
  0xa5   : > { %v677_v15 = vpop.permute.xlu1 %676  ;;  %v391_v24 = vadd.f32 %v379_v7, %v322_v36  ;;  %v392_v25 = vadd.f32 %v380_v8, %v323_v37  ;;  %463 = vst [vmem:[%s788_s26 + $0x20] sm:$0xff] %v451_v16  ;;  %464 = vst [vmem:[%s788_s26 + $0x28] sm:$0xff] %v452_v17 }
  0xa6   : > { %465 = vst [vmem:[%s788_s26 + $0x30] sm:$0xff] %v453_v18  ;;  %466 = vst [vmem:[%s788_s26 + $0x38] sm:$0xff] %v454_v19  ;;  %v679_v26 = vunpack.i.h.bf16 %v677_v15  ;;  %v678_v27 = vunpack.i.l.bf16 %v677_v15  ;;  %v447_v28 = vadd.f32 %v435_v20, %v381_v55  ;;  %v448_v29 = vadd.f32 %v436_v21, %v382_v56 }
  0xa7   : > { %v449_v30 = vadd.f32 %v437_v22, %v383_v13  ;;  %v450_v31 = vadd.f32 %v438_v23, %v384_v14 }
  0xa8   : > { %v443_v32 = vmul.f32 %v678_v27, %v764_v53  ;;  %v444_v33 = vmul.f32 %v678_v27, %v766_v57  ;;  %v445_v34 = vmul.f32 %v679_v26, %v764_v53  ;;  %v446_v35 = vmul.f32 %v679_v26, %v766_v57  ;;  %459 = vst [vmem:[%s788_s26] sm:$0xff] %v447_v28 }
  0xa9   : > { %460 = vst [vmem:[%s788_s26 + $0x8] sm:$0xff] %v448_v29  ;;  %461 = vst [vmem:[%s788_s26 + $0x10] sm:$0xff] %v449_v30 }
  0xaa   : > { %462 = vst [vmem:[%s788_s26 + $0x18] sm:$0xff] %v450_v31  ;;  %v455_v36 = vadd.f32 %v443_v32, %v389_v51  ;;  %v456_v37 = vadd.f32 %v444_v33, %v390_v52  ;;  %v457_v38 = vadd.f32 %v445_v34, %v391_v24  ;;  %v458_v39 = vadd.f32 %v446_v35, %v392_v25 }
  0xac   : > { %467 = vst [vmem:[%s788_s26 + $0x40] sm:$0xff] %v455_v36  ;;  %468 = vst [vmem:[%s788_s26 + $0x48] sm:$0xff] %v456_v37 }
  0xad   : > { %469 = vst [vmem:[%s788_s26 + $0x50] sm:$0xff] %v457_v38  ;;  %470 = vst [vmem:[%s788_s26 + $0x58] sm:$0xff] %v458_v39 }
  0xae PF: > { %s12_s11 = sadd.s32 1, %s702_s11   ;;  %s822_s9 = smov %s698_s10 }
  0xaf   : > { %p9_p5 = scmp.ge.s32.totalorder %s12_s11, 4   ;;  %s823_s10 = smov %s825_s12 }
  0xb1   :  { %11 = sbr.rel (!%p9_p5) target bundleno = 2 (0x2), region = 58 }

// kernel: attention_conv_forward.3
= control target key start
LH: loop header
LB: loop body
LE: loop exit
PB: predicated region body
PF: predicated region fallthrough
CT: control target
= control target key end

     0   :  { %v86_v3 = vlaneseq  ;;  %vm518_vm0 = vcmask 1046528   ;;  %vm911_vm1 = vcmask 1045504   ;;  %vm1280_vm2 = vcmask 1044480   ;;  %s6024_s0 = inlined_call_operand.vmem [shape: bf16[8,4,256], index: 0, kind: input, shape index: {}]   ;;  %s6025_s1 = inlined_call_operand.vmem [shape: bf16[8,36,256], index: 1, kind: input, shape index: {}]   ;;  %s6026_s2 = inlined_call_operand.vmem [shape: bf16[8,36,256], index: 2, kind: input, shape index: {}]   ;;  %s6027_s3 = inlined_call_operand.vmem [shape: f32[8,4,256], index: 3, kind: output, shape index: {}]  }
   0x1   :  { %v14_v0 = vld [vmem:[%s6024_s0] sm:$0x5]  ;;  %v15_v1 = vld [vmem:[%s6024_s0 + $0x4] sm:$0x5]  ;;  %v16_v2 = vld [vmem:[%s6024_s0 + $0x8] sm:$0x5] }
   0x2   :  { %v17_v4 = vld [vmem:[%s6024_s0 + $0xc] sm:$0x5]  ;;  %v18_v5 = vld [vmem:[%s6024_s0 + $0x10] sm:$0x5]  ;;  %v19_v6 = vld [vmem:[%s6024_s0 + $0x14] sm:$0x5]  ;;  %v3201_v10 = vunpack.c.l.bf16 %v14_v0  ;;  %v3203_v11 = vunpack.c.l.bf16 %v15_v1  ;;  %v3205_v12 = vunpack.c.l.bf16 %v16_v2 }
   0x3   :  { %v20_v7 = vld [vmem:[%s6024_s0 + $0x18] sm:$0x5]  ;;  %v21_v8 = vld [vmem:[%s6024_s0 + $0x1c] sm:$0x5]  ;;  %v3199_v9 = vld [vmem:[%s6025_s1] sm:$0xff]  ;;  %v3217_v15 = vunpack.c.l.bf16 %v17_v4  ;;  %v3219_v16 = vunpack.c.l.bf16 %v18_v5  ;;  %v3221_v17 = vunpack.c.l.bf16 %v19_v6  ;;  %v3233_v20 = vshrl.u32 %v86_v3, 7 }
   0x4   :  { %v3210_v13 = vld [vmem:[%s6025_s1 + $0x8] sm:$0x11]  ;;  %v3226_v18 = vld [vmem:[%s6025_s1 + $0x30] sm:$0x11]  ;;  %v3235_v21 = vunpack.c.l.bf16 %v20_v7  ;;  %v3237_v22 = vunpack.c.l.bf16 %v21_v8  ;;  %v3242_v23 = vld [vmem:[%s6025_s1 + $0x58] sm:$0x11]  ;;  %v46_v25 = vunpack.c.l.bf16 %v3199_v9  ;;  %v47_v26 = vunpack.c.h.bf16 %v3199_v9 }
   0x5   :  { %v3215_v14 = vld [vmem:[%s6025_s1 + $0x28] sm:$0xff]  ;;  %v3231_v19 = vld [vmem:[%s6025_s1 + $0x50] sm:$0xff]  ;;  %6131 = vst [vmem:[#allocation2_spill] sm:$0xff] %v3233_v20  ;;  %v3247_v24 = vld [vmem:[%s6025_s1 + $0x78] sm:$0xff]  ;;  %v88_v58 = vsub.s32 0, %v3233_v20  ;;  %v92_v59 = vsub.s32 4, %v3233_v20  ;;  %v6136_v9 = vunpack.c.l.bf16 %v3226_v18 }
   0x6   :  { %v3254_v27 = vld [vmem:[%s6025_s1 + $0x80] sm:$0x11]  ;;  %v3268_v33 = vld [vmem:[%s6025_s1 + $0xa8] sm:$0x11]  ;;  %v3282_v39 = vld [vmem:[%s6025_s1 + $0xd0] sm:$0x11] }
   0x7   :  { %v3259_v28 = vld [vmem:[%s6025_s1 + $0xa0] sm:$0xff]  ;;  %v3273_v34 = vld [vmem:[%s6025_s1 + $0xc8] sm:$0xff]  ;;  %v3291_v44 = vld [vmem:[%s6025_s1 + $0xf0] sm:$0xff]  ;;  %v89_v0 = vrot.slane %v3201_v10, %v88_v58  ;;  %v93_v1 = vrot.slane %v3201_v10, %v92_v59  ;;  %v97_v2 = vrot.slane %v3203_v11, %v88_v58  ;;  %v101_v3 = vrot.slane %v3203_v11, %v92_v59 }
   0x8   :  { %v3296_v45 = vld [vmem:[%s6025_s1 + $0xf8] sm:$0x11]  ;;  %v3310_v51 = vld [vmem:[%s6025_s1 + $0x120] sm:$0x11]  ;;  %v3323_v60 = vld [vmem:[%s6025_s1 + $0x8] sm:$0xff]  ;;  %v105_v4 = vrot.slane %v3205_v12, %v88_v58  ;;  %v109_v5 = vrot.slane %v3205_v12, %v92_v59  ;;  %v113_v6 = vrot.slane %v3217_v15, %v88_v58  ;;  %v117_v7 = vrot.slane %v3217_v15, %v92_v59 }
   0x9   :  { %v3305_v50 = vld [vmem:[%s6025_s1 + $0x118] sm:$0xff]  ;;  %v3328_v61 = vld [vmem:[%s6025_s1 + $0x10] sm:$0x11]  ;;  %v121_v8 = vrot.slane %v3219_v16, %v88_v58  ;;  %v125_v63 = vrot.slane %v3219_v16, %v92_v59  ;;  %v129_v62 = vrot.slane %v3221_v17, %v88_v58  ;;  %v133_v57 = vrot.slane %v3221_v17, %v92_v59 }
   0xa   :  { %v137_v56 = vrot.slane %v3235_v21, %v88_v58  ;;  %v141_v55 = vrot.slane %v3235_v21, %v92_v59  ;;  %v145_v54 = vrot.slane %v3237_v22, %v88_v58  ;;  %v149_v53 = vrot.slane %v3237_v22, %v92_v59 }
   0xb   :  { %v169_v52 = vrot.slane %v89_v0, %v88_v58  ;;  %v173_v49 = vrot.slane %v93_v1, %v88_v58  ;;  %v177_v48 = vrot.slane %v97_v2, %v88_v58  ;;  %v181_v47 = vrot.slane %v101_v3, %v88_v58 }
   0xc   :  { %v185_v46 = vrot.slane %v105_v4, %v88_v58  ;;  %v189_v43 = vrot.slane %v109_v5, %v88_v58  ;;  %v193_v42 = vrot.slane %v113_v6, %v88_v58  ;;  %v197_v41 = vrot.slane %v117_v7, %v88_v58 }
   0xd   :  { %v201_v40 = vrot.slane %v121_v8, %v88_v58  ;;  %v205_v38 = vrot.slane %v125_v63, %v88_v58  ;;  %v209_v37 = vrot.slane %v129_v62, %v88_v58  ;;  %v213_v36 = vrot.slane %v133_v57, %v88_v58 }
   0xe   :  { %v217_v35 = vrot.slane %v137_v56, %v88_v58  ;;  %v221_v32 = vrot.slane %v141_v55, %v88_v58  ;;  %v225_v31 = vrot.slane %v145_v54, %v88_v58  ;;  %v229_v30 = vrot.slane %v149_v53, %v88_v58 }
   0xf   :  { %v3360_v29 = vmul.f32 %v169_v52, %v46_v25  ;;  %v3364_v59 = vmul.f32 %v173_v49, %v47_v26  ;;  %v6132_v0 = vunpack.c.l.bf16 %v3210_v13  ;;  %v6133_v63 = vunpack.c.h.bf16 %v3210_v13 }
  0x10   :  { %v6134_v55 = vunpack.c.l.bf16 %v3215_v14  ;;  %v6135_v53 = vunpack.c.h.bf16 %v3215_v14  ;;  %v3384_v26 = vmul.f32 %v177_v48, %v6136_v9  ;;  %v6137_v56 = vunpack.c.h.bf16 %v3226_v18 }
  0x11   :  { %v3368_v1 = vmul.f32 %v169_v52, %v6132_v0  ;;  %v3372_v62 = vmul.f32 %v173_v49, %v6133_v63  ;;  %v6138_v13 = vunpack.c.l.bf16 %v3231_v19  ;;  %v6139_v57 = vunpack.c.h.bf16 %v3231_v19 }
  0x12   :  { %v3376_v54 = vmul.f32 %v177_v48, %v6134_v55  ;;  %v3380_v25 = vmul.f32 %v181_v47, %v6135_v53  ;;  %v3388_v52 = vmul.f32 %v181_v47, %v6137_v56  ;;  %v6140_v14 = vunpack.c.l.bf16 %v3242_v23 }
  0x13   :  { %v3392_v49 = vmul.f32 %v185_v46, %v6138_v13  ;;  %v3396_v58 = vmul.f32 %v189_v43, %v6139_v57  ;;  %v6141_v3 = vunpack.c.h.bf16 %v3242_v23  ;;  %v6142_v18 = vunpack.c.l.bf16 %v3247_v24 }
  0x14   :  { %v3400_v2 = vmul.f32 %v185_v46, %v6140_v14  ;;  %v6144_v4 = vunpack.c.h.bf16 %v3247_v24  ;;  %v6146_v19 = vunpack.c.l.bf16 %v3254_v27  ;;  %v6148_v7 = vunpack.c.h.bf16 %v3254_v27 }
  0x15   :  { %v3404_v48 = vmul.f32 %v189_v43, %v6141_v3  ;;  %v3408_v47 = vmul.f32 %v193_v42, %v6142_v18  ;;  %v6150_v23 = vunpack.c.l.bf16 %v3259_v28  ;;  %v6152_v8 = vunpack.c.h.bf16 %v3259_v28 }
  0x16   :  { %v3412_v5 = vmul.f32 %v197_v41, %v6144_v4  ;;  %v3416_v6 = vmul.f32 %v193_v42, %v6146_v19  ;;  %v3420_v46 = vmul.f32 %v197_v41, %v6148_v7  ;;  %v6154_v24 = vunpack.c.l.bf16 %v3268_v33  ;;  %v3483_v4 = vld [vmem:[%s6025_s1 + $0x58] sm:$0xff]  ;;  %v3488_v19 = vld [vmem:[%s6025_s1 + $0x60] sm:$0x11] }
  0x17   :  { %6143 = vst [vmem:[#allocation3_spill] sm:$0xff] %v3408_v47  ;;  %v3424_v43 = vmul.f32 %v201_v40, %v6150_v23  ;;  %v3428_v0 = vmul.f32 %v205_v38, %v6152_v8  ;;  %v6156_v55 = vunpack.c.h.bf16 %v3268_v33  ;;  %v6158_v27 = vunpack.c.l.bf16 %v3273_v34  ;;  %v3457_v33 = vld [vmem:[%s6025_s1 + $0x30] sm:$0xff] }
  0x18   :  { %6145 = vst [vmem:[#allocation4_spill] sm:$0xff] %v3412_v5  ;;  %6147 = vst [vmem:[#allocation5_spill] sm:$0xff] %v3416_v6  ;;  %v3432_v63 = vmul.f32 %v201_v40, %v6154_v24  ;;  %v6160_v53 = vunpack.c.h.bf16 %v3273_v34  ;;  %v6162_v28 = vunpack.c.l.bf16 %v3282_v39  ;;  %v6164_v13 = vunpack.c.h.bf16 %v3282_v39 }
  0x19   :  { %6149 = vst [vmem:[#allocation6_spill] sm:$0xff] %v3420_v46  ;;  %6151 = vst [vmem:[#allocation7_spill] sm:$0xff] %v3424_v43  ;;  %v3436_v42 = vmul.f32 %v205_v38, %v6156_v55  ;;  %v3440_v41 = vmul.f32 %v209_v37, %v6158_v27  ;;  %v3462_v38 = vld [vmem:[%s6025_s1 + $0x38] sm:$0x11]  ;;  %v6166_v34 = vunpack.c.l.bf16 %v3291_v44  ;;  %v6172_v3 = vunpack.c.h.bf16 %v3296_v45  ;;  %v3509_v55 = vld [vmem:[%s6025_s1 + $0x80] sm:$0xff] }
  0x1a   :  { %6153 = vst [vmem:[#allocation8_spill] sm:$0xff] %v3428_v0  ;;  %6155 = vst [vmem:[#allocation9_spill] sm:$0xff] %v3432_v63  ;;  %v3444_v9 = vmul.f32 %v213_v36, %v6160_v53  ;;  %v3448_v56 = vmul.f32 %v209_v37, %v6162_v28  ;;  %v3452_v40 = vmul.f32 %v213_v36, %v6164_v13  ;;  %v6168_v37 = vunpack.c.h.bf16 %v3291_v44  ;;  %v3514_v27 = vld [vmem:[%s6025_s1 + $0x88] sm:$0x11]  ;;  %v3533_v13 = vld [vmem:[%s6025_s1 + $0xd0] sm:$0xff] }
  0x1b   :  { %6157 = vst [vmem:[#allocation10_spill] sm:$0xff] %v3436_v42  ;;  %6159 = vst [vmem:[#allocation11_spill] sm:$0xff] %v3440_v41  ;;  %v3466_v57 = vmul.f32 %v217_v35, %v6166_v34  ;;  %v6170_v36 = vunpack.c.l.bf16 %v3296_v45  ;;  %v3478_v18 = vmul.f32 %v221_v32, %v6172_v3  ;;  %v6174_v44 = vunpack.c.l.bf16 %v3305_v50  ;;  %v3538_v34 = vld [vmem:[%s6025_s1 + $0xd8] sm:$0x11]  ;;  %v3566_v28 = vld [vmem:[%s6025_s1 + $0x128] sm:$0x11] }
  0x1c   :  { %6161 = vst [vmem:[#allocation12_spill] sm:$0xff] %v3444_v9  ;;  %6163 = vst [vmem:[#allocation13_spill] sm:$0xff] %v3448_v56  ;;  %v3470_v14 = vmul.f32 %v221_v32, %v6168_v37  ;;  %v6178_v32 = vunpack.c.l.bf16 %v3310_v51  ;;  %v6180_v8 = vunpack.c.h.bf16 %v3310_v51  ;;  %v631_v3 = vld [vmem:[%s6024_s0] sm:$0xa]  ;;  %v634_v37 = vld [vmem:[%s6024_s0 + $0xc] sm:$0xa]  ;;  %v6188_v47 = vunpack.c.l.bf16 %v3323_v60 }
  0x1d   :  { %6165 = vst [vmem:[#allocation14_spill] sm:$0xff] %v3452_v40  ;;  %6167 = vst [vmem:[#allocation15_spill] sm:$0xff] %v3466_v57  ;;  %v3474_v39 = vmul.f32 %v217_v35, %v6170_v36  ;;  %v3492_v7 = vmul.f32 %v225_v31, %v6174_v44  ;;  %v6176_v35 = vunpack.c.h.bf16 %v3305_v50  ;;  %v3519_v50 = vld [vmem:[%s6025_s1 + $0xa8] sm:$0xff]  ;;  %v3561_v44 = vld [vmem:[%s6025_s1 + $0x120] sm:$0xff]  ;;  %v3610_v56 = vunpack.c.l.bf16 %v634_v37 }
  0x1e   :  { %6169 = vst [vmem:[#allocation16_spill] sm:$0xff] %v3470_v14  ;;  %6173 = vst [vmem:[#allocation18_spill] sm:$0xff] %v3478_v18  ;;  %v3500_v45 = vmul.f32 %v225_v31, %v6178_v32  ;;  %v3504_v24 = vmul.f32 %v229_v30, %v6180_v8  ;;  %v3552_v32 = vld [vmem:[%s6025_s1 + $0x100] sm:$0x11]  ;;  %v632_v8 = vld [vmem:[%s6024_s0 + $0x4] sm:$0xa]  ;;  %v3604_v14 = vunpack.c.l.bf16 %v631_v3 }
  0x1f   :  { %6171 = vst [vmem:[#allocation17_spill] sm:$0xff] %v3474_v39  ;;  %6175 = vst [vmem:[#allocation19_spill] sm:$0xff] %v3492_v7  ;;  %v3496_v23 = vmul.f32 %v229_v30, %v6176_v35  ;;  %v3524_v30 = vld [vmem:[%s6025_s1 + $0xb0] sm:$0x11]  ;;  %v3547_v35 = vld [vmem:[%s6025_s1 + $0xf8] sm:$0xff]  ;;  %v3606_v57 = vunpack.c.l.bf16 %v632_v8  ;;  %vm1393_vm3 = vcmask 1040384  }
  0x20   :  { %6179 = vst [vmem:[#allocation21_spill] sm:$0xff] %v3500_v45  ;;  %6181 = vst [vmem:[#allocation22_spill] sm:$0xff] %v3504_v24  ;;  %v633_v36 = vld [vmem:[%s6024_s0 + $0x8] sm:$0xa]  ;;  %v312_v24 = vsub.s32 1, %v3233_v20  ;;  %v316_v45 = vsub.s32 5, %v3233_v20 }
  0x21   :  { %6177 = vst [vmem:[#allocation20_spill] sm:$0xff] %v3496_v23  ;;  %v635_v53 = vld [vmem:[%s6024_s0 + $0x10] sm:$0xa]  ;;  %v636_v23 = vld [vmem:[%s6024_s0 + $0x14] sm:$0xa]  ;;  %6182 = vst [vmem:[#allocation23_spill] sm:$0xff] %v3604_v14  ;;  %v3608_v40 = vunpack.c.l.bf16 %v633_v36 }
  0x22   :  { %6183 = vst [vmem:[#allocation24_spill] sm:$0xff] %v3606_v57  ;;  %6185 = vst [vmem:[#allocation26_spill] sm:$0xff] %v3610_v56  ;;  %v3612_v9 = vunpack.c.l.bf16 %v635_v53  ;;  %v3614_v7 = vunpack.c.l.bf16 %v636_v23  ;;  %v313_v51 = vrot.slane %v3201_v10, %v312_v24  ;;  %v317_v31 = vrot.slane %v3201_v10, %v316_v45 }
  0x23   :  { %6184 = vst [vmem:[#allocation25_spill] sm:$0xff] %v3608_v40  ;;  %v321_v39 = vrot.slane %v3203_v11, %v312_v24  ;;  %v325_v20 = vrot.slane %v3203_v11, %v316_v45  ;;  %v329_v3 = vrot.slane %v3205_v12, %v312_v24  ;;  %v333_v8 = vrot.slane %v3205_v12, %v316_v45 }
  0x24   :  { %6186 = vst [vmem:[#allocation27_spill] sm:$0xff] %v3612_v9  ;;  %6187 = vst [vmem:[#allocation28_spill] sm:$0xff] %v3614_v7  ;;  %v337_v36 = vrot.slane %v3217_v15, %v312_v24  ;;  %v341_v37 = vrot.slane %v3217_v15, %v316_v45  ;;  %v345_v53 = vrot.slane %v3219_v16, %v312_v24  ;;  %vm2978_vm4 = vcmask 1041408  }
  0x25   :  { %v349_v23 = vrot.slane %v3219_v16, %v316_v45  ;;  %v353_v18 = vrot.slane %v3221_v17, %v312_v24  ;;  %v357_v10 = vrot.slane %v3221_v17, %v316_v45  ;;  %v361_v7 = vrot.slane %v3235_v21, %v312_v24 }
  0x26   :  { %v365_v11 = vrot.slane %v3235_v21, %v316_v45  ;;  %v369_v9 = vrot.slane %v3237_v22, %v312_v24  ;;  %v373_v12 = vrot.slane %v3237_v22, %v316_v45  ;;  %v393_v56 = vrot.slane %v313_v51, %v312_v24 }
  0x27   :  { %v397_v40 = vrot.slane %v317_v31, %v312_v24  ;;  %v401_v57 = vrot.slane %v321_v39, %v312_v24  ;;  %v405_v15 = vrot.slane %v325_v20, %v312_v24  ;;  %v409_v14 = vrot.slane %v329_v3, %v312_v24 }
  0x28   :  { %v413_v41 = vrot.slane %v333_v8, %v312_v24  ;;  %v417_v42 = vrot.slane %v337_v36, %v312_v24  ;;  %v421_v16 = vrot.slane %v341_v37, %v312_v24  ;;  %v425_v63 = vrot.slane %v345_v53, %v312_v24 }
  0x29   :  { %v429_v0 = vrot.slane %v349_v23, %v312_v24  ;;  %v433_v43 = vrot.slane %v353_v18, %v312_v24  ;;  %v437_v17 = vrot.slane %v357_v10, %v312_v24  ;;  %v441_v46 = vrot.slane %v361_v7, %v312_v24 }
  0x2a   :  { %v445_v6 = vrot.slane %v365_v11, %v312_v24  ;;  %v449_v5 = vrot.slane %v369_v9, %v312_v24  ;;  %v453_v21 = vrot.slane %v373_v12, %v312_v24  ;;  %v454_v22 = vmul.f32 %v393_v56, %v6188_v47 }
  0x2b   :  { %v6189_v45 = vunpack.c.h.bf16 %v3323_v60  ;;  %v6190_v20 = vunpack.c.l.bf16 %v3328_v61  ;;  %v6191_v51 = vunpack.c.h.bf16 %v3328_v61  ;;  %v6192_v18 = vunpack.c.l.bf16 %v3457_v33 }
  0x2c   :  { %v6193_v9 = vunpack.c.h.bf16 %v3457_v33  ;;  %v6194_v8 = vunpack.c.l.bf16 %v3462_v38  ;;  %v6195_v60 = vunpack.c.h.bf16 %v3462_v38  ;;  %v6197_v61 = vunpack.c.h.bf16 %v3483_v4 }
  0x2d   :  { %v455_v39 = vmul.f32 %v397_v40, %v6189_v45  ;;  %v3638_v31 = vmul.f32 %v393_v56, %v6190_v20  ;;  %v3642_v3 = vmul.f32 %v397_v40, %v6191_v51  ;;  %v458_v7 = vmul.f32 %v401_v57, %v6192_v18 }
  0x2e   :  { %v459_v24 = vmul.f32 %v405_v15, %v6193_v9  ;;  %v3650_v47 = vmul.f32 %v401_v57, %v6194_v8  ;;  %v3654_v36 = vmul.f32 %v405_v15, %v6195_v60  ;;  %v6196_v56 = vunpack.c.l.bf16 %v3483_v4 }
  0x2f   :  { %v463_v40 = vmul.f32 %v413_v41, %v6197_v61  ;;  %v6198_v53 = vunpack.c.l.bf16 %v3488_v19  ;;  %v6199_v33 = vunpack.c.h.bf16 %v3488_v19  ;;  %v6200_v57 = vunpack.c.l.bf16 %v3509_v55 }
  0x30   :  { %v462_v37 = vmul.f32 %v409_v14, %v6196_v56  ;;  %v6201_v38 = vunpack.c.h.bf16 %v3509_v55  ;;  %v6202_v15 = vunpack.c.l.bf16 %v3514_v27  ;;  %v6203_v4 = vunpack.c.h.bf16 %v3514_v27 }
  0x31   :  { %v3662_v23 = vmul.f32 %v409_v14, %v6198_v53  ;;  %v3666_v10 = vmul.f32 %v413_v41, %v6199_v33  ;;  %v466_v11 = vmul.f32 %v417_v42, %v6200_v57  ;;  %v6204_v14 = vunpack.c.l.bf16 %v3519_v50 }
  0x32   :  { %v467_v12 = vmul.f32 %v421_v16, %v6201_v38  ;;  %v3674_v45 = vmul.f32 %v417_v42, %v6202_v15  ;;  %v3678_v20 = vmul.f32 %v421_v16, %v6203_v4  ;;  %v6205_v41 = vunpack.c.h.bf16 %v3519_v50 }
  0x33   :  { %v470_v51 = vmul.f32 %v425_v63, %v6204_v14  ;;  %v6206_v18 = vunpack.c.l.bf16 %v3524_v30  ;;  %v6207_v55 = vunpack.c.h.bf16 %v3524_v30  ;;  %v6208_v42 = vunpack.c.l.bf16 %v3533_v13 }
  0x34   :  { %v471_v19 = vmul.f32 %v429_v0, %v6205_v41  ;;  %v6209_v27 = vunpack.c.h.bf16 %v3533_v13  ;;  %v6210_v56 = vunpack.c.l.bf16 %v3538_v34  ;;  %v6211_v50 = vunpack.c.h.bf16 %v3538_v34 }
  0x35   :  { %v3686_v9 = vmul.f32 %v425_v63, %v6206_v18  ;;  %v3690_v8 = vmul.f32 %v429_v0, %v6207_v55  ;;  %v474_v60 = vmul.f32 %v433_v43, %v6208_v42  ;;  %v519_v63 = vrot.slane %v454_v22, 1 }
  0x36   :  { %v475_v16 = vmul.f32 %v437_v17, %v6209_v27  ;;  %v3698_v61 = vmul.f32 %v433_v43, %v6210_v56  ;;  %v3702_v53 = vmul.f32 %v437_v17, %v6211_v50  ;;  %v520_v33 = vrot.slane %v3638_v31, 1 }
  0x37   :  { %v522_v30 = vrot.slane %v455_v39, 1  ;;  %v523_v0 = vrot.slane %v3642_v3, 1  ;;  %v525_v57 = vrot.slane %v458_v7, 1  ;;  %v526_v38 = vrot.slane %v3650_v47, 1 }
  0x38   :  { %v528_v15 = vrot.slane %v459_v24, 1  ;;  %v529_v13 = vrot.slane %v3654_v36, 1  ;;  %v6212_v4 = vunpack.c.l.bf16 %v3547_v35  ;;  %v6213_v14 = vunpack.c.h.bf16 %v3547_v35 }
  0x39   :  { %v6214_v17 = vunpack.c.l.bf16 %v3552_v32  ;;  %v6215_v39 = vunpack.c.h.bf16 %v3552_v32  ;;  %v6216_v3 = vunpack.c.l.bf16 %v3561_v44  ;;  %v6217_v24 = vunpack.c.h.bf16 %v3561_v44 }
  0x3a   :  { %v478_v43 = vmul.f32 %v441_v46, %v6212_v4  ;;  %v479_v34 = vmul.f32 %v445_v6, %v6213_v14  ;;  %v6218_v36 = vunpack.c.l.bf16 %v3566_v28  ;;  %v6219_v35 = vunpack.c.h.bf16 %v3566_v28 }
  0x3b   :  { %v3714_v22 = vmul.f32 %v441_v46, %v6214_v17  ;;  %v3718_v31 = vmul.f32 %v445_v6, %v6215_v39  ;;  %v482_v7 = vmul.f32 %v449_v5, %v6216_v3  ;;  %v483_v47 = vmul.f32 %v453_v21, %v6217_v24 }
  0x3c   :  { %v3726_v41 = vmul.f32 %v449_v5, %v6218_v36  ;;  %v3730_v18 = vmul.f32 %v453_v21, %v6219_v35  ;;  %v521_v46 = vsel %vm518_vm0, %v519_v63, %v520_v33  ;;  %v524_v32 = vsel %vm518_vm0, %v522_v30, %v523_v0 }
  0x3d   :  { %v531_v6 = vrot.slane %v462_v37, 1  ;;  %v532_v55 = vrot.slane %v3662_v23, 1  ;;  %v527_v42 = vsel %vm518_vm0, %v525_v57, %v526_v38  ;;  %v530_v44 = vsel %vm518_vm0, %v528_v15, %v529_v13 }
  0x3e   :  { %v534_v27 = vrot.slane %v463_v40, 1  ;;  %v535_v56 = vrot.slane %v3666_v10, 1  ;;  %v537_v5 = vrot.slane %v466_v11, 1  ;;  %v538_v50 = vrot.slane %v3674_v45, 1 }
  0x3f   :  { %v540_v28 = vrot.slane %v467_v12, 1  ;;  %v541_v21 = vrot.slane %v3678_v20, 1  ;;  %v543_v4 = vrot.slane %v470_v51, 1  ;;  %v544_v63 = vrot.slane %v3686_v9, 1 }
  0x40   :  { %v546_v30 = vrot.slane %v471_v19, 1  ;;  %v547_v37 = vrot.slane %v3690_v8, 1  ;;  %v549_v23 = vrot.slane %v474_v60, 1  ;;  %v550_v57 = vrot.slane %v3698_v61, 1 }
  0x41   :  { %v552_v14 = vrot.slane %v475_v16, 1  ;;  %v553_v40 = vrot.slane %v3702_v53, 1  ;;  %v555_v15 = vrot.slane %v478_v43, 1  ;;  %v556_v10 = vrot.slane %v3714_v22, 1 }
  0x42   :  { %v558_v11 = vrot.slane %v479_v34, 1  ;;  %v559_v12 = vrot.slane %v3718_v31, 1  ;;  %v533_v45 = vsel %vm518_vm0, %v531_v6, %v532_v55  ;;  %v536_v20 = vsel %vm518_vm0, %v534_v27, %v535_v56  ;;  %v6234_v6 = vld [vmem:[#allocation10_spill] sm:$0xff]  ;;  %v6238_v27 = vld [vmem:[#allocation12_spill] sm:$0xff] }
  0x43   :  { %v561_v51 = vrot.slane %v482_v7, 1  ;;  %v562_v19 = vrot.slane %v3726_v41, 1  ;;  %v539_v9 = vsel %vm518_vm0, %v537_v5, %v538_v50  ;;  %v542_v8 = vsel %vm518_vm0, %v540_v28, %v541_v21  ;;  %v6240_v5 = vld [vmem:[#allocation13_spill] sm:$0xff]  ;;  %v6242_v28 = vld [vmem:[#allocation14_spill] sm:$0xff] }
  0x44   :  { %v564_v60 = vrot.slane %v483_v47, 1  ;;  %v565_v16 = vrot.slane %v3730_v18, 1  ;;  %v545_v61 = vsel %vm518_vm0, %v543_v4, %v544_v63  ;;  %v548_v53 = vsel %vm518_vm0, %v546_v30, %v547_v37  ;;  %v637_v4 = vld [vmem:[%s6024_s0 + $0x18] sm:$0xa]  ;;  %v3841_v30 = vld [vmem:[%s6025_s1 + $0x10] sm:$0xee] }
  0x45   :  { %v551_v43 = vsel %vm518_vm0, %v549_v23, %v550_v57  ;;  %v554_v34 = vsel %vm518_vm0, %v552_v14, %v553_v40  ;;  %v557_v17 = vsel %vm518_vm0, %v555_v15, %v556_v10  ;;  %v560_v22 = vsel %vm518_vm0, %v558_v11, %v559_v12  ;;  %v6250_v11 = vld [vmem:[#allocation18_spill] sm:$0xff] }
  0x46   :  { %v3759_v39 = vadd.f32 %v521_v46, %v3360_v29  ;;  %v3762_v31 = vadd.f32 %v524_v32, %v3364_v59  ;;  %v563_v3 = vsel %vm518_vm0, %v561_v51, %v562_v19  ;;  %v3766_v7 = vadd.f32 %v520_v33, %v3368_v1  ;;  %v3863_v51 = vld [vmem:[%s6025_s1 + $0x38] sm:$0xee] }
  0x47   :  { %v3769_v24 = vadd.f32 %v523_v0, %v3372_v62  ;;  %v3772_v47 = vadd.f32 %v527_v42, %v3376_v54  ;;  %v566_v36 = vsel %vm518_vm0, %v564_v60, %v565_v16  ;;  %v3776_v41 = vadd.f32 %v530_v44, %v3380_v25  ;;  %v6220_v25 = vld [vmem:[#allocation3_spill] sm:$0xff]  ;;  %v6254_v60 = vld [vmem:[#allocation20_spill] sm:$0xff] }
  0x48   :  { %v3779_v29 = vadd.f32 %v526_v38, %v3384_v26  ;;  %v3782_v59 = vadd.f32 %v529_v13, %v3388_v52  ;;  %v3785_v1 = vadd.f32 %v533_v45, %v3392_v49  ;;  %v3788_v62 = vadd.f32 %v536_v20, %v3396_v58  ;;  %v6222_v26 = vld [vmem:[#allocation4_spill] sm:$0xff]  ;;  %v6224_v52 = vld [vmem:[#allocation5_spill] sm:$0xff]  ;;  %v6226_v49 = vld [vmem:[#allocation6_spill] sm:$0xff] }
  0x49   :  { %v3791_v54 = vadd.f32 %v532_v55, %v3400_v2  ;;  %v3794_v33 = vadd.f32 %v535_v56, %v3404_v48  ;;  %v3797_v0 = vadd.f32 %v539_v9, %v6220_v25  ;;  %v3800_v38 = vadd.f32 %v542_v8, %v6222_v26  ;;  %v6228_v58 = vld [vmem:[#allocation7_spill] sm:$0xff]  ;;  %v6230_v2 = vld [vmem:[#allocation8_spill] sm:$0xff]  ;;  %v6232_v48 = vld [vmem:[#allocation9_spill] sm:$0xff] }
  0x4a   :  { %v3803_v13 = vadd.f32 %v538_v50, %v6224_v52  ;;  %v3806_v35 = vadd.f32 %v541_v21, %v6226_v49  ;;  %v3809_v18 = vadd.f32 %v545_v61, %v6228_v58  ;;  %v3812_v46 = vadd.f32 %v548_v53, %v6230_v2  ;;  %v6236_v42 = vld [vmem:[#allocation11_spill] sm:$0xff]  ;;  %v3858_v20 = vld [vmem:[%s6025_s1 + $0x18] sm:$0x33]  ;;  %v3906_v26 = vld [vmem:[%s6025_s1 + $0x90] sm:$0x33] }
  0x4b   :  { %6221 = vst [vmem:[#allocation3_spill] sm:$0xff] %v3797_v0  ;;  %6223 = vst [vmem:[#allocation4_spill] sm:$0xff] %v3800_v38  ;;  %v3815_v32 = vadd.f32 %v544_v63, %v6232_v48  ;;  %v3818_v55 = vadd.f32 %v547_v37, %v6234_v6  ;;  %v3821_v44 = vadd.f32 %v551_v43, %v6236_v42  ;;  %v638_v63 = vld [vmem:[%s6024_s0 + $0x1c] sm:$0xa]  ;;  %v6244_v37 = vld [vmem:[#allocation15_spill] sm:$0xff]  ;;  %v6270_v0 = vunpack.c.l.bf16 %v3841_v30 }
  0x4c   :  { %6225 = vst [vmem:[#allocation5_spill] sm:$0xff] %v3803_v13  ;;  %6227 = vst [vmem:[#allocation6_spill] sm:$0xff] %v3806_v35  ;;  %v3824_v56 = vadd.f32 %v554_v34, %v6238_v27  ;;  %v3827_v50 = vadd.f32 %v550_v57, %v6240_v5  ;;  %v3830_v21 = vadd.f32 %v553_v40, %v6242_v28  ;;  %v6246_v57 = vld [vmem:[#allocation16_spill] sm:$0xff]  ;;  %v6248_v40 = vld [vmem:[#allocation17_spill] sm:$0xff]  ;;  %vm2995_vm5 = vcmask 1042432  }
  0x4d   :  { %6229 = vst [vmem:[#allocation7_spill] sm:$0xff] %v3809_v18  ;;  %6231 = vst [vmem:[#allocation8_spill] sm:$0xff] %v3812_v46  ;;  %v3844_v23 = vadd.f32 %v557_v17, %v6244_v37  ;;  %v3847_v14 = vadd.f32 %v560_v22, %v6246_v57  ;;  %v3850_v15 = vadd.f32 %v556_v10, %v6248_v40  ;;  %v6252_v9 = vld [vmem:[#allocation19_spill] sm:$0xff]  ;;  %v6256_v10 = vld [vmem:[#allocation21_spill] sm:$0xff]  ;;  %v3887_v22 = vunpack.c.l.bf16 %v637_v4 }
  0x4e   :  { %6233 = vst [vmem:[#allocation9_spill] sm:$0xff] %v3815_v32  ;;  %6235 = vst [vmem:[#allocation10_spill] sm:$0xff] %v3818_v55  ;;  %v3853_v45 = vadd.f32 %v559_v12, %v6250_v11  ;;  %v3866_v8 = vadd.f32 %v563_v3, %v6252_v9  ;;  %v3869_v61 = vadd.f32 %v566_v36, %v6254_v60  ;;  %v6258_v12 = vld [vmem:[#allocation22_spill] sm:$0xff]  ;;  %v3889_v3 = vunpack.c.l.bf16 %v638_v63  ;;  %v3911_v52 = vld [vmem:[%s6025_s1 + $0xb0] sm:$0xee] }
  0x4f   :  { %6237 = vst [vmem:[#allocation11_spill] sm:$0xff] %v3821_v44  ;;  %6239 = vst [vmem:[#allocation12_spill] sm:$0xff] %v3824_v56  ;;  %v3872_v53 = vadd.f32 %v562_v19, %v6256_v10  ;;  %v3875_v43 = vadd.f32 %v565_v16, %v6258_v12  ;;  %v3880_v34 = vld [vmem:[%s6025_s1 + $0x40] sm:$0x33]  ;;  %v3894_v19 = vld [vmem:[%s6025_s1 + $0x68] sm:$0x33] }
  0x50   :  { %6241 = vst [vmem:[#allocation13_spill] sm:$0xff] %v3827_v50  ;;  %6243 = vst [vmem:[#allocation14_spill] sm:$0xff] %v3830_v21  ;;  %v3885_v17 = vld [vmem:[%s6025_s1 + $0x60] sm:$0xee]  ;;  %v3899_v16 = vld [vmem:[%s6025_s1 + $0x88] sm:$0xee] }
  0x51   :  { %6245 = vst [vmem:[#allocation15_spill] sm:$0xff] %v3844_v23  ;;  %6247 = vst [vmem:[#allocation16_spill] sm:$0xff] %v3847_v14  ;;  %v3920_v6 = vld [vmem:[%s6025_s1 + $0xb8] sm:$0x33]  ;;  %v3934_v63 = vld [vmem:[%s6025_s1 + $0xe0] sm:$0x33] }
  0x52   :  { %6249 = vst [vmem:[#allocation17_spill] sm:$0xff] %v3850_v15  ;;  %6251 = vst [vmem:[#allocation18_spill] sm:$0xff] %v3853_v45  ;;  %v3925_v42 = vld [vmem:[%s6025_s1 + $0xd8] sm:$0xee]  ;;  %v3943_v9 = vld [vmem:[%s6025_s1 + $0x100] sm:$0xee] }
  0x53   :  { %6253 = vst [vmem:[#allocation19_spill] sm:$0xff] %v3866_v8  ;;  %6255 = vst [vmem:[#allocation20_spill] sm:$0xff] %v3869_v61  ;;  %v3948_v60 = vld [vmem:[%s6025_s1 + $0x108] sm:$0x33]  ;;  %v3962_v37 = vld [vmem:[%s6025_s1 + $0x130] sm:$0x33] }
  0x54   :  { %6257 = vst [vmem:[#allocation21_spill] sm:$0xff] %v3872_v53  ;;  %6259 = vst [vmem:[#allocation22_spill] sm:$0xff] %v3875_v43  ;;  %v3957_v11 = vld [vmem:[%s6025_s1 + $0x128] sm:$0xee]  ;;  %v6261_v5 = vld [vmem:[#allocation2_spill] sm:$0xff] }
  0x55   :  { %6260 = vst [vmem:[#allocation29_spill] sm:$0xff] %v3887_v22  ;;  %v705_v27 = vsub.s32 2, %v6261_v5  ;;  %v709_v48 = vsub.s32 6, %v6261_v5  ;;  %v3975_v2 = vld [vmem:[%s6025_s1 + $0x18] sm:$0xee]  ;;  %v6264_v43 = vld [vmem:[#allocation23_spill] sm:$0xff] }
  0x56   :  { %6262 = vst [vmem:[#allocation30_spill] sm:$0xff] %v3975_v2  ;;  %v3980_v10 = vld [vmem:[%s6025_s1 + $0x20] sm:$0x33]  ;;  %v6265_v53 = vld [vmem:[#allocation24_spill] sm:$0xff]  ;;  %v6266_v61 = vld [vmem:[#allocation25_spill] sm:$0xff] }
  0x57   :  { %6263 = vst [vmem:[#allocation31_spill] sm:$0xff] %v3980_v10  ;;  %v706_v28 = vrot.slane %v6264_v43, %v705_v27  ;;  %v710_v12 = vrot.slane %v6264_v43, %v709_v48  ;;  %v714_v4 = vrot.slane %v6265_v53, %v705_v27  ;;  %v718_v58 = vrot.slane %v6265_v53, %v709_v48  ;;  %v6267_v8 = vld [vmem:[#allocation26_spill] sm:$0xff]  ;;  %v6268_v2 = vld [vmem:[#allocation27_spill] sm:$0xff]  ;;  %v6269_v10 = vld [vmem:[#allocation28_spill] sm:$0xff] }
  0x58   :  { %v722_v49 = vrot.slane %v6266_v61, %v705_v27  ;;  %v726_v25 = vrot.slane %v6266_v61, %v709_v48  ;;  %v730_v36 = vrot.slane %v6267_v8, %v705_v27  ;;  %v734_v5 = vrot.slane %v6267_v8, %v709_v48 }
  0x59   :  { %v738_v57 = vrot.slane %v6268_v2, %v705_v27  ;;  %v742_v40 = vrot.slane %v6268_v2, %v709_v48  ;;  %v746_v45 = vrot.slane %v6269_v10, %v705_v27  ;;  %v750_v43 = vrot.slane %v6269_v10, %v709_v48 }
  0x5a   :  { %v754_v15 = vrot.slane %v3887_v22, %v705_v27  ;;  %v758_v53 = vrot.slane %v3887_v22, %v709_v48  ;;  %v762_v14 = vrot.slane %v3889_v3, %v705_v27  ;;  %v766_v61 = vrot.slane %v3889_v3, %v709_v48 }
  0x5b   :  { %v786_v23 = vrot.slane %v706_v28, %v705_v27  ;;  %v790_v21 = vrot.slane %v710_v12, %v705_v27  ;;  %v794_v50 = vrot.slane %v714_v4, %v705_v27  ;;  %v798_v8 = vrot.slane %v718_v58, %v705_v27 }
  0x5c   :  { %v802_v56 = vrot.slane %v722_v49, %v705_v27  ;;  %v806_v44 = vrot.slane %v726_v25, %v705_v27  ;;  %v810_v55 = vrot.slane %v730_v36, %v705_v27  ;;  %v814_v2 = vrot.slane %v734_v5, %v705_v27 }
  0x5d   :  { %v818_v32 = vrot.slane %v738_v57, %v705_v27  ;;  %v822_v46 = vrot.slane %v742_v40, %v705_v27  ;;  %v826_v18 = vrot.slane %v746_v45, %v705_v27  ;;  %v830_v10 = vrot.slane %v750_v43, %v705_v27 }
  0x5e   :  { %v834_v35 = vrot.slane %v754_v15, %v705_v27  ;;  %v838_v13 = vrot.slane %v758_v53, %v705_v27  ;;  %v842_v38 = vrot.slane %v762_v14, %v705_v27  ;;  %v846_v22 = vrot.slane %v766_v61, %v705_v27 }
  0x5f   :  { %v847_v48 = vmul.f32 %v786_v23, %v6270_v0  ;;  %v6271_v28 = vunpack.c.h.bf16 %v3841_v30  ;;  %v6272_v49 = vunpack.c.l.bf16 %v3858_v20  ;;  %v6273_v36 = vunpack.c.h.bf16 %v3858_v20 }
  0x60   :  { %v6274_v15 = vunpack.c.l.bf16 %v3863_v51  ;;  %v6275_v14 = vunpack.c.h.bf16 %v3863_v51  ;;  %v6276_v53 = vunpack.c.l.bf16 %v3880_v34  ;;  %v6277_v30 = vunpack.c.h.bf16 %v3880_v34 }
  0x61   :  { %v848_v4 = vmul.f32 %v790_v21, %v6271_v28  ;;  %v4016_v25 = vmul.f32 %v786_v23, %v6272_v49  ;;  %v4020_v58 = vmul.f32 %v790_v21, %v6273_v36  ;;  %v6278_v23 = vunpack.c.l.bf16 %v3885_v17 }
  0x62   :  { %v851_v45 = vmul.f32 %v794_v50, %v6274_v15  ;;  %v852_v61 = vmul.f32 %v798_v8, %v6275_v14  ;;  %v4028_v0 = vmul.f32 %v794_v50, %v6276_v53  ;;  %v4032_v43 = vmul.f32 %v798_v8, %v6277_v30 }
  0x63   :  { %v855_v27 = vmul.f32 %v802_v56, %v6278_v23  ;;  %v6279_v21 = vunpack.c.h.bf16 %v3885_v17  ;;  %v6280_v5 = vunpack.c.l.bf16 %v3894_v19  ;;  %v6281_v51 = vunpack.c.h.bf16 %v3894_v19 }
  0x64   :  { %v6282_v50 = vunpack.c.l.bf16 %v3899_v16  ;;  %v6283_v8 = vunpack.c.h.bf16 %v3899_v16  ;;  %v6284_v28 = vunpack.c.l.bf16 %v3906_v26  ;;  %v6285_v17 = vunpack.c.h.bf16 %v3906_v26 }
  0x65   :  { %v856_v20 = vmul.f32 %v806_v44, %v6279_v21  ;;  %v4040_v57 = vmul.f32 %v802_v56, %v6280_v5  ;;  %v4044_v40 = vmul.f32 %v806_v44, %v6281_v51  ;;  %v6286_v56 = vunpack.c.l.bf16 %v3911_v52 }
  0x66   :  { %v859_v12 = vmul.f32 %v810_v55, %v6282_v50  ;;  %v860_v34 = vmul.f32 %v814_v2, %v6283_v8  ;;  %v4052_v49 = vmul.f32 %v810_v55, %v6284_v28  ;;  %v4056_v36 = vmul.f32 %v814_v2, %v6285_v17 }
  0x67   :  { %v863_v15 = vmul.f32 %v818_v32, %v6286_v56  ;;  %v6287_v44 = vunpack.c.h.bf16 %v3911_v52  ;;  %v6288_v14 = vunpack.c.l.bf16 %v3920_v6  ;;  %v6289_v16 = vunpack.c.h.bf16 %v3920_v6 }
  0x68   :  { %v6290_v55 = vunpack.c.l.bf16 %v3925_v42  ;;  %v6291_v26 = vunpack.c.h.bf16 %v3925_v42  ;;  %v6292_v21 = vunpack.c.l.bf16 %v3934_v63  ;;  %v6293_v52 = vunpack.c.h.bf16 %v3934_v63 }
  0x69   :  { %v864_v19 = vmul.f32 %v822_v46, %v6287_v44  ;;  %v4064_v53 = vmul.f32 %v818_v32, %v6288_v14  ;;  %v4068_v30 = vmul.f32 %v822_v46, %v6289_v16  ;;  %v912_v32 = vrot.slane %v847_v48, 2 }
  0x6a   :  { %v867_v23 = vmul.f32 %v826_v18, %v6290_v55  ;;  %v868_v2 = vmul.f32 %v830_v10, %v6291_v26  ;;  %v4076_v5 = vmul.f32 %v826_v18, %v6292_v21  ;;  %v4080_v51 = vmul.f32 %v830_v10, %v6293_v52 }
  0x6b   :  { %v913_v50 = vrot.slane %v4016_v25, 2  ;;  %v915_v6 = vrot.slane %v848_v4, 2  ;;  %v916_v46 = vrot.slane %v4020_v58, 2  ;;  %v918_v8 = vrot.slane %v851_v45, 2 }
  0x6c   :  { %v919_v28 = vrot.slane %v4028_v0, 2  ;;  %v921_v17 = vrot.slane %v852_v61, 2  ;;  %v922_v42 = vrot.slane %v4032_v43, 2  ;;  %v6294_v56 = vunpack.c.l.bf16 %v3943_v9 }
  0x6d   :  { %v6295_v44 = vunpack.c.h.bf16 %v3943_v9  ;;  %v6296_v10 = vunpack.c.l.bf16 %v3948_v60  ;;  %v6297_v4 = vunpack.c.h.bf16 %v3948_v60  ;;  %v6298_v58 = vunpack.c.l.bf16 %v3957_v11 }
  0x6e   :  { %v871_v18 = vmul.f32 %v834_v35, %v6294_v56  ;;  %v6299_v61 = vunpack.c.h.bf16 %v3957_v11  ;;  %v6300_v43 = vunpack.c.l.bf16 %v3962_v37  ;;  %v6301_v9 = vunpack.c.h.bf16 %v3962_v37 }
  0x6f   :  { %v872_v63 = vmul.f32 %v838_v13, %v6295_v44  ;;  %v4092_v48 = vmul.f32 %v834_v35, %v6296_v10  ;;  %v4096_v25 = vmul.f32 %v838_v13, %v6297_v4  ;;  %v875_v45 = vmul.f32 %v842_v38, %v6298_v58 }
  0x70   :  { %v876_v0 = vmul.f32 %v846_v22, %v6299_v61  ;;  %v4104_v14 = vmul.f32 %v842_v38, %v6300_v43  ;;  %v4108_v16 = vmul.f32 %v846_v22, %v6301_v9  ;;  %v914_v35 = vsel %vm911_vm1, %v912_v32, %v913_v50 }
  0x71   :  { %v917_v60 = vsel %vm911_vm1, %v915_v6, %v916_v46  ;;  %v924_v13 = vrot.slane %v855_v27, 2  ;;  %v925_v55 = vrot.slane %v4040_v57, 2  ;;  %v920_v26 = vsel %vm911_vm1, %v918_v8, %v919_v28 }
  0x72   :  { %v923_v11 = vsel %vm911_vm1, %v921_v17, %v922_v42  ;;  %v927_v21 = vrot.slane %v856_v20, 2  ;;  %v928_v52 = vrot.slane %v4044_v40, 2  ;;  %v930_v38 = vrot.slane %v859_v12, 2 }
  0x73   :  { %v931_v56 = vrot.slane %v4052_v49, 2  ;;  %v933_v37 = vrot.slane %v860_v34, 2  ;;  %v934_v22 = vrot.slane %v4056_v36, 2  ;;  %v936_v44 = vrot.slane %v863_v15, 2 }
  0x74   :  { %v937_v32 = vrot.slane %v4064_v53, 2  ;;  %v939_v6 = vrot.slane %v864_v19, 2  ;;  %v940_v27 = vrot.slane %v4068_v30, 2  ;;  %v942_v57 = vrot.slane %v867_v23, 2 }
  0x75   :  { %v943_v8 = vrot.slane %v4076_v5, 2  ;;  %v945_v10 = vrot.slane %v868_v2, 2  ;;  %v946_v20 = vrot.slane %v4080_v51, 2  ;;  %v948_v17 = vrot.slane %v871_v18, 2 }
  0x76   :  { %v949_v40 = vrot.slane %v4092_v48, 2  ;;  %v951_v12 = vrot.slane %v872_v63, 2  ;;  %v952_v34 = vrot.slane %v4096_v25, 2  ;;  %v926_v49 = vsel %vm911_vm1, %v924_v13, %v925_v55 }
  0x77   :  { %v929_v36 = vsel %vm911_vm1, %v927_v21, %v928_v52  ;;  %v954_v15 = vrot.slane %v875_v45, 2  ;;  %v955_v19 = vrot.slane %v4104_v14, 2  ;;  %v932_v53 = vsel %vm911_vm1, %v930_v38, %v931_v56 }
  0x78   :  { %v935_v30 = vsel %vm911_vm1, %v933_v37, %v934_v22  ;;  %v957_v23 = vrot.slane %v876_v0, 2  ;;  %v958_v2 = vrot.slane %v4108_v16, 2  ;;  %v938_v5 = vsel %vm911_vm1, %v936_v44, %v937_v32 }
  0x79   :  { %v941_v51 = vsel %vm911_vm1, %v939_v6, %v940_v27  ;;  %v944_v18 = vsel %vm911_vm1, %v942_v57, %v943_v8  ;;  %v947_v63 = vsel %vm911_vm1, %v945_v10, %v946_v20  ;;  %v950_v48 = vsel %vm911_vm1, %v948_v17, %v949_v40  ;;  %v4218_v6 = vld [vmem:[%s6025_s1 + $0x48] sm:$0x33]  ;;  %v6328_v10 = vld [vmem:[#allocation16_spill] sm:$0xff] }
  0x7a   :  { %v953_v4 = vsel %vm911_vm1, %v951_v12, %v952_v34  ;;  %v4137_v25 = vadd.f32 %v914_v35, %v3759_v39  ;;  %v4140_v58 = vadd.f32 %v917_v60, %v3762_v31  ;;  %v956_v45 = vsel %vm911_vm1, %v954_v15, %v955_v19  ;;  %v4240_v15 = vld [vmem:[%s6025_s1 + $0x70] sm:$0x33] }
  0x7b   :  { %v4144_v61 = vadd.f32 %v913_v50, %v3766_v7  ;;  %v4147_v0 = vadd.f32 %v916_v46, %v3769_v24  ;;  %v4150_v43 = vadd.f32 %v920_v26, %v3772_v47  ;;  %v959_v14 = vsel %vm911_vm1, %v957_v23, %v958_v2  ;;  %v6336_v23 = vld [vmem:[#allocation20_spill] sm:$0xff] }
  0x7c   :  { %v4154_v9 = vadd.f32 %v923_v11, %v3776_v41  ;;  %v4157_v39 = vadd.f32 %v919_v28, %v3779_v29  ;;  %v4160_v31 = vadd.f32 %v922_v42, %v3782_v59  ;;  %v4163_v7 = vadd.f32 %v926_v49, %v3785_v1  ;;  %v6302_v41 = vld [vmem:[#allocation3_spill] sm:$0xff]  ;;  %v6304_v29 = vld [vmem:[#allocation4_spill] sm:$0xff]  ;;  %v6306_v59 = vld [vmem:[#allocation5_spill] sm:$0xff] }
  0x7d   :  { %v4166_v24 = vadd.f32 %v929_v36, %v3788_v62  ;;  %v4169_v47 = vadd.f32 %v925_v55, %v3791_v54  ;;  %v4172_v50 = vadd.f32 %v928_v52, %v3794_v33  ;;  %v4175_v46 = vadd.f32 %v932_v53, %v6302_v41  ;;  %v6308_v1 = vld [vmem:[#allocation6_spill] sm:$0xff]  ;;  %v6310_v62 = vld [vmem:[#allocation7_spill] sm:$0xff]  ;;  %v6312_v54 = vld [vmem:[#allocation8_spill] sm:$0xff] }
  0x7e   :  { %v4178_v28 = vadd.f32 %v935_v30, %v6304_v29  ;;  %v4181_v42 = vadd.f32 %v931_v56, %v6306_v59  ;;  %v4184_v16 = vadd.f32 %v934_v22, %v6308_v1  ;;  %v4187_v35 = vadd.f32 %v938_v5, %v6310_v62  ;;  %v6314_v33 = vld [vmem:[#allocation9_spill] sm:$0xff]  ;;  %v6316_v55 = vld [vmem:[#allocation10_spill] sm:$0xff]  ;;  %v6318_v11 = vld [vmem:[#allocation11_spill] sm:$0xff] }
  0x7f   :  { %6303 = vst [vmem:[#allocation3_spill] sm:$0xff] %v4175_v46  ;;  %v4190_v60 = vadd.f32 %v941_v51, %v6312_v54  ;;  %v4193_v13 = vadd.f32 %v937_v32, %v6314_v33  ;;  %v4196_v26 = vadd.f32 %v940_v27, %v6316_v55  ;;  %v4199_v21 = vadd.f32 %v944_v18, %v6318_v11  ;;  %v6320_v52 = vld [vmem:[#allocation12_spill] sm:$0xff]  ;;  %v6322_v56 = vld [vmem:[#allocation13_spill] sm:$0xff]  ;;  %v6324_v22 = vld [vmem:[#allocation14_spill] sm:$0xff] }
  0x80   :  { %6305 = vst [vmem:[#allocation4_spill] sm:$0xff] %v4178_v28  ;;  %6307 = vst [vmem:[#allocation5_spill] sm:$0xff] %v4181_v42  ;;  %v4202_v38 = vadd.f32 %v947_v63, %v6320_v52  ;;  %v4205_v37 = vadd.f32 %v943_v8, %v6322_v56  ;;  %v4208_v44 = vadd.f32 %v946_v20, %v6324_v22  ;;  %v4213_v32 = vld [vmem:[%s6025_s1 + $0x40] sm:$0xee]  ;;  %v6326_v27 = vld [vmem:[#allocation15_spill] sm:$0xff] }
  0x81   :  { %6309 = vst [vmem:[#allocation6_spill] sm:$0xff] %v4184_v16  ;;  %6311 = vst [vmem:[#allocation7_spill] sm:$0xff] %v4187_v35  ;;  %v4221_v57 = vadd.f32 %v950_v48, %v6326_v27  ;;  %v4224_v17 = vadd.f32 %v953_v4, %v6328_v10  ;;  %v6330_v8 = vld [vmem:[#allocation17_spill] sm:$0xff]  ;;  %v6332_v20 = vld [vmem:[#allocation18_spill] sm:$0xff]  ;;  %v4246_v5 = vadd.f32 %v959_v14, %v6336_v23 }
  0x82   :  { %6313 = vst [vmem:[#allocation8_spill] sm:$0xff] %v4190_v60  ;;  %6315 = vst [vmem:[#allocation9_spill] sm:$0xff] %v4193_v13  ;;  %v4227_v12 = vadd.f32 %v949_v40, %v6330_v8  ;;  %v4230_v49 = vadd.f32 %v952_v34, %v6332_v20  ;;  %v4235_v36 = vld [vmem:[%s6025_s1 + $0x68] sm:$0xee]  ;;  %v6338_v40 = vld [vmem:[#allocation21_spill] sm:$0xff] }
  0x83   :  { %6317 = vst [vmem:[#allocation10_spill] sm:$0xff] %v4196_v26  ;;  %6319 = vst [vmem:[#allocation11_spill] sm:$0xff] %v4199_v21  ;;  %v6334_v53 = vld [vmem:[#allocation19_spill] sm:$0xff]  ;;  %v4249_v51 = vadd.f32 %v955_v19, %v6338_v40  ;;  %v6340_v34 = vld [vmem:[#allocation22_spill] sm:$0xff] }
  0x84   :  { %6321 = vst [vmem:[#allocation12_spill] sm:$0xff] %v4202_v38  ;;  %6323 = vst [vmem:[#allocation13_spill] sm:$0xff] %v4205_v37  ;;  %v4243_v30 = vadd.f32 %v956_v45, %v6334_v53  ;;  %v4252_v18 = vadd.f32 %v958_v2, %v6340_v34  ;;  %v4257_v63 = vld [vmem:[%s6025_s1 + $0x90] sm:$0xee]  ;;  %v4262_v48 = vld [vmem:[%s6025_s1 + $0x98] sm:$0x33] }
  0x85   :  { %6325 = vst [vmem:[#allocation14_spill] sm:$0xff] %v4208_v44  ;;  %6327 = vst [vmem:[#allocation15_spill] sm:$0xff] %v4221_v57  ;;  %v4267_v4 = vld [vmem:[%s6025_s1 + $0xb8] sm:$0xee]  ;;  %v4272_v19 = vld [vmem:[%s6025_s1 + $0xc0] sm:$0x33] }
  0x86   :  { %6329 = vst [vmem:[#allocation16_spill] sm:$0xff] %v4224_v17  ;;  %6331 = vst [vmem:[#allocation17_spill] sm:$0xff] %v4227_v12  ;;  %v4281_v29 = vld [vmem:[%s6025_s1 + $0xe0] sm:$0xee]  ;;  %v4286_v59 = vld [vmem:[%s6025_s1 + $0xe8] sm:$0x33] }
  0x87   :  { %6333 = vst [vmem:[#allocation18_spill] sm:$0xff] %v4230_v49  ;;  %6335 = vst [vmem:[#allocation19_spill] sm:$0xff] %v4243_v30  ;;  %v4295_v55 = vld [vmem:[%s6025_s1 + $0x108] sm:$0xee]  ;;  %v4304_v27 = vld [vmem:[%s6025_s1 + $0x110] sm:$0x33] }
  0x88   :  { %6337 = vst [vmem:[#allocation20_spill] sm:$0xff] %v4246_v5  ;;  %6339 = vst [vmem:[#allocation21_spill] sm:$0xff] %v4249_v51  ;;  %v4309_v10 = vld [vmem:[%s6025_s1 + $0x130] sm:$0xee]  ;;  %v4318_v40 = vld [vmem:[%s6025_s1 + $0x138] sm:$0x33] }
  0x89   :  { %6341 = vst [vmem:[#allocation22_spill] sm:$0xff] %v4252_v18  ;;  %v6342_v53 = vld [vmem:[#allocation2_spill] sm:$0xff]  ;;  %v6343_v62 = vld [vmem:[#allocation23_spill] sm:$0xff]  ;;  %v6344_v1 = vld [vmem:[#allocation24_spill] sm:$0xff] }
  0x8a   :  { %v1074_v11 = vsub.s32 3, %v6342_v53  ;;  %v1078_v23 = vsub.s32 7, %v6342_v53  ;;  %v6345_v14 = vld [vmem:[#allocation25_spill] sm:$0xff]  ;;  %v6346_v45 = vld [vmem:[#allocation26_spill] sm:$0xff]  ;;  %v6347_v2 = vld [vmem:[#allocation27_spill] sm:$0xff] }
  0x8b   :  { %v6348_v18 = vld [vmem:[#allocation28_spill] sm:$0xff]  ;;  %v6349_v5 = vld [vmem:[#allocation29_spill] sm:$0xff]  ;;  %v6350_v42 = vld [vmem:[#allocation30_spill] sm:$0xff] }
  0x8c   :  { %v1075_v8 = vrot.slane %v6343_v62, %v1074_v11  ;;  %v1079_v20 = vrot.slane %v6343_v62, %v1078_v23  ;;  %v1083_v41 = vrot.slane %v6344_v1, %v1074_v11  ;;  %v1087_v53 = vrot.slane %v6344_v1, %v1078_v23 }
  0x8d   :  { %v1091_v33 = vrot.slane %v6345_v14, %v1074_v11  ;;  %v1095_v54 = vrot.slane %v6345_v14, %v1078_v23  ;;  %v1099_v34 = vrot.slane %v6346_v45, %v1074_v11  ;;  %v1103_v22 = vrot.slane %v6346_v45, %v1078_v23 }
  0x8e   :  { %v1107_v56 = vrot.slane %v6347_v2, %v1074_v11  ;;  %v1111_v52 = vrot.slane %v6347_v2, %v1078_v23  ;;  %v1115_v51 = vrot.slane %v6348_v18, %v1074_v11  ;;  %v1119_v62 = vrot.slane %v6348_v18, %v1078_v23 }
  0x8f   :  { %v1123_v30 = vrot.slane %v6349_v5, %v1074_v11  ;;  %v1127_v1 = vrot.slane %v6349_v5, %v1078_v23  ;;  %v1131_v49 = vrot.slane %v3889_v3, %v1074_v11  ;;  %v1135_v14 = vrot.slane %v3889_v3, %v1078_v23 }
  0x90   :  { %v1155_v12 = vrot.slane %v1075_v8, %v1074_v11  ;;  %v1159_v17 = vrot.slane %v1079_v20, %v1074_v11  ;;  %v1163_v57 = vrot.slane %v1083_v41, %v1074_v11  ;;  %v1167_v45 = vrot.slane %v1087_v53, %v1074_v11  ;;  %v6353_v41 = vld [vmem:[#allocation31_spill] sm:$0xff] }
  0x91   :  { %v1171_v44 = vrot.slane %v1091_v33, %v1074_v11  ;;  %v1175_v37 = vrot.slane %v1095_v54, %v1074_v11  ;;  %v1179_v38 = vrot.slane %v1099_v34, %v1074_v11  ;;  %v1183_v2 = vrot.slane %v1103_v22, %v1074_v11 }
  0x92   :  { %v1187_v21 = vrot.slane %v1107_v56, %v1074_v11  ;;  %v1191_v26 = vrot.slane %v1111_v52, %v1074_v11  ;;  %v1195_v13 = vrot.slane %v1115_v51, %v1074_v11  ;;  %v1199_v18 = vrot.slane %v1119_v62, %v1074_v11 }
  0x93   :  { %v1203_v60 = vrot.slane %v1123_v30, %v1074_v11  ;;  %v1207_v35 = vrot.slane %v1127_v1, %v1074_v11  ;;  %v1211_v16 = vrot.slane %v1131_v49, %v1074_v11  ;;  %v1215_v5 = vrot.slane %v1135_v14, %v1074_v11 }
  0x94   :  { %v6351_v28 = vunpack.c.l.bf16 %v6350_v42  ;;  %v6352_v3 = vunpack.c.h.bf16 %v6350_v42  ;;  %v6354_v33 = vunpack.c.l.bf16 %v6353_v41  ;;  %v6355_v56 = vunpack.c.h.bf16 %v6353_v41 }
  0x95   :  { %v6356_v30 = vunpack.c.l.bf16 %v4213_v32  ;;  %v6357_v49 = vunpack.c.h.bf16 %v4213_v32  ;;  %v6359_v42 = vunpack.c.h.bf16 %v4218_v6  ;;  %v6362_v53 = vunpack.c.l.bf16 %v4240_v15 }
  0x96   :  { %v1216_v46 = vmul.f32 %v1155_v12, %v6351_v28  ;;  %v1217_v8 = vmul.f32 %v1159_v17, %v6352_v3  ;;  %v4356_v54 = vmul.f32 %v1155_v12, %v6354_v33  ;;  %v4360_v52 = vmul.f32 %v1159_v17, %v6355_v56 }
  0x97   :  { %v1220_v51 = vmul.f32 %v1163_v57, %v6356_v30  ;;  %v1221_v11 = vmul.f32 %v1167_v45, %v6357_v49  ;;  %v6358_v28 = vunpack.c.l.bf16 %v4218_v6  ;;  %v4372_v20 = vmul.f32 %v1167_v45, %v6359_v42 }
  0x98   :  { %v6360_v12 = vunpack.c.l.bf16 %v4235_v36  ;;  %v6361_v17 = vunpack.c.h.bf16 %v4235_v36  ;;  %v4380_v62 = vmul.f32 %v1171_v44, %v6362_v53  ;;  %v6363_v32 = vunpack.c.h.bf16 %v4240_v15 }
  0x99   :  { %v4368_v22 = vmul.f32 %v1163_v57, %v6358_v28  ;;  %v6364_v57 = vunpack.c.l.bf16 %v4257_v63  ;;  %v6365_v6 = vunpack.c.h.bf16 %v4257_v63  ;;  %v6366_v3 = vunpack.c.l.bf16 %v4262_v48 }
  0x9a   :  { %v1224_v23 = vmul.f32 %v1171_v44, %v6360_v12  ;;  %v1225_v34 = vmul.f32 %v1175_v37, %v6361_v17  ;;  %v4384_v1 = vmul.f32 %v1175_v37, %v6363_v32  ;;  %v6367_v36 = vunpack.c.h.bf16 %v4262_v48 }
  0x9b   :  { %v1228_v14 = vmul.f32 %v1179_v38, %v6364_v57  ;;  %v1229_v45 = vmul.f32 %v1183_v2, %v6365_v6  ;;  %v4392_v41 = vmul.f32 %v1179_v38, %v6366_v3  ;;  %v6368_v44 = vunpack.c.l.bf16 %v4267_v4 }
  0x9c   :  { %v4396_v33 = vmul.f32 %v1183_v2, %v6367_v36  ;;  %v6369_v37 = vunpack.c.h.bf16 %v4267_v4  ;;  %v6370_v30 = vunpack.c.l.bf16 %v4272_v19  ;;  %v6371_v63 = vunpack.c.h.bf16 %v4272_v19 }
  0x9d   :  { %v1232_v56 = vmul.f32 %v1187_v21, %v6368_v44  ;;  %v6372_v38 = vunpack.c.l.bf16 %v4281_v29  ;;  %v6373_v48 = vunpack.c.h.bf16 %v4281_v29  ;;  %v6374_v12 = vunpack.c.l.bf16 %v4286_v59 }
  0x9e   :  { %v1233_v15 = vmul.f32 %v1191_v26, %v6369_v37  ;;  %v4404_v49 = vmul.f32 %v1187_v21, %v6370_v30  ;;  %v4408_v28 = vmul.f32 %v1191_v26, %v6371_v63  ;;  %v6375_v4 = vunpack.c.h.bf16 %v4286_v59 }
  0x9f   :  { %v1236_v42 = vmul.f32 %v1195_v13, %v6372_v38  ;;  %v1237_v2 = vmul.f32 %v1199_v18, %v6373_v48  ;;  %v4416_v17 = vmul.f32 %v1195_v13, %v6374_v12  ;;  %v6376_v21 = vunpack.c.l.bf16 %v4295_v55 }
  0xa0   :  { %v4420_v53 = vmul.f32 %v1199_v18, %v6375_v4  ;;  %v6377_v26 = vunpack.c.h.bf16 %v4295_v55  ;;  %v6378_v57 = vunpack.c.l.bf16 %v4304_v27  ;;  %v6379_v29 = vunpack.c.h.bf16 %v4304_v27 }
  0xa1   :  { %v1240_v32 = vmul.f32 %v1203_v60, %v6376_v21  ;;  %v6380_v13 = vunpack.c.l.bf16 %v4309_v10  ;;  %v6381_v59 = vunpack.c.h.bf16 %v4309_v10  ;;  %v1281_v44 = vrot.slane %v1216_v46, 3 }
  0xa2   :  { %v1241_v19 = vmul.f32 %v1207_v35, %v6377_v26  ;;  %v4428_v6 = vmul.f32 %v1203_v60, %v6378_v57  ;;  %v4432_v3 = vmul.f32 %v1207_v35, %v6379_v29  ;;  %v1282_v37 = vrot.slane %v4356_v54, 3 }
  0xa3   :  { %v1244_v36 = vmul.f32 %v1211_v16, %v6380_v13  ;;  %v1245_v18 = vmul.f32 %v1215_v5, %v6381_v59  ;;  %v1284_v30 = vrot.slane %v1217_v8, 3  ;;  %v1285_v55 = vrot.slane %v4360_v52, 3 }
  0xa4   :  { %v1287_v63 = vrot.slane %v1220_v51, 3  ;;  %v1288_v60 = vrot.slane %v4368_v22, 3  ;;  %v1290_v38 = vrot.slane %v1221_v11, 3  ;;  %v1291_v27 = vrot.slane %v4372_v20, 3 }
  0xa5   :  { %v6382_v35 = vunpack.c.l.bf16 %v4318_v40  ;;  %v6383_v12 = vunpack.c.h.bf16 %v4318_v40  ;;  %v1293_v46 = vrot.slane %v1224_v23, 3  ;;  %v1294_v54 = vrot.slane %v4380_v62, 3 }
  0xa6   :  { %v1283_v8 = vsel %vm1280_vm2, %v1281_v44, %v1282_v37  ;;  %v1286_v52 = vsel %vm1280_vm2, %v1284_v30, %v1285_v55  ;;  %v1296_v51 = vrot.slane %v1225_v34, 3  ;;  %v1297_v11 = vrot.slane %v4384_v1, 3 }
  0xa7   :  { %v4444_v48 = vmul.f32 %v1211_v16, %v6382_v35  ;;  %v4448_v10 = vmul.f32 %v1215_v5, %v6383_v12  ;;  %v1289_v22 = vsel %vm1280_vm2, %v1287_v63, %v1288_v60  ;;  %v1299_v20 = vrot.slane %v1228_v14, 3 }
  0xa8   :  { %v1300_v16 = vrot.slane %v4392_v41, 3  ;;  %v1302_v4 = vrot.slane %v1229_v45, 3  ;;  %v1292_v40 = vsel %vm1280_vm2, %v1290_v38, %v1291_v27  ;;  %v1303_v5 = vrot.slane %v4396_v33, 3 }
  0xa9   :  { %v1305_v23 = vrot.slane %v1232_v56, 3  ;;  %v1306_v62 = vrot.slane %v4404_v49, 3  ;;  %v1295_v21 = vsel %vm1280_vm2, %v1293_v46, %v1294_v54  ;;  %v1308_v26 = vrot.slane %v1233_v15, 3 }
  0xaa   :  { %v1309_v34 = vrot.slane %v4408_v28, 3  ;;  %v1311_v57 = vrot.slane %v1236_v42, 3  ;;  %v1298_v1 = vsel %vm1280_vm2, %v1296_v51, %v1297_v11  ;;  %v1301_v14 = vsel %vm1280_vm2, %v1299_v20, %v1300_v16  ;;  %v6394_v51 = vld [vmem:[#allocation10_spill] sm:$0xff] }
  0xab   :  { %v1312_v41 = vrot.slane %v4416_v17, 3  ;;  %v1314_v45 = vrot.slane %v1237_v2, 3  ;;  %v1304_v29 = vsel %vm1280_vm2, %v1302_v4, %v1303_v5  ;;  %v1315_v33 = vrot.slane %v4420_v53, 3 }
  0xac   :  { %v1317_v56 = vrot.slane %v1240_v32, 3  ;;  %v1318_v49 = vrot.slane %v4428_v6, 3  ;;  %v1307_v13 = vsel %vm1280_vm2, %v1305_v23, %v1306_v62  ;;  %v1320_v15 = vrot.slane %v1241_v19, 3  ;;  %v6400_v23 = vld [vmem:[#allocation14_spill] sm:$0xff] }
  0xad   :  { %v1321_v28 = vrot.slane %v4432_v3, 3  ;;  %v1323_v42 = vrot.slane %v1244_v36, 3  ;;  %v1310_v59 = vsel %vm1280_vm2, %v1308_v26, %v1309_v34  ;;  %v1313_v44 = vsel %vm1280_vm2, %v1311_v57, %v1312_v41  ;;  %v6402_v26 = vld [vmem:[#allocation15_spill] sm:$0xff] }
  0xae   :  { %v6050_v2 = vrot.slane %v4444_v48, 3  ;;  %v1326_v17 = vrot.slane %v1245_v18, 3  ;;  %v1316_v30 = vsel %vm1280_vm2, %v1314_v45, %v1315_v33  ;;  %v1319_v53 = vsel %vm1280_vm2, %v1317_v56, %v1318_v49  ;;  %v6408_v45 = vld [vmem:[#allocation18_spill] sm:$0xff]  ;;  %v6410_v56 = vld [vmem:[#allocation19_spill] sm:$0xff] }
  0xaf   :  { %v1322_v32 = vsel %vm1280_vm2, %v1320_v15, %v1321_v28  ;;  %v6049_v6 = vrot.slane %v4448_v10, 3  ;;  %v4480_v3 = vadd.f32 %v1283_v8, %v4137_v25  ;;  %v4483_v36 = vadd.f32 %v1286_v52, %v4140_v58 }
  0xb0   :  { %v1325_v19 = vsel %vm1280_vm2, %v1323_v42, %v6050_v2  ;;  %v4486_v18 = vadd.f32 %v1282_v37, %v4144_v61  ;;  %v4492_v38 = vadd.f32 %v1285_v55, %v4147_v0  ;;  %v4495_v35 = vadd.f32 %v1289_v22, %v4150_v43  ;;  %v6395_v22 = vld [vmem:[#allocation11_spill] sm:$0xff] }
  0xb1   :  { %v1328_v63 = vsel %vm1280_vm2, %v1326_v17, %v6049_v6  ;;  %v4498_v12 = vadd.f32 %v1292_v40, %v4154_v9  ;;  %v4501_v25 = vadd.f32 %v1288_v60, %v4157_v39  ;;  %v4504_v58 = vadd.f32 %v1291_v27, %v4160_v31  ;;  %v6384_v9 = vld [vmem:[#allocation3_spill] sm:$0xff]  ;;  %v6385_v39 = vld [vmem:[#allocation4_spill] sm:$0xff]  ;;  %v6387_v31 = vld [vmem:[#allocation5_spill] sm:$0xff] }
  0xb2   :  { %v4507_v61 = vadd.f32 %v1295_v21, %v4163_v7  ;;  %v4510_v37 = vadd.f32 %v1298_v1, %v4166_v24  ;;  %v4513_v0 = vadd.f32 %v1294_v54, %v4169_v47  ;;  %v4516_v43 = vadd.f32 %v1297_v11, %v4172_v50  ;;  %v6389_v7 = vld [vmem:[#allocation6_spill] sm:$0xff]  ;;  %v6391_v24 = vld [vmem:[#allocation7_spill] sm:$0xff]  ;;  %v6392_v47 = vld [vmem:[#allocation8_spill] sm:$0xff] }
  0xb3   :  { %v4519_v55 = vadd.f32 %v1301_v14, %v6384_v9  ;;  %v4522_v60 = vadd.f32 %v1304_v29, %v6385_v39  ;;  %v4525_v27 = vadd.f32 %v1300_v16, %v6387_v31  ;;  %v4528_v46 = vadd.f32 %v1303_v5, %v6389_v7  ;;  %v6393_v50 = vld [vmem:[#allocation9_spill] sm:$0xff]  ;;  %v6396_v16 = vld [vmem:[#allocation12_spill] sm:$0xff] }
  0xb4   :  { %v4531_v8 = vadd.f32 %v1307_v13, %v6391_v24  ;;  %v4534_v54 = vadd.f32 %v1310_v59, %v6392_v47  ;;  %v4537_v52 = vadd.f32 %v1306_v62, %v6393_v50  ;;  %v4540_v11 = vadd.f32 %v1309_v34, %v6394_v51  ;;  %v6398_v40 = vld [vmem:[#allocation13_spill] sm:$0xff]  ;;  %v6404_v62 = vld [vmem:[#allocation16_spill] sm:$0xff] }
  0xb5   :  { %6386 = vst [vmem:[#allocation2_spill] sm:$0xff] %v4522_v60  ;;  %6388 = vst [vmem:[#allocation23_spill] sm:$0xff] %v4525_v27  ;;  %v4543_v20 = vadd.f32 %v1313_v44, %v6395_v22  ;;  %v4546_v4 = vadd.f32 %v1316_v30, %v6396_v16  ;;  %v4549_v5 = vadd.f32 %v1312_v41, %v6398_v40  ;;  %v6406_v34 = vld [vmem:[#allocation17_spill] sm:$0xff]  ;;  %v6412_v41 = vld [vmem:[#allocation20_spill] sm:$0xff]  ;;  %v1402_v42 = vsel %vm1393_vm3, %v4492_v38, -inf }
  0xb6   :  { %6390 = vst [vmem:[#allocation24_spill] sm:$0xff] %v4528_v46  ;;  %v4552_v21 = vadd.f32 %v1315_v33, %v6400_v23  ;;  %v4555_v57 = vadd.f32 %v1319_v53, %v6402_v26  ;;  %v4558_v1 = vadd.f32 %v1322_v32, %v6404_v62  ;;  %v4561_v14 = vadd.f32 %v1318_v49, %v6406_v34 }
  0xb7   :  { %6397 = vst [vmem:[#allocation25_spill] sm:$0xff] %v4546_v4  ;;  %6399 = vst [vmem:[#allocation26_spill] sm:$0xff] %v4549_v5  ;;  %v4564_v29 = vadd.f32 %v1321_v28, %v6408_v45  ;;  %v4567_v13 = vadd.f32 %v1325_v19, %v6410_v56  ;;  %v4570_v15 = vadd.f32 %v1328_v63, %v6412_v41  ;;  %v1394_v33 = vsel %vm1393_vm3, %v4486_v18, -inf }
  0xb8   :  { %6401 = vst [vmem:[#allocation27_spill] sm:$0xff] %v4552_v21  ;;  %6403 = vst [vmem:[#allocation28_spill] sm:$0xff] %v4555_v57  ;;  %v1410_v59 = vsel %vm1393_vm3, %v4501_v25, -inf  ;;  %v1418_v49 = vsel %vm1393_vm3, %v4504_v58, -inf  ;;  %v1395_v28 = vmax.f32 %v4480_v3, %v1394_v33  ;;  %v1403_v44 = vmax.f32 %v4483_v36, %v1402_v42 }
  0xb9   :  { %6405 = vst [vmem:[#allocation29_spill] sm:$0xff] %v4558_v1  ;;  %6407 = vst [vmem:[#allocation30_spill] sm:$0xff] %v4561_v14  ;;  %v1411_v17 = vmax.f32 %v4495_v35, %v1410_v59  ;;  %v1419_v30 = vmax.f32 %v4498_v12, %v1418_v49  ;;  %v1426_v53 = vsel %vm1393_vm3, %v4513_v0, -inf  ;;  %v1434_v32 = vsel %vm1393_vm3, %v4516_v43, -inf }
  0xba   :  { %6409 = vst [vmem:[#allocation31_spill] sm:$0xff] %v4564_v29  ;;  %6411 = vst [vmem:[#allocation3_spill] sm:$0xff] %v4567_v13  ;;  %v1442_v19 = vsel %vm1393_vm3, %v4525_v27, -inf  ;;  %v1450_v63 = vsel %vm1393_vm3, %v4528_v46, -inf  ;;  %v1396_v9 = vrot.slane %v1395_v28, 4  ;;  %v1404_v39 = vrot.slane %v1403_v44, 4 }
  0xbb   :  { %6413 = vst [vmem:[#allocation4_spill] sm:$0xff] %v4570_v15  ;;  %v1412_v31 = vrot.slane %v1411_v17, 4  ;;  %v1420_v7 = vrot.slane %v1419_v30, 4  ;;  %v1427_v24 = vmax.f32 %v4507_v61, %v1426_v53  ;;  %v1435_v47 = vmax.f32 %v4510_v37, %v1434_v32 }
  0xbc   :  { %v1443_v50 = vmax.f32 %v4519_v55, %v1442_v19  ;;  %v1451_v51 = vmax.f32 %v4522_v60, %v1450_v63  ;;  %v1397_v22 = vmax.f32 %v1395_v28, %v1396_v9  ;;  %v1405_v16 = vmax.f32 %v1403_v44, %v1404_v39 }
  0xbd   :  { %v1413_v40 = vmax.f32 %v1411_v17, %v1412_v31  ;;  %v1421_v23 = vmax.f32 %v1419_v30, %v1420_v7  ;;  %v1428_v26 = vrot.slane %v1427_v24, 4  ;;  %v1436_v62 = vrot.slane %v1435_v47, 4 }
  0xbe   :  { %v1444_v34 = vrot.slane %v1443_v50, 4  ;;  %v1452_v45 = vrot.slane %v1451_v51, 4  ;;  %v1398_v56 = vrot.slane %v1397_v22, 2  ;;  %v1406_v41 = vrot.slane %v1405_v16, 2 }
  0xbf   :  { %v1414_v33 = vrot.slane %v1413_v40, 2  ;;  %v1422_v42 = vrot.slane %v1421_v23, 2  ;;  %v1429_v59 = vmax.f32 %v1427_v24, %v1428_v26  ;;  %v1437_v49 = vmax.f32 %v1435_v47, %v1436_v62  ;;  %v6414_v47 = vld [vmem:[#allocation21_spill] sm:$0xff] }
  0xc0   :  { %v1445_v53 = vmax.f32 %v1443_v50, %v1444_v34  ;;  %v1453_v32 = vmax.f32 %v1451_v51, %v1452_v45  ;;  %v1399_v6 = vmax.f32 %v1397_v22, %v1398_v56  ;;  %v1407_v19 = vmax.f32 %v1405_v16, %v1406_v41  ;;  %v6417_v22 = vld [vmem:[#allocation22_spill] sm:$0xff] }
  0xc1   :  { %v1415_v2 = vmax.f32 %v1413_v40, %v1414_v33  ;;  %v1423_v63 = vmax.f32 %v1421_v23, %v1422_v42  ;;  %v1430_v28 = vrot.slane %v1429_v59, 2  ;;  %v1438_v44 = vrot.slane %v1437_v49, 2 }
  0xc2   :  { %v1446_v17 = vrot.slane %v1445_v53, 2  ;;  %v1454_v30 = vrot.slane %v1453_v32, 2  ;;  %v1400_v9 = vrot.slane %v1399_v6, 1  ;;  %v1408_v39 = vrot.slane %v1407_v19, 1 }
  0xc3   :  { %v1416_v31 = vrot.slane %v1415_v2, 1  ;;  %v1424_v7 = vrot.slane %v1423_v63, 1  ;;  %v1431_v46 = vmax.f32 %v1429_v59, %v1430_v28  ;;  %v1439_v27 = vmax.f32 %v1437_v49, %v1438_v44 }
  0xc4   :  { %v4596_v60 = vmax.f32 %v1445_v53, %v1446_v17  ;;  %v4598_v24 = vmax.f32 %v1453_v32, %v1454_v30  ;;  %v6415_v50 = vrot.slane %v4444_v48, 3  ;;  %v6418_v16 = vrot.slane %v4448_v10, 3 }
  0xc5   :  { %v4610_v23 = vmax.f32 %v1399_v6, %v1400_v9  ;;  %v4612_v26 = vmax.f32 %v1407_v19, %v1408_v39  ;;  %v4614_v62 = vmax.f32 %v1415_v2, %v1416_v31  ;;  %v4616_v34 = vmax.f32 %v1423_v63, %v1424_v7 }
  0xc6   :  { %v4603_v51 = vadd.f32 %v6415_v50, %v6414_v47  ;;  %v4608_v40 = vadd.f32 %v6418_v16, %v6417_v22  ;;  %v1432_v45 = vrot.slane %v1431_v46, 1  ;;  %v1440_v56 = vrot.slane %v1439_v27, 1 }
  0xc7   :  { %v1458_v48 = vsel %vm1393_vm3, %v4537_v52, -inf  ;;  %v1466_v41 = vsel %vm1393_vm3, %v4540_v11, -inf  ;;  %v1474_v10 = vsel %vm1393_vm3, %v4549_v5, -inf  ;;  %v1482_v6 = vsel %vm1393_vm3, %v4552_v21, -inf }
  0xc8   :  { %6416 = vst [vmem:[#allocation5_spill] sm:$0xff] %v4603_v51  ;;  %6419 = vst [vmem:[#allocation6_spill] sm:$0xff] %v4608_v40  ;;  %v4626_v33 = vmax.f32 %v1431_v46, %v1432_v45  ;;  %v4628_v2 = vmax.f32 %v1439_v27, %v1440_v56  ;;  %v1448_v42 = vrot.slane %v4596_v60, 1  ;;  %v1456_v59 = vrot.slane %v4598_v24, 1 }
  0xc9   :  { %v1459_v49 = vmax.f32 %v4531_v8, %v1458_v48  ;;  %v1467_v53 = vmax.f32 %v4534_v54, %v1466_v41  ;;  %v1475_v32 = vmax.f32 %v4543_v20, %v1474_v10  ;;  %v1483_v19 = vmax.f32 %v4546_v4, %v1482_v6 }
  0xca   :  { %v1490_v63 = vsel %vm1393_vm3, %v4561_v14, -inf  ;;  %v1498_v46 = vsel %vm1393_vm3, %v4564_v29, -inf  ;;  %v1506_v27 = vsel %vm1393_vm3, %v4603_v51, -inf  ;;  %v1514_v28 = vsel %vm1393_vm3, %v4608_v40, -inf }
  0xcb   :  { %v1460_v44 = vrot.slane %v1459_v49, 4  ;;  %v1468_v17 = vrot.slane %v1467_v53, 4  ;;  %v1476_v30 = vrot.slane %v1475_v32, 4  ;;  %v1484_v9 = vrot.slane %v1483_v19, 4 }
  0xcc   :  { %v1491_v39 = vmax.f32 %v4555_v57, %v1490_v63  ;;  %v1499_v31 = vmax.f32 %v4558_v1, %v1498_v46  ;;  %v1507_v7 = vmax.f32 %v4567_v13, %v1506_v27  ;;  %v1515_v47 = vmax.f32 %v4570_v15, %v1514_v28 }
  0xcd   :  { %v1461_v50 = vmax.f32 %v1459_v49, %v1460_v44  ;;  %v1469_v22 = vmax.f32 %v1467_v53, %v1468_v17  ;;  %v1477_v16 = vmax.f32 %v1475_v32, %v1476_v30  ;;  %v1485_v45 = vmax.f32 %v1483_v19, %v1484_v9 }
  0xce   :  { %v1492_v56 = vrot.slane %v1491_v39, 4  ;;  %v1500_v48 = vrot.slane %v1499_v31, 4  ;;  %v1508_v41 = vrot.slane %v1507_v7, 4  ;;  %v1516_v10 = vrot.slane %v1515_v47, 4 }
  0xcf   :  { %v1462_v6 = vrot.slane %v1461_v50, 2  ;;  %v1470_v40 = vrot.slane %v1469_v22, 2  ;;  %v1478_v51 = vrot.slane %v1477_v16, 2  ;;  %v1486_v29 = vrot.slane %v1485_v45, 2 }
  0xd0   :  { %v1493_v14 = vmax.f32 %v1491_v39, %v1492_v56  ;;  %v1501_v63 = vmax.f32 %v1499_v31, %v1500_v48  ;;  %v1509_v57 = vmax.f32 %v1507_v7, %v1508_v41  ;;  %v1517_v46 = vmax.f32 %v1515_v47, %v1516_v10 }
  0xd1   :  { %v1463_v1 = vmax.f32 %v1461_v50, %v1462_v6  ;;  %v1471_v27 = vmax.f32 %v1469_v22, %v1470_v40  ;;  %v1479_v13 = vmax.f32 %v1477_v16, %v1478_v51  ;;  %v1487_v28 = vmax.f32 %v1485_v45, %v1486_v29  ;;  %v6429_v6 = vld [vmem:[#allocation31_spill] sm:$0xff] }
  0xd2   :  { %v1494_v49 = vrot.slane %v1493_v14, 2  ;;  %v1502_v53 = vrot.slane %v1501_v63, 2  ;;  %v1510_v32 = vrot.slane %v1509_v57, 2  ;;  %v1518_v19 = vrot.slane %v1517_v46, 2 }
  0xd3   :  { %v1464_v44 = vrot.slane %v1463_v1, 1  ;;  %v1472_v17 = vrot.slane %v1471_v27, 1  ;;  %v1480_v30 = vrot.slane %v1479_v13, 1  ;;  %v1488_v9 = vrot.slane %v1487_v28, 1 }
  0xd4   :  { %v1495_v15 = vmax.f32 %v1493_v14, %v1494_v49  ;;  %v1503_v21 = vmax.f32 %v1501_v63, %v1502_v53  ;;  %v1511_v5 = vmax.f32 %v1509_v57, %v1510_v32  ;;  %v1519_v4 = vmax.f32 %v1517_v46, %v1518_v19  ;;  %v6430_v46 = vld [vmem:[#allocation3_spill] sm:$0xff]  ;;  %v6432_v53 = vld [vmem:[#allocation5_spill] sm:$0xff] }
  0xd5   :  { %v4649_v39 = vmax.f32 %v4596_v60, %v1448_v42  ;;  %v4652_v31 = vmax.f32 %v4598_v24, %v1456_v59  ;;  %v4654_v51 = vmax.f32 %v1463_v1, %v1464_v44  ;;  %v4656_v29 = vmax.f32 %v1471_v27, %v1472_v17 }
  0xd6   :  { %v1496_v40 = vrot.slane %v1495_v15, 1  ;;  %v1504_v7 = vrot.slane %v1503_v21, 1  ;;  %v1512_v47 = vrot.slane %v1511_v5, 1  ;;  %v1520_v50 = vrot.slane %v1519_v4, 1 }
  0xd7   :  { %v4658_v22 = vmax.f32 %v1479_v13, %v1480_v30  ;;  %v4660_v14 = vmax.f32 %v1487_v28, %v1488_v9  ;;  %v1522_v57 = vsub.f32 %v4480_v3, %v4610_v23  ;;  %v1523_v60 = vsub.f32 %v4483_v36, %v4612_v26  ;;  %v6431_v28 = vld [vmem:[#allocation4_spill] sm:$0xff]  ;;  %v6433_v30 = vld [vmem:[#allocation6_spill] sm:$0xff] }
  0xd8   :  { %v4666_v24 = vmax.f32 %v1495_v15, %v1496_v40  ;;  %v4668_v1 = vmax.f32 %v1503_v21, %v1504_v7  ;;  %v1524_v42 = vsub.f32 %v4486_v18, %v4610_v23  ;;  %v1525_v59 = vsub.f32 %v4492_v38, %v4612_v26 }
  0xd9   :  { %v4674_v13 = vmax.f32 %v1511_v5, %v1512_v47  ;;  %v4676_v16 = vmax.f32 %v1519_v4, %v1520_v50  ;;  %v1526_v3 = vsub.f32 %v4495_v35, %v4614_v62  ;;  %v1527_v36 = vsub.f32 %v4498_v12, %v4616_v34 }
  0xda   :  { %v1528_v21 = vsub.f32 %v4501_v25, %v4614_v62  ;;  %v1529_v15 = vsub.f32 %v4504_v58, %v4616_v34  ;;  %v1530_v18 = vsub.f32 %v4507_v61, %v4626_v33  ;;  %v1531_v38 = vsub.f32 %v4510_v37, %v4628_v2  ;;  %v6420_v25 = vld [vmem:[#allocation2_spill] sm:$0xff]  ;;  %v6421_v58 = vld [vmem:[#allocation23_spill] sm:$0xff]  ;;  %v6422_v61 = vld [vmem:[#allocation24_spill] sm:$0xff] }
  0xdb   :  { %v1532_v4 = vsub.f32 %v4513_v0, %v4626_v33  ;;  %v1533_v35 = vsub.f32 %v4516_v43, %v4628_v2  ;;  %v1534_v12 = vsub.f32 %v4519_v55, %v4649_v39  ;;  %v1535_v5 = vsub.f32 %v6420_v25, %v4652_v31  ;;  %v6423_v34 = vld [vmem:[#allocation25_spill] sm:$0xff]  ;;  %v6424_v2 = vld [vmem:[#allocation26_spill] sm:$0xff]  ;;  %v4777_v25 = vld [vmem:[%s6026_s2 + $0x50] sm:$0xff] }
  0xdc   :  { %v1536_v23 = vsub.f32 %v6421_v58, %v4649_v39  ;;  %v1537_v26 = vsub.f32 %v6422_v61, %v4652_v31  ;;  %v1538_v37 = vsub.f32 %v4531_v8, %v4654_v51  ;;  %v1539_v0 = vsub.f32 %v4534_v54, %v4656_v29  ;;  %v6425_v8 = vld [vmem:[#allocation27_spill] sm:$0xff]  ;;  %v6426_v54 = vld [vmem:[#allocation28_spill] sm:$0xff] }
  0xdd   :  { %v1540_v43 = vsub.f32 %v4537_v52, %v4654_v51  ;;  %v1541_v55 = vsub.f32 %v4540_v11, %v4656_v29  ;;  %v1542_v62 = vsub.f32 %v4543_v20, %v4658_v22  ;;  %v1543_v33 = vsub.f32 %v6423_v34, %v4660_v14  ;;  %v6427_v52 = vld [vmem:[#allocation29_spill] sm:$0xff]  ;;  %v4725_v11 = vld [vmem:[%s6026_s2] sm:$0xff] }
  0xde   :  { %v1544_v45 = vsub.f32 %v6424_v2, %v4658_v22  ;;  %v1545_v56 = vsub.f32 %v6425_v8, %v4660_v14  ;;  %v1546_v48 = vsub.f32 %v6426_v54, %v4666_v24  ;;  %v1547_v41 = vsub.f32 %v6427_v52, %v4668_v1  ;;  %v6428_v20 = vld [vmem:[#allocation30_spill] sm:$0xff] }
  0xdf   :  { %v1548_v10 = vsub.f32 %v6428_v20, %v4666_v24  ;;  %v1549_v63 = vsub.f32 %v6429_v6, %v4668_v1  ;;  %v1550_v27 = vsub.f32 %v6430_v46, %v4674_v13  ;;  %v1551_v49 = vsub.f32 %v6431_v28, %v4676_v16  ;;  %v4810_v2 = vld [vmem:[%s6026_s2 + $0x80] sm:$0x11] }
  0xe0   :  { %v1552_v32 = vsub.f32 %v6432_v53, %v4674_v13  ;;  %v1554_v19 = vmul.f32 1.442695, %v1522_v57  ;;  %v1556_v44 = vmul.f32 1.442695, %v1523_v60  ;;  %v1558_v17 = vmul.f32 1.442695, %v1524_v42 }
  0xe1   :  { %v1553_v9 = vsub.f32 %v6433_v30, %v4676_v16  ;;  %v1560_v39 = vmul.f32 1.442695, %v1525_v59  ;;  %v1562_v31 = vmul.f32 1.442695, %v1526_v3  ;;  %v1564_v29 = vmul.f32 1.442695, %v1527_v36 }
  0xe2   :  { %3056 = vpow2.f32 %v1554_v19  ;;  %v1566_v40 = vmul.f32 1.442695, %v1528_v21  ;;  %v1568_v47 = vmul.f32 1.442695, %v1529_v15  ;;  %v1570_v50 = vmul.f32 1.442695, %v1530_v18 }
  0xe3   :  { %3058 = vpow2.f32 %v1556_v44  ;;  %v1572_v22 = vmul.f32 1.442695, %v1531_v38  ;;  %v1574_v14 = vmul.f32 1.442695, %v1532_v4  ;;  %v1576_v57 = vmul.f32 1.442695, %v1533_v35 }
  0xe4   :  { %3060 = vpow2.f32 %v1558_v17  ;;  %v1578_v60 = vmul.f32 1.442695, %v1534_v12  ;;  %v1580_v24 = vmul.f32 1.442695, %v1535_v5  ;;  %v1582_v1 = vmul.f32 1.442695, %v1536_v23 }
  0xe5   :  { %3062 = vpow2.f32 %v1560_v39  ;;  %v1584_v42 = vmul.f32 1.442695, %v1537_v26  ;;  %v4741_v59 = vmul.f32 1.442695, %v1538_v37  ;;  %v4743_v13 = vmul.f32 1.442695, %v1539_v0 }
  0xe6   :  { %3064 = vpow2.f32 %v1562_v31  ;;  %v4745_v16 = vmul.f32 1.442695, %v1540_v43  ;;  %v4750_v3 = vld [vmem:[%s6026_s2 + $0x8] sm:$0x11]  ;;  %v4752_v36 = vmul.f32 1.442695, %v1541_v55 }
  0xe7   :  { %3066 = vpow2.f32 %v1564_v29  ;;  %v4754_v21 = vmul.f32 1.442695, %v1542_v62  ;;  %v4756_v15 = vmul.f32 1.442695, %v1543_v33  ;;  %v4761_v18 = vld [vmem:[%s6026_s2 + $0x28] sm:$0xff]  ;;  %v4801_v55 = vld [vmem:[%s6026_s2 + $0x78] sm:$0xff] }
  0xe8   :  { %v4766_v38 = vld [vmem:[%s6026_s2 + $0x30] sm:$0x11]  ;;  %3068 = vpow2.f32 %v1566_v40  ;;  %v4768_v4 = vmul.f32 1.442695, %v1544_v45  ;;  %v4770_v35 = vmul.f32 1.442695, %v1545_v56 }
  0xe9   :  { %v4772_v12 = vmul.f32 1.442695, %v1546_v48  ;;  %3070 = vpow2.f32 %v1568_v47  ;;  %v4779_v5 = vmul.f32 1.442695, %v1547_v41  ;;  %v4781_v58 = vmul.f32 1.442695, %v1548_v10 }
  0xea   :  { %v4783_v23 = vmul.f32 1.442695, %v1549_v63  ;;  %3072 = vpow2.f32 %v1570_v50  ;;  %v4785_v61 = vmul.f32 1.442695, %v1550_v27  ;;  %v4787_v26 = vmul.f32 1.442695, %v1551_v49 }
  0xeb   :  { %v4789_v37 = vmul.f32 1.442695, %v1552_v32  ;;  %3074 = vpow2.f32 %v1572_v22  ;;  %v4791_v0 = vmul.f32 1.442695, %v1553_v9  ;;  %v4796_v43 = vld [vmem:[%s6026_s2 + $0x58] sm:$0x11] }
  0xec   :  { %6434 = vst [vmem:[#allocation7_spill] sm:$0xff] %v4796_v43  ;;  %6435 = vst [vmem:[#allocation8_spill] sm:$0xff] %v4801_v55  ;;  %v4805_v33 = vpop.eup %3056  ;;  %3076 = vpow2.f32 %v1574_v14  ;;  %v4825_v10 = vld [vmem:[%s6026_s2 + $0xa0] sm:$0xff]  ;;  %v4837_v49 = vld [vmem:[%s6026_s2 + $0xa8] sm:$0x11] }
  0xed   :  { %6436 = vst [vmem:[#allocation9_spill] sm:$0xff] %v4810_v2  ;;  %v4815_v54 = vpop.eup %3058  ;;  %3078 = vpow2.f32 %v1576_v57  ;;  %6437 = vst [vmem:[#allocation10_spill] sm:$0xff] %v4825_v10  ;;  %v4849_v30 = vld [vmem:[%s6026_s2 + $0xc8] sm:$0xff] }
  0xee   :  { %v4820_v20 = vpop.eup %3060  ;;  %3080 = vpow2.f32 %v1578_v60  ;;  %6438 = vst [vmem:[#allocation11_spill] sm:$0xff] %v4837_v49  ;;  %6439 = vst [vmem:[#allocation12_spill] sm:$0xff] %v4849_v30 }
  0xef   :  { %v4830_v27 = vpop.eup %3062  ;;  %3082 = vpow2.f32 %v1580_v24  ;;  %v1618_v28 = vsel %vm1393_vm3, %v4820_v20, 0.0 }
  0xf0   :  { %v4841_v19 = vpop.eup %3064  ;;  %3084 = vpow2.f32 %v1582_v1  ;;  %v1619_v44 = vadd.f32 %v4805_v33, %v1618_v28  ;;  %v1626_v17 = vsel %vm1393_vm3, %v4830_v27, 0.0  ;;  %v4870_v1 = vld [vmem:[%s6026_s2 + $0xd0] sm:$0x11] }
  0xf1   :  { %v4852_v39 = vpop.eup %3066  ;;  %3086 = vpow2.f32 %v1584_v42  ;;  %v1627_v31 = vadd.f32 %v4815_v54, %v1626_v17  ;;  %6440 = vst [vmem:[#allocation13_spill] sm:$0xff] %v4870_v1 }
  0xf2   :  { %v4857_v47 = vpop.eup %3068  ;;  %3088 = vpow2.f32 %v4741_v59  ;;  %v1620_v50 = vrot.slane %v1619_v44, 4 }
  0xf3   :  { %v4862_v57 = vpop.eup %3070  ;;  %3090 = vpow2.f32 %v4743_v13  ;;  %v1628_v60 = vrot.slane %v1627_v31, 4  ;;  %v1634_v24 = vsel %vm1393_vm3, %v4857_v47, 0.0 }
  0xf4   :  { %v4873_v59 = vpop.eup %3072  ;;  %3092 = vpow2.f32 %v4745_v16  ;;  %v1621_v28 = vadd.f32 %v1620_v50, %v1619_v44  ;;  %v1635_v17 = vadd.f32 %v4841_v19, %v1634_v24  ;;  %v1642_v13 = vsel %vm1393_vm3, %v4862_v57, 0.0 }
  0xf5   :  { %v4879_v14 = vpop.eup %3074  ;;  %3094 = vpow2.f32 %v4752_v36  ;;  %v1629_v22 = vadd.f32 %v1628_v60, %v1627_v31  ;;  %v1643_v40 = vadd.f32 %v4852_v39, %v1642_v13 }
  0xf6   :  { %v4884_v42 = vpop.eup %3076  ;;  %3096 = vpow2.f32 %v4754_v21  ;;  %v1622_v16 = vrot.slane %v1621_v28, 2  ;;  %v1636_v44 = vrot.slane %v1635_v17, 4 }
  0xf7   :  { %v4888_v24 = vpop.eup %3078  ;;  %3098 = vpow2.f32 %v4756_v15  ;;  %v1630_v9 = vrot.slane %v1629_v22, 2  ;;  %v1644_v32 = vrot.slane %v1643_v40, 4  ;;  %v1650_v36 = vsel %vm1393_vm3, %v4884_v42, 0.0 }
  0xf8   :  { %v4893_v31 = vpop.eup %3080  ;;  %3100 = vpow2.f32 %v4768_v4  ;;  %v1623_v60 = vadd.f32 %v1622_v16, %v1621_v28  ;;  %v1637_v13 = vadd.f32 %v1636_v44, %v1635_v17  ;;  %v1651_v21 = vadd.f32 %v4873_v59, %v1650_v36  ;;  %v4908_v28 = vld [vmem:[%s6026_s2 + $0xf0] sm:$0xff] }
  0xf9   :  { %v4897_v29 = vpop.eup %3082  ;;  %3102 = vpow2.f32 %v4770_v35  ;;  %v1631_v50 = vadd.f32 %v1630_v9, %v1629_v22  ;;  %v1645_v53 = vadd.f32 %v1644_v32, %v1643_v40  ;;  %v1658_v15 = vsel %vm1393_vm3, %v4888_v24, 0.0 }
  0xfa   :  { %v4902_v46 = vpop.eup %3084  ;;  %3104 = vpow2.f32 %v4772_v12  ;;  %v1624_v63 = vrot.slane %v1623_v60, 1  ;;  %v1638_v6 = vrot.slane %v1637_v13, 2  ;;  %v1652_v4 = vrot.slane %v1651_v21, 4 }
  0xfb   :  { %v4910_v17 = vpop.eup %3086  ;;  %3106 = vpow2.f32 %v4779_v5  ;;  %v1632_v35 = vrot.slane %v1631_v50, 1  ;;  %v1646_v32 = vrot.slane %v1645_v53, 2  ;;  %v1659_v9 = vadd.f32 %v4879_v14, %v1658_v15 }
  0xfc   :  { %v4914_v40 = vpop.eup %3088  ;;  %3108 = vpow2.f32 %v4781_v58  ;;  %v1639_v12 = vadd.f32 %v1638_v6, %v1637_v13  ;;  %v1653_v22 = vadd.f32 %v1652_v4, %v1651_v21  ;;  %v1625_v48 = vadd.f32 %v1624_v63, %v1623_v60 }
  0xfd   :  { %v4918_v44 = vpop.eup %3090  ;;  %3110 = vpow2.f32 %v4783_v23  ;;  %v1647_v36 = vadd.f32 %v1646_v32, %v1645_v53  ;;  %v1660_v41 = vrot.slane %v1659_v9, 4  ;;  %v1666_v58 = vsel %vm1393_vm3, %v4902_v46, 0.0 }
  0xfe   :  { %v4922_v52 = vpop.eup %3092  ;;  %v1640_v15 = vrot.slane %v1639_v12, 1  ;;  %v1654_v56 = vrot.slane %v1653_v22, 2  ;;  %3112 = vpow2.f32 %v4785_v61  ;;  %v4929_v13 = vadd.f32 %v1632_v35, %v1631_v50 }
  0xff   :  { %v4926_v6 = vpop.eup %3094  ;;  %v1661_v21 = vadd.f32 %v1660_v41, %v1659_v9  ;;  %v1667_v23 = vadd.f32 %v4893_v31, %v1666_v58  ;;  %3114 = vpow2.f32 %v4789_v37  ;;  %v1648_v4 = vrot.slane %v1647_v36, 1 }
 0x100   :  { %6441 = vst [vmem:[#allocation14_spill] sm:$0xff] %v4926_v6  ;;  %v4932_v53 = vpop.eup %3096  ;;  %v1655_v63 = vadd.f32 %v1654_v56, %v1653_v22  ;;  %v1674_v60 = vsel %vm1393_vm3, %v4910_v17, 0.0  ;;  %3116 = vpow2.f32 %v4787_v26  ;;  %v4940_v5 = vadd.f32 %v1640_v15, %v1639_v12 }
 0x101   :  { %6442 = vst [vmem:[#allocation15_spill] sm:$0xff] %v4932_v53  ;;  %v4937_v32 = vpop.eup %3098  ;;  %v1662_v61 = vrot.slane %v1661_v21, 2  ;;  %v1668_v50 = vrot.slane %v1667_v23, 4  ;;  %v1675_v9 = vadd.f32 %v4897_v29, %v1674_v60  ;;  %v1682_v37 = vsel %vm1393_vm3, %v4922_v52, 0.0 }
 0x102   :  { %6443 = vst [vmem:[#allocation16_spill] sm:$0xff] %v4937_v32  ;;  %v4942_v41 = vpop.eup %3100  ;;  %v1656_v35 = vrot.slane %v1655_v63, 1  ;;  %v1690_v56 = vsel %vm1393_vm3, %v4926_v6, 0.0  ;;  %3118 = vpow2.f32 %v4791_v0  ;;  %v1683_v12 = vadd.f32 %v4914_v40, %v1682_v37 }
 0x103   :  { %6444 = vst [vmem:[#allocation17_spill] sm:$0xff] %v4942_v41  ;;  %v4949_v22 = vpop.eup %3102  ;;  %v1669_v26 = vadd.f32 %v1668_v50, %v1667_v23  ;;  %v1691_v15 = vadd.f32 %v4918_v44, %v1690_v56  ;;  %v4956_v16 = vadd.f32 %v1648_v4, %v1647_v36  ;;  %v1676_v60 = vrot.slane %v1675_v9, 4 }
 0x104   :  { %6445 = vst [vmem:[#allocation18_spill] sm:$0xff] %v4949_v22  ;;  %v4954_v58 = vpop.eup %3104  ;;  %v1698_v8 = vsel %vm1393_vm3, %v4942_v41, 0.0  ;;  %v1706_v45 = vsel %vm1393_vm3, %v4949_v22, 0.0  ;;  %v1663_v7 = vadd.f32 %v1662_v61, %v1661_v21  ;;  %v1684_v23 = vrot.slane %v1683_v12, 4 }
 0x105   :  { %6446 = vst [vmem:[#allocation19_spill] sm:$0xff] %v4954_v58  ;;  %v4962_v34 = vpop.eup %3106  ;;  %v1670_v0 = vrot.slane %v1669_v26, 2  ;;  %v1692_v50 = vrot.slane %v1691_v15, 4  ;;  %v4966_v56 = vadd.f32 %v1656_v35, %v1655_v63  ;;  %v1677_v51 = vadd.f32 %v1676_v60, %v1675_v9 }
 0x106   :  { %v4964_v37 = vpop.eup %3108  ;;  %v1699_v36 = vadd.f32 %v4932_v53, %v1698_v8  ;;  %v1707_v4 = vadd.f32 %v4937_v32, %v1706_v45  ;;  %v1685_v30 = vadd.f32 %v1684_v23, %v1683_v12  ;;  %3120 = vrcp.f32 %v1625_v48 }
 0x107   :  { %6447 = vst [vmem:[#allocation20_spill] sm:$0xff] %v4964_v37  ;;  %v4970_v62 = vpop.eup %3110  ;;  %v1671_v1 = vadd.f32 %v1670_v0, %v1669_v26  ;;  %v1693_v49 = vadd.f32 %v1692_v50, %v1691_v15  ;;  %v1678_v10 = vrot.slane %v1677_v51, 2  ;;  %v1714_v2 = vsel %vm1393_vm3, %v4964_v37, 0.0 }
 0x108   :  { %6448 = vst [vmem:[#allocation21_spill] sm:$0xff] %v4970_v62  ;;  %v1700_v21 = vrot.slane %v1699_v36, 4  ;;  %v1708_v61 = vrot.slane %v1707_v4, 4  ;;  %v4974_v22 = vpop.eup %3112  ;;  %v1664_v63 = vrot.slane %v1663_v7, 1  ;;  %v1686_v35 = vrot.slane %v1685_v30, 2 }
 0x109   :  { %v1694_v9 = vrot.slane %v1693_v49, 2  ;;  %v1715_v8 = vadd.f32 %v4954_v58, %v1714_v2  ;;  %v4977_v45 = vpop.eup %3114  ;;  %v1679_v60 = vadd.f32 %v1678_v10, %v1677_v51  ;;  %v1722_v48 = vsel %vm1393_vm3, %v4970_v62, 0.0 }
 0x10a   :  { %6449 = vst [vmem:[#allocation22_spill] sm:$0xff] %v4977_v45  ;;  %v1701_v26 = vadd.f32 %v1700_v21, %v1699_v36  ;;  %v1709_v12 = vadd.f32 %v1708_v61, %v1707_v4  ;;  %v4981_v15 = vpop.eup %3116  ;;  %v1672_v0 = vrot.slane %v1671_v1, 1  ;;  %v1687_v23 = vadd.f32 %v1686_v35, %v1685_v30 }
 0x10b   :  { %v1695_v50 = vadd.f32 %v1694_v9, %v1693_v49  ;;  %v1716_v37 = vrot.slane %v1715_v8, 4  ;;  %v1680_v32 = vrot.slane %v1679_v60, 1  ;;  %v1723_v53 = vadd.f32 %v4962_v34, %v1722_v48 }
 0x10c   :  { %v1702_v55 = vrot.slane %v1701_v26, 2  ;;  %v1710_v41 = vrot.slane %v1709_v12, 2  ;;  %v4984_v2 = vpop.eup %3118  ;;  %v1665_v58 = vadd.f32 %v1664_v63, %v1663_v7  ;;  %v1688_v51 = vrot.slane %v1687_v23, 1 }
 0x10d   :  { %v1717_v10 = vadd.f32 %v1716_v37, %v1715_v8  ;;  %v1730_v36 = vsel %vm1393_vm3, %v4977_v45, 0.0  ;;  %v1696_v4 = vrot.slane %v1695_v50, 1  ;;  %v1724_v62 = vrot.slane %v1723_v53, 4 }
 0x10e   :  { %v1703_v21 = vadd.f32 %v1702_v55, %v1701_v26  ;;  %v1711_v61 = vadd.f32 %v1710_v41, %v1709_v12  ;;  %v1673_v30 = vadd.f32 %v1672_v0, %v1671_v1  ;;  %v1681_v49 = vadd.f32 %v1680_v32, %v1679_v60 }
 0x10f   :  { %v1718_v35 = vrot.slane %v1717_v10, 2  ;;  %v1731_v9 = vadd.f32 %v4974_v22, %v1730_v36  ;;  %v1725_v48 = vadd.f32 %v1724_v62, %v1723_v53  ;;  %v1738_v7 = vsel %vm1393_vm3, %v4984_v2, 0.0 }
 0x110   :  { %v1704_v43 = vrot.slane %v1703_v21, 1  ;;  %v1712_v6 = vrot.slane %v1711_v61, 1  ;;  %v3121_v63 = vpop.eup %3120  ;;  %v1739_v45 = vadd.f32 %v4981_v15, %v1738_v7  ;;  %3122 = vrcp.f32 %v4929_v13 }
 0x111   :  { %v1719_v37 = vadd.f32 %v1718_v35, %v1717_v10  ;;  %v1732_v8 = vrot.slane %v1731_v9, 4  ;;  %v1689_v55 = vadd.f32 %v1688_v51, %v1687_v23  ;;  %v1697_v41 = vadd.f32 %v1696_v4, %v1695_v50  ;;  %v5027_v35 = vld [vmem:[%s6026_s2 + $0x8] sm:$0xff] }
 0x112   :  { %v1726_v1 = vrot.slane %v1725_v48, 2  ;;  %3124 = vrcp.f32 %v4940_v5  ;;  %v1740_v26 = vrot.slane %v1739_v45, 4  ;;  %v1705_v62 = vadd.f32 %v1704_v43, %v1703_v21  ;;  %v5002_v5 = vld [vmem:[%s6026_s2 + $0xf8] sm:$0x11] }
 0x113   :  { %v1720_v32 = vrot.slane %v1719_v37, 1  ;;  %v1733_v60 = vadd.f32 %v1732_v8, %v1731_v9  ;;  %3126 = vrcp.f32 %v4956_v16  ;;  %v1713_v53 = vadd.f32 %v1712_v6, %v1711_v61  ;;  %v5010_v16 = vld [vmem:[%s6026_s2 + $0x118] sm:$0xff] }
 0x114   :  { %v1727_v12 = vadd.f32 %v1726_v1, %v1725_v48  ;;  %3128 = vrcp.f32 %v4966_v56  ;;  %v1741_v10 = vadd.f32 %v1740_v26, %v1739_v45  ;;  %v4997_v13 = vmul.f32 %v3121_v63, %v4805_v33  ;;  %v5015_v33 = vld [vmem:[%s6026_s2 + $0x120] sm:$0x11] }
 0x115   :  { %v1734_v0 = vrot.slane %v1733_v60, 2  ;;  %3130 = vrcp.f32 %v1665_v58  ;;  %v1721_v23 = vadd.f32 %v1720_v32, %v1719_v37  ;;  %v5005_v43 = vmul.f32 %v3121_v63, %v4820_v20 }
 0x116   :  { %v1728_v50 = vrot.slane %v1727_v12, 1  ;;  %3132 = vrcp.f32 %v1673_v30  ;;  %v1742_v58 = vrot.slane %v1741_v10, 2  ;;  %v6450_v63 = vunpack.c.l.bf16 %v4750_v3  ;;  %v6488_v30 = vld [vmem:[#allocation19_spill] sm:$0xff] }
 0x117   :  { %v1735_v6 = vadd.f32 %v1734_v0, %v1733_v60  ;;  %3134 = vrcp.f32 %v1681_v49  ;;  %v6451_v1 = vunpack.c.l.bf16 %v4725_v11 }
 0x118   :  { %v1729_v45 = vadd.f32 %v1728_v50, %v1727_v12  ;;  %3136 = vrcp.f32 %v1689_v55  ;;  %v1743_v4 = vadd.f32 %v1742_v58, %v1741_v10  ;;  %v1844_v37 = vmul.f32 %v6450_v63, %v5005_v43 }
 0x119   :  { %v1736_v36 = vrot.slane %v1735_v6, 1  ;;  %3138 = vrcp.f32 %v1697_v41  ;;  %v5041_v32 = vmul.f32 %v6451_v1, %v4997_v13  ;;  %v6463_v63 = vunpack.c.h.bf16 %v4766_v38 }
 0x11a   :  { %3140 = vrcp.f32 %v1705_v62  ;;  %v3123_v9 = vpop.eup %3122  ;;  %v1744_v7 = vrot.slane %v1743_v4, 1 }
 0x11b   :  { %v1737_v48 = vadd.f32 %v1736_v36, %v1735_v6  ;;  %3142 = vrcp.f32 %v1713_v53  ;;  %v5033_v55 = vmul.f32 %v3123_v9, %v4815_v54  ;;  %v5036_v41 = vmul.f32 %v3123_v9, %v4830_v27 }
 0x11c   :  { %v3125_v8 = vpop.eup %3124  ;;  %3144 = vrcp.f32 %v1721_v23  ;;  %v1745_v26 = vadd.f32 %v1744_v7, %v1743_v4  ;;  %v1874_v6 = vsel %vm1393_vm3, %v1844_v37, 0.0 }
 0x11d   :  { %v3127_v60 = vpop.eup %3126  ;;  %3146 = vrcp.f32 %v1729_v45  ;;  %v5044_v62 = vmul.f32 %v3125_v8, %v4841_v19  ;;  %v5051_v27 = vmul.f32 %v3125_v8, %v4857_v47  ;;  %v6452_v19 = vunpack.c.h.bf16 %v4725_v11 }
 0x11e   :  { %v3129_v12 = vpop.eup %3128  ;;  %3148 = vrcp.f32 %v1737_v48  ;;  %v5048_v54 = vmul.f32 %v3127_v60, %v4852_v39  ;;  %v5054_v0 = vmul.f32 %v3127_v60, %v4862_v57  ;;  %v6467_v60 = vunpack.c.h.bf16 %v4777_v25 }
 0x11f   :  { %v3131_v10 = vpop.eup %3130  ;;  %3150 = vrcp.f32 %v1745_v26  ;;  %v5057_v23 = vmul.f32 %v3129_v12, %v4873_v59  ;;  %v5062_v50 = vmul.f32 %v6452_v19, %v5033_v55  ;;  %v5069_v47 = vmul.f32 %v3129_v12, %v4884_v42 }
 0x120   :  { %v3133_v39 = vpop.eup %3132  ;;  %v5066_v58 = vmul.f32 %v3131_v10, %v4879_v14  ;;  %v5072_v57 = vmul.f32 %v3131_v10, %v4888_v24  ;;  %v6455_v59 = vunpack.c.h.bf16 %v4750_v3  ;;  %v6458_v14 = vunpack.c.l.bf16 %v4761_v18 }
 0x121   :  { %6453 = vst [vmem:[#allocation2_spill] sm:$0xff] %v5069_v47  ;;  %v3135_v36 = vpop.eup %3134  ;;  %v5078_v11 = vmul.f32 %v3133_v39, %v4893_v31  ;;  %v5081_v4 = vmul.f32 %v3133_v39, %v4902_v46  ;;  %v6459_v42 = vunpack.c.h.bf16 %v4761_v18  ;;  %v6462_v31 = vunpack.c.l.bf16 %v4766_v38  ;;  %v6469_v38 = vld [vmem:[#allocation14_spill] sm:$0xff] }
 0x122   :  { %6454 = vst [vmem:[#allocation23_spill] sm:$0xff] %v5072_v57  ;;  %v1845_v45 = vmul.f32 %v6455_v59, %v5036_v41  ;;  %v1846_v9 = vmul.f32 %v6458_v14, %v5044_v62  ;;  %v3137_v48 = vpop.eup %3136  ;;  %v5090_v7 = vmul.f32 %v3135_v36, %v4897_v29  ;;  %v5093_v3 = vmul.f32 %v3135_v36, %v4910_v17 }
 0x123   :  { %6456 = vst [vmem:[#allocation24_spill] sm:$0xff] %v5078_v11  ;;  %6457 = vst [vmem:[#allocation25_spill] sm:$0xff] %v5081_v4  ;;  %v1847_v24 = vmul.f32 %v6459_v42, %v5048_v54  ;;  %v1848_v46 = vmul.f32 %v6462_v31, %v5051_v27  ;;  %v1849_v37 = vmul.f32 %v6463_v63, %v5054_v0  ;;  %v3139_v8 = vpop.eup %3138  ;;  %v6466_v29 = vunpack.c.l.bf16 %v4777_v25  ;;  %v6474_v42 = vld [vmem:[#allocation15_spill] sm:$0xff]  ;;  %v6476_v25 = vld [vmem:[#allocation17_spill] sm:$0xff] }
 0x124   :  { %6460 = vst [vmem:[#allocation26_spill] sm:$0xff] %v5090_v7  ;;  %6461 = vst [vmem:[#allocation27_spill] sm:$0xff] %v5093_v3  ;;  %v5102_v1 = vmul.f32 %v3137_v48, %v4914_v40  ;;  %v5105_v18 = vmul.f32 %v3137_v48, %v4922_v52  ;;  %v1851_v26 = vmul.f32 %v6467_v60, %v5066_v58  ;;  %v3141_v12 = vpop.eup %3140  ;;  %v6471_v40 = vld [vmem:[#allocation7_spill] sm:$0xff] }
 0x125   :  { %v1850_v17 = vmul.f32 %v6466_v29, %v5057_v23  ;;  %v5114_v10 = vmul.f32 %v3139_v8, %v4918_v44  ;;  %v5117_v19 = vmul.f32 %v3139_v8, %v6469_v38  ;;  %v6472_v39 = vunpack.c.l.bf16 %v6471_v40  ;;  %v3143_v14 = vpop.eup %3142  ;;  %v6478_v44 = vld [vmem:[#allocation8_spill] sm:$0xff] }
 0x126   :  { %6464 = vst [vmem:[#allocation28_spill] sm:$0xff] %v5102_v1  ;;  %6465 = vst [vmem:[#allocation29_spill] sm:$0xff] %v5105_v18  ;;  %v6473_v59 = vunpack.c.h.bf16 %v6471_v40  ;;  %v5126_v48 = vmul.f32 %v3141_v12, %v6474_v42  ;;  %v5129_v31 = vmul.f32 %v3141_v12, %v6476_v25  ;;  %v6479_v63 = vunpack.c.l.bf16 %v6478_v44  ;;  %v3145_v38 = vpop.eup %3144  ;;  %v6483_v40 = vld [vmem:[#allocation18_spill] sm:$0xff]  ;;  %v6485_v42 = vld [vmem:[#allocation9_spill] sm:$0xff] }
 0x127   :  { %6468 = vst [vmem:[#allocation30_spill] sm:$0xff] %v5114_v10  ;;  %6470 = vst [vmem:[#allocation31_spill] sm:$0xff] %v5117_v19  ;;  %v1852_v52 = vmul.f32 %v6472_v39, %v5069_v47  ;;  %v6480_v29 = vunpack.c.h.bf16 %v6478_v44  ;;  %v6481_v39 = vld [vmem:[#allocation16_spill] sm:$0xff]  ;;  %v6486_v49 = vunpack.c.l.bf16 %v6485_v42  ;;  %v6487_v25 = vunpack.c.h.bf16 %v6485_v42 }
 0x128   :  { %v1853_v36 = vmul.f32 %v6473_v59, %v5072_v57  ;;  %6475 = vst [vmem:[#allocation3_spill] sm:$0xff] %v5126_v48  ;;  %6477 = vst [vmem:[#allocation4_spill] sm:$0xff] %v5129_v31  ;;  %v1854_v8 = vmul.f32 %v6479_v63, %v5078_v11  ;;  %v5138_v53 = vmul.f32 %v3143_v14, %v6481_v39  ;;  %v3147_v63 = vpop.eup %3146  ;;  %v6490_v44 = vld [vmem:[#allocation20_spill] sm:$0xff]  ;;  %v6492_v39 = vld [vmem:[#allocation10_spill] sm:$0xff] }
 0x129   :  { %v1855_v60 = vmul.f32 %v6480_v29, %v5090_v7  ;;  %v5141_v59 = vmul.f32 %v3143_v14, %v6483_v40  ;;  %v1856_v12 = vmul.f32 %v6486_v49, %v5081_v4  ;;  %v1857_v61 = vmul.f32 %v6487_v25, %v5093_v3  ;;  %v3149_v20 = vpop.eup %3148  ;;  %v6496_v25 = vld [vmem:[#allocation21_spill] sm:$0xff] }
 0x12a   :  { %6482 = vst [vmem:[#allocation5_spill] sm:$0xff] %v5138_v53  ;;  %v5150_v21 = vmul.f32 %v3145_v38, %v6488_v30  ;;  %v5153_v29 = vmul.f32 %v3145_v38, %v6490_v44  ;;  %v6493_v51 = vunpack.c.l.bf16 %v6492_v39  ;;  %v6494_v40 = vunpack.c.h.bf16 %v6492_v39  ;;  %v6498_v38 = vld [vmem:[#allocation11_spill] sm:$0xff]  ;;  %v3151_v39 = vpop.eup %3150 }
 0x12b   :  { %6484 = vst [vmem:[#allocation6_spill] sm:$0xff] %v5141_v59  ;;  %v5166_v42 = vmul.f32 %v3147_v63, %v4962_v34  ;;  %v5169_v30 = vmul.f32 %v3147_v63, %v6496_v25  ;;  %v6499_v44 = vunpack.c.l.bf16 %v6498_v38  ;;  %v6504_v63 = vld [vmem:[#allocation12_spill] sm:$0xff] }
 0x12c   :  { %6489 = vst [vmem:[#allocation14_spill] sm:$0xff] %v5150_v21  ;;  %6491 = vst [vmem:[#allocation7_spill] sm:$0xff] %v5153_v29  ;;  %v5158_v14 = vmul.f32 %v6493_v51, %v5102_v1  ;;  %v5163_v49 = vmul.f32 %v6494_v40, %v5114_v10  ;;  %v6500_v51 = vunpack.c.h.bf16 %v6498_v38  ;;  %v5182_v40 = vmul.f32 %v3149_v20, %v4974_v22  ;;  %v6502_v10 = vld [vmem:[#allocation22_spill] sm:$0xff]  ;;  %v6508_v22 = vld [vmem:[#allocation13_spill] sm:$0xff] }
 0x12d   :  { %6495 = vst [vmem:[#allocation15_spill] sm:$0xff] %v5166_v42  ;;  %6497 = vst [vmem:[#allocation17_spill] sm:$0xff] %v5169_v30  ;;  %v5174_v56 = vmul.f32 %v6499_v44, %v5105_v18  ;;  %v5185_v34 = vmul.f32 %v3149_v20, %v6502_v10  ;;  %v6505_v25 = vunpack.c.l.bf16 %v6504_v63  ;;  %v6506_v44 = vunpack.c.h.bf16 %v6504_v63 }
 0x12e   :  { %v5179_v1 = vmul.f32 %v6500_v51, %v5117_v19  ;;  %6501 = vst [vmem:[#allocation8_spill] sm:$0xff] %v5182_v40  ;;  %v5198_v38 = vmul.f32 %v3151_v39, %v4981_v15  ;;  %v5201_v51 = vmul.f32 %v3151_v39, %v4984_v2  ;;  %v6509_v20 = vunpack.c.l.bf16 %v6508_v22 }
 0x12f   :  { %6503 = vst [vmem:[#allocation16_spill] sm:$0xff] %v5185_v34  ;;  %v5190_v3 = vmul.f32 %v6505_v25, %v5126_v48  ;;  %v5195_v18 = vmul.f32 %v6506_v44, %v5138_v53  ;;  %v6510_v25 = vunpack.c.h.bf16 %v6508_v22  ;;  %v6511_v63 = vunpack.c.l.bf16 %v4908_v28 }
 0x130   :  { %6507 = vst [vmem:[#allocation18_spill] sm:$0xff] %v5198_v38  ;;  %v5206_v10 = vmul.f32 %v6509_v20, %v5129_v31  ;;  %v6512_v15 = vunpack.c.h.bf16 %v4908_v28  ;;  %v6513_v39 = vunpack.c.l.bf16 %v5002_v5  ;;  %v6514_v22 = vunpack.c.h.bf16 %v5002_v5 }
 0x131   :  { %v5211_v48 = vmul.f32 %v6510_v25, %v5141_v59  ;;  %v5216_v44 = vmul.f32 %v6511_v63, %v5150_v21  ;;  %v6515_v59 = vunpack.c.l.bf16 %v5010_v16  ;;  %v6516_v28 = vunpack.c.l.bf16 %v5015_v33 }
 0x132   :  { %v5221_v2 = vmul.f32 %v6512_v15, %v5166_v42  ;;  %v5226_v20 = vmul.f32 %v6513_v39, %v5153_v29  ;;  %v5231_v25 = vmul.f32 %v6514_v22, %v5169_v30  ;;  %v1875_v42 = vadd.f32 %v1874_v6, %v5041_v32 }
 0x133   :  { %v5236_v63 = vmul.f32 %v6515_v59, %v5182_v40  ;;  %v5241_v15 = vmul.f32 %v6516_v28, %v5185_v34  ;;  %v1882_v39 = vsel %vm1393_vm3, %v1845_v45, 0.0  ;;  %v1890_v5 = vsel %vm1393_vm3, %v1848_v46, 0.0 }
 0x134   :  { %v1883_v29 = vadd.f32 %v1882_v39, %v5062_v50  ;;  %v1898_v22 = vsel %vm1393_vm3, %v1849_v37, 0.0  ;;  %v1906_v30 = vsel %vm1393_vm3, %v1852_v52, 0.0  ;;  %v1876_v21 = vrot.slane %v1875_v42, 4 }
 0x135   :  { %v1891_v59 = vadd.f32 %v1890_v5, %v1846_v9  ;;  %v1899_v40 = vadd.f32 %v1898_v22, %v1847_v24  ;;  %v1907_v31 = vadd.f32 %v1906_v30, %v1850_v17  ;;  %v1914_v28 = vsel %vm1393_vm3, %v1853_v36, 0.0 }
 0x136   :  { %v1884_v53 = vrot.slane %v1883_v29, 4  ;;  %v1922_v34 = vsel %vm1393_vm3, %v1856_v12, 0.0  ;;  %v1930_v32 = vsel %vm1393_vm3, %v1857_v61, 0.0  ;;  %v1877_v6 = vadd.f32 %v1876_v21, %v1875_v42 }
 0x137   :  { %v1892_v45 = vrot.slane %v1891_v59, 4  ;;  %v1900_v50 = vrot.slane %v1899_v40, 4  ;;  %v1908_v39 = vrot.slane %v1907_v31, 4  ;;  %v1915_v19 = vadd.f32 %v1914_v28, %v1851_v26 }
 0x138   :  { %v1885_v46 = vadd.f32 %v1884_v53, %v1883_v29  ;;  %v1923_v37 = vadd.f32 %v1922_v34, %v1854_v8  ;;  %v1931_v4 = vadd.f32 %v1930_v32, %v1855_v60  ;;  %v1878_v52 = vrot.slane %v1877_v6, 2 }
 0x139   :  { %v1893_v7 = vadd.f32 %v1892_v45, %v1891_v59  ;;  %v1901_v9 = vadd.f32 %v1900_v50, %v1899_v40  ;;  %v1909_v24 = vadd.f32 %v1908_v39, %v1907_v31  ;;  %v1916_v30 = vrot.slane %v1915_v19, 4 }
 0x13a   :  { %v1886_v17 = vrot.slane %v1885_v46, 2  ;;  %v1924_v5 = vrot.slane %v1923_v37, 4  ;;  %v1932_v36 = vrot.slane %v1931_v4, 4  ;;  %v1879_v22 = vadd.f32 %v1878_v52, %v1877_v6 }
 0x13b   :  { %v1894_v12 = vrot.slane %v1893_v7, 2  ;;  %v1902_v11 = vrot.slane %v1901_v9, 2  ;;  %v1910_v61 = vrot.slane %v1909_v24, 2  ;;  %v1917_v42 = vadd.f32 %v1916_v30, %v1915_v19 }
 0x13c   :  { %v1887_v21 = vadd.f32 %v1886_v17, %v1885_v46  ;;  %v1925_v57 = vadd.f32 %v1924_v5, %v1923_v37  ;;  %v1933_v47 = vadd.f32 %v1932_v36, %v1931_v4  ;;  %v1880_v53 = vrot.slane %v1879_v22, 1 }
 0x13d   :  { %v1895_v26 = vadd.f32 %v1894_v12, %v1893_v7  ;;  %v1903_v8 = vadd.f32 %v1902_v11, %v1901_v9  ;;  %v1911_v60 = vadd.f32 %v1910_v61, %v1909_v24  ;;  %v1918_v34 = vrot.slane %v1917_v42, 2 }
 0x13e   :  { %v1888_v29 = vrot.slane %v1887_v21, 1  ;;  %v1926_v40 = vrot.slane %v1925_v57, 2  ;;  %v1934_v31 = vrot.slane %v1933_v47, 2  ;;  %v6517_v59 = vunpack.c.h.bf16 %v5010_v16 }
 0x13f   :  { %v1896_v32 = vrot.slane %v1895_v26, 1  ;;  %v1904_v6 = vrot.slane %v1903_v8, 1  ;;  %v1912_v45 = vrot.slane %v1911_v60, 1  ;;  %v6518_v19 = vunpack.c.h.bf16 %v5015_v33 }
 0x140   :  { %v1871_v28 = vmul.f32 %v6517_v59, %v5198_v38  ;;  %v1919_v4 = vadd.f32 %v1918_v34, %v1917_v42  ;;  %v1927_v39 = vadd.f32 %v1926_v40, %v1925_v57  ;;  %v1935_v7 = vadd.f32 %v1934_v31, %v1933_v47 }
 0x141   :  { %v1873_v50 = vmul.f32 %v6518_v19, %v5201_v51  ;;  %v5258_v11 = vadd.f32 %v1880_v53, %v1879_v22  ;;  %v5260_v46 = vadd.f32 %v1888_v29, %v1887_v21  ;;  %v5262_v37 = vadd.f32 %v1896_v32, %v1895_v26 }
 0x142   :  { %v1938_v16 = vsel %vm1393_vm3, %v5174_v56, 0.0  ;;  %v5266_v52 = vadd.f32 %v1904_v6, %v1903_v8  ;;  %v5268_v9 = vadd.f32 %v1912_v45, %v1911_v60  ;;  %v1920_v24 = vrot.slane %v1919_v4, 1 }
 0x143   :  { %6519 = vst [vmem:[#allocation9_spill] sm:$0xff] %v5258_v11  ;;  %6520 = vst [vmem:[#allocation19_spill] sm:$0xff] %v5260_v46  ;;  %v1939_v33 = vadd.f32 %v1938_v16, %v5158_v14  ;;  %v1946_v57 = vsel %vm1393_vm3, %v5179_v1, 0.0  ;;  %v1954_v47 = vsel %vm1393_vm3, %v5206_v10, 0.0  ;;  %v1962_v17 = vsel %vm1393_vm3, %v5211_v48, 0.0 }
 0x144   :  { %6521 = vst [vmem:[#allocation20_spill] sm:$0xff] %v5262_v37  ;;  %6522 = vst [vmem:[#allocation10_spill] sm:$0xff] %v5266_v52  ;;  %v1970_v30 = vsel %vm1393_vm3, %v5226_v20, 0.0  ;;  %v5279_v56 = vadd.f32 %v1920_v24, %v1919_v4  ;;  %v1928_v5 = vrot.slane %v1927_v39, 1  ;;  %v1936_v36 = vrot.slane %v1935_v7, 1  ;;  %v6542_v52 = vld [vmem:[#allocation28_spill] sm:$0xff] }
 0x145   :  { %6523 = vst [vmem:[#allocation21_spill] sm:$0xff] %v5268_v9  ;;  %v1940_v22 = vrot.slane %v1939_v33, 4  ;;  %v1947_v12 = vadd.f32 %v1946_v57, %v5163_v49  ;;  %v1955_v14 = vadd.f32 %v1954_v47, %v5190_v3  ;;  %v1963_v1 = vadd.f32 %v1962_v17, %v5195_v18 }
 0x146   :  { %6524 = vst [vmem:[#allocation11_spill] sm:$0xff] %v5279_v56  ;;  %v1971_v61 = vadd.f32 %v1970_v30, %v5216_v44  ;;  %v1978_v48 = vsel %vm1393_vm3, %v5231_v25, 0.0  ;;  %v1986_v20 = vsel %vm1393_vm3, %v5241_v15, 0.0  ;;  %v1994_v21 = vsel %vm1393_vm3, %v1873_v50, 0.0 }
 0x147   :  { %v1941_v10 = vadd.f32 %v1940_v22, %v1939_v33  ;;  %v1948_v42 = vrot.slane %v1947_v12, 4  ;;  %v1956_v53 = vrot.slane %v1955_v14, 4  ;;  %v1964_v26 = vrot.slane %v1963_v1, 4 }
 0x148   :  { %v1972_v8 = vrot.slane %v1971_v61, 4  ;;  %v1979_v3 = vadd.f32 %v1978_v48, %v5221_v2  ;;  %v1987_v18 = vadd.f32 %v1986_v20, %v5236_v63  ;;  %v1995_v60 = vadd.f32 %v1994_v21, %v1871_v28  ;;  %v2003_v21 = vld [vmem:[%s6026_s2 + $0x10] sm:$0x11] }
 0x149   :  { %v1942_v49 = vrot.slane %v1941_v10, 2  ;;  %v1949_v44 = vadd.f32 %v1948_v42, %v1947_v12  ;;  %v1957_v29 = vadd.f32 %v1956_v53, %v1955_v14  ;;  %v1965_v34 = vadd.f32 %v1964_v26, %v1963_v1 }
 0x14a   :  { %v1973_v40 = vadd.f32 %v1972_v8, %v1971_v61  ;;  %v1980_v31 = vrot.slane %v1979_v3, 4  ;;  %v1988_v59 = vrot.slane %v1987_v18, 4  ;;  %v1996_v15 = vrot.slane %v1995_v60, 4 }
 0x14b   :  { %v1943_v25 = vadd.f32 %v1942_v49, %v1941_v10  ;;  %v1950_v32 = vrot.slane %v1949_v44, 2  ;;  %v1958_v6 = vrot.slane %v1957_v29, 2  ;;  %v1966_v45 = vrot.slane %v1965_v34, 2 }
 0x14c   :  { %v1974_v19 = vrot.slane %v1973_v40, 2  ;;  %v1981_v4 = vadd.f32 %v1980_v31, %v1979_v3  ;;  %v1989_v16 = vadd.f32 %v1988_v59, %v1987_v18  ;;  %v1997_v24 = vadd.f32 %v1996_v15, %v1995_v60  ;;  %v2006_v18 = vld [vmem:[%s6026_s2 + $0x58] sm:$0xff]  ;;  %v2009_v15 = vld [vmem:[%s6026_s2 + $0x88] sm:$0x11] }
 0x14d   :  { %v1944_v50 = vrot.slane %v1943_v25, 1  ;;  %v1951_v2 = vadd.f32 %v1950_v32, %v1949_v44  ;;  %v1959_v33 = vadd.f32 %v1958_v6, %v1957_v29  ;;  %v1967_v63 = vadd.f32 %v1966_v45, %v1965_v34  ;;  %v2007_v44 = vld [vmem:[%s6026_s2 + $0x60] sm:$0x11]  ;;  %v2010_v32 = vld [vmem:[%s6026_s2 + $0xa8] sm:$0xff] }
 0x14e   :  { %v1975_v28 = vadd.f32 %v1974_v19, %v1973_v40  ;;  %v5292_v57 = vadd.f32 %v1928_v5, %v1927_v39  ;;  %v1982_v47 = vrot.slane %v1981_v4, 2  ;;  %v1990_v17 = vrot.slane %v1989_v16, 2  ;;  %v2004_v39 = vld [vmem:[%s6026_s2 + $0x30] sm:$0xff]  ;;  %v2008_v29 = vld [vmem:[%s6026_s2 + $0x80] sm:$0xff] }
 0x14f   :  { %v1998_v30 = vrot.slane %v1997_v24, 2  ;;  %v1952_v22 = vrot.slane %v1951_v2, 1  ;;  %v1960_v12 = vrot.slane %v1959_v33, 1  ;;  %v1968_v14 = vrot.slane %v1967_v63, 1 }
 0x150   :  { %6525 = vst [vmem:[#allocation22_spill] sm:$0xff] %v5292_v57  ;;  %v1976_v1 = vrot.slane %v1975_v28, 1  ;;  %v5294_v61 = vadd.f32 %v1936_v36, %v1935_v7  ;;  %v1983_v10 = vadd.f32 %v1982_v47, %v1981_v4  ;;  %v1991_v48 = vadd.f32 %v1990_v17, %v1989_v16  ;;  %v2005_v7 = vld [vmem:[%s6026_s2 + $0x38] sm:$0x11]  ;;  %v2012_v4 = vld [vmem:[%s6026_s2 + $0xd0] sm:$0xff] }
 0x151   :  { %v1999_v20 = vadd.f32 %v1998_v30, %v1997_v24  ;;  %v5302_v5 = vadd.f32 %v1944_v50, %v1943_v25  ;;  %v5304_v42 = vadd.f32 %v1952_v22, %v1951_v2  ;;  %v5306_v53 = vadd.f32 %v1960_v12, %v1959_v33  ;;  %v2011_v50 = vld [vmem:[%s6026_s2 + $0xb0] sm:$0x11]  ;;  %v2013_v33 = vld [vmem:[%s6026_s2 + $0xd8] sm:$0x11]  ;;  %v2015_v22 = vld [vmem:[%s6026_s2 + $0x100] sm:$0x11] }
 0x152   :  { %6526 = vst [vmem:[#allocation12_spill] sm:$0xff] %v5294_v61  ;;  %v2019_v36 = vunpack.c.h.bf16 %v5027_v35  ;;  %v5312_v26 = vadd.f32 %v1968_v14, %v1967_v63  ;;  %v1984_v8 = vrot.slane %v1983_v10, 1  ;;  %v1992_v49 = vrot.slane %v1991_v48, 1  ;;  %v2014_v63 = vld [vmem:[%s6026_s2 + $0xf8] sm:$0xff]  ;;  %v2016_v12 = vld [vmem:[%s6026_s2 + $0x120] sm:$0xff] }
 0x153   :  { %6527 = vst [vmem:[#allocation13_spill] sm:$0xff] %v5302_v5  ;;  %6528 = vst [vmem:[#allocation32_spill] sm:$0xff] %v5304_v42  ;;  %v2000_v3 = vrot.slane %v1999_v20, 1  ;;  %v5317_v60 = vadd.f32 %v1976_v1, %v1975_v28  ;;  %v2020_v34 = vunpack.c.l.bf16 %v2003_v21  ;;  %v2021_v40 = vunpack.c.h.bf16 %v2003_v21 }
 0x154   :  { %6529 = vst [vmem:[#allocation33_spill] sm:$0xff] %v5306_v53  ;;  %6530 = vst [vmem:[#allocation34_spill] sm:$0xff] %v5312_v26  ;;  %v2022_v25 = vunpack.c.l.bf16 %v2004_v39  ;;  %v5325_v31 = vadd.f32 %v1984_v8, %v1983_v10  ;;  %v5327_v59 = vadd.f32 %v1992_v49, %v1991_v48  ;;  %v2023_v6 = vunpack.c.h.bf16 %v2004_v39 }
 0x155   :  { %6531 = vst [vmem:[#allocation35_spill] sm:$0xff] %v5317_v60  ;;  %v2024_v45 = vunpack.c.l.bf16 %v2005_v7  ;;  %v5335_v19 = vadd.f32 %v2000_v3, %v1999_v20  ;;  %v2025_v16 = vunpack.c.h.bf16 %v2005_v7  ;;  %v2026_v24 = vunpack.c.l.bf16 %v2006_v18 }
 0x156   :  { %6532 = vst [vmem:[#allocation36_spill] sm:$0xff] %v5325_v31  ;;  %6533 = vst [vmem:[#allocation37_spill] sm:$0xff] %v5327_v59  ;;  %v2027_v2 = vunpack.c.h.bf16 %v2006_v18  ;;  %v2028_v28 = vunpack.c.l.bf16 %v2007_v44  ;;  %v2029_v47 = vunpack.c.h.bf16 %v2007_v44  ;;  %v2030_v17 = vunpack.c.l.bf16 %v2008_v29  ;;  %v2017_v44 = vld [vmem:[%s6026_s2 + $0x128] sm:$0x11] }
 0x157   :  { %6534 = vst [vmem:[#allocation38_spill] sm:$0xff] %v5335_v19  ;;  %v2031_v30 = vunpack.c.h.bf16 %v2008_v29  ;;  %v2032_v14 = vunpack.c.l.bf16 %v2009_v15  ;;  %v2033_v1 = vunpack.c.h.bf16 %v2009_v15  ;;  %v2034_v10 = vunpack.c.l.bf16 %v2010_v32 }
 0x158   :  { %v2035_v48 = vunpack.c.h.bf16 %v2010_v32  ;;  %v2036_v20 = vunpack.c.l.bf16 %v2011_v50  ;;  %v2037_v21 = vunpack.c.h.bf16 %v2011_v50  ;;  %v2038_v39 = vunpack.c.l.bf16 %v2012_v4 }
 0x159   :  { %v2039_v7 = vunpack.c.h.bf16 %v2012_v4  ;;  %v2040_v8 = vunpack.c.l.bf16 %v2013_v33  ;;  %v2041_v49 = vunpack.c.h.bf16 %v2013_v33  ;;  %v2042_v3 = vunpack.c.l.bf16 %v2014_v63 }
 0x15a   :  { %v2043_v18 = vunpack.c.h.bf16 %v2014_v63  ;;  %v2044_v29 = vunpack.c.l.bf16 %v2015_v22  ;;  %v2045_v19 = vunpack.c.h.bf16 %v2015_v22  ;;  %v2046_v59 = vunpack.c.l.bf16 %v2016_v12 }
 0x15b   :  { %v2047_v31 = vunpack.c.h.bf16 %v2016_v12  ;;  %v6535_v15 = vunpack.c.l.bf16 %v5027_v35  ;;  %v2083_v32 = vrot.slane %v2020_v34, 1  ;;  %v2085_v26 = vrot.slane %v2019_v36, 1 }
 0x15c   :  { %v2086_v50 = vrot.slane %v2021_v40, 1  ;;  %v2088_v53 = vrot.slane %v2022_v25, 1  ;;  %v2089_v4 = vrot.slane %v2024_v45, 1  ;;  %v2091_v42 = vrot.slane %v2023_v6, 1 }
 0x15d   :  { %v2082_v60 = vrot.slane %v6535_v15, 1  ;;  %v2092_v33 = vrot.slane %v2025_v16, 1  ;;  %v2048_v5 = vunpack.c.l.bf16 %v2017_v44  ;;  %v2049_v63 = vunpack.c.h.bf16 %v2017_v44 }
 0x15e   :  { %v2094_v61 = vrot.slane %v2026_v24, 1  ;;  %v2095_v57 = vrot.slane %v2028_v28, 1  ;;  %v2087_v22 = vsel %vm518_vm0, %v2085_v26, %v2086_v50  ;;  %v2097_v9 = vrot.slane %v2027_v2, 1 }
 0x15f   :  { %v2084_v56 = vsel %vm518_vm0, %v2082_v60, %v2083_v32  ;;  %v2098_v12 = vrot.slane %v2029_v47, 1  ;;  %v2090_v35 = vsel %vm518_vm0, %v2088_v53, %v2089_v4  ;;  %v2100_v15 = vrot.slane %v2030_v17, 1 }
 0x160   :  { %v2101_v34 = vrot.slane %v2032_v14, 1  ;;  %v2103_v36 = vrot.slane %v2031_v30, 1  ;;  %v2093_v40 = vsel %vm518_vm0, %v2091_v42, %v2092_v33  ;;  %v2104_v25 = vrot.slane %v2033_v1, 1 }
 0x161   :  { %v2106_v6 = vrot.slane %v2034_v10, 1  ;;  %v2107_v45 = vrot.slane %v2036_v20, 1  ;;  %v2096_v16 = vsel %vm518_vm0, %v2094_v61, %v2095_v57  ;;  %v2109_v24 = vrot.slane %v2035_v48, 1 }
 0x162   :  { %v2110_v28 = vrot.slane %v2037_v21, 1  ;;  %v2112_v44 = vrot.slane %v2038_v39, 1  ;;  %v2099_v60 = vsel %vm518_vm0, %v2097_v9, %v2098_v12  ;;  %v2102_v26 = vsel %vm518_vm0, %v2100_v15, %v2101_v34 }
 0x163   :  { %v2113_v2 = vrot.slane %v2040_v8, 1  ;;  %v2115_v47 = vrot.slane %v2039_v7, 1  ;;  %v2105_v53 = vsel %vm518_vm0, %v2103_v36, %v2104_v25  ;;  %v2116_v17 = vrot.slane %v2041_v49, 1 }
 0x164   :  { %v2118_v30 = vrot.slane %v2042_v3, 1  ;;  %v2119_v14 = vrot.slane %v2044_v29, 1  ;;  %v2108_v42 = vsel %vm518_vm0, %v2106_v6, %v2107_v45  ;;  %v2121_v1 = vrot.slane %v2043_v18, 1 }
 0x165   :  { %v2122_v10 = vrot.slane %v2045_v19, 1  ;;  %v2124_v20 = vrot.slane %v2046_v59, 1  ;;  %v2111_v61 = vsel %vm518_vm0, %v2109_v24, %v2110_v28  ;;  %v2114_v48 = vsel %vm518_vm0, %v2112_v44, %v2113_v2 }
 0x166   :  { %v5371_v21 = vrot.slane %v2048_v5, 1  ;;  %v2127_v9 = vrot.slane %v2047_v31, 1  ;;  %v2117_v39 = vsel %vm518_vm0, %v2115_v47, %v2116_v17  ;;  %v2120_v7 = vsel %vm518_vm0, %v2118_v30, %v2119_v14  ;;  %v6538_v47 = vld [vmem:[#allocation24_spill] sm:$0xff] }
 0x167   :  { %v2123_v8 = vsel %vm518_vm0, %v2121_v1, %v2122_v10  ;;  %v5376_v49 = vrot.slane %v2049_v63, 1  ;;  %v2162_v59 = vmul.f32 %v2084_v56, %v4997_v13  ;;  %v2163_v19 = vmul.f32 %v2087_v22, %v5033_v55  ;;  %v6536_v22 = vld [vmem:[#allocation2_spill] sm:$0xff] }
 0x168   :  { %v2126_v3 = vsel %vm518_vm0, %v2124_v20, %v5371_v21  ;;  %v2164_v18 = vmul.f32 %v2083_v32, %v5005_v43  ;;  %v2165_v31 = vmul.f32 %v2086_v50, %v5036_v41  ;;  %v2166_v29 = vmul.f32 %v2090_v35, %v5044_v62  ;;  %v6537_v32 = vld [vmem:[#allocation23_spill] sm:$0xff]  ;;  %v6539_v1 = vld [vmem:[#allocation26_spill] sm:$0xff]  ;;  %v6540_v20 = vld [vmem:[#allocation25_spill] sm:$0xff] }
 0x169   :  { %v2129_v5 = vsel %vm518_vm0, %v2127_v9, %v5376_v49  ;;  %v2167_v15 = vmul.f32 %v2093_v40, %v5048_v54  ;;  %v2168_v63 = vmul.f32 %v2089_v4, %v5051_v27  ;;  %v2169_v36 = vmul.f32 %v2092_v33, %v5054_v0  ;;  %v6541_v9 = vld [vmem:[#allocation27_spill] sm:$0xff]  ;;  %v6543_v33 = vld [vmem:[#allocation30_spill] sm:$0xff] }
 0x16a   :  { %v2170_v6 = vmul.f32 %v2096_v16, %v5057_v23  ;;  %v2171_v56 = vmul.f32 %v2099_v60, %v5066_v58  ;;  %v2172_v24 = vmul.f32 %v2095_v57, %v6536_v22  ;;  %v2173_v44 = vmul.f32 %v2098_v12, %v6537_v32  ;;  %v6544_v16 = vld [vmem:[#allocation29_spill] sm:$0xff]  ;;  %v6545_v57 = vld [vmem:[#allocation31_spill] sm:$0xff] }
 0x16b   :  { %v2174_v30 = vmul.f32 %v2102_v26, %v6538_v47  ;;  %v2175_v50 = vmul.f32 %v2105_v53, %v6539_v1  ;;  %v2176_v35 = vmul.f32 %v2101_v34, %v6540_v20  ;;  %v2177_v40 = vmul.f32 %v2104_v25, %v6541_v9  ;;  %v6546_v12 = vld [vmem:[#allocation3_spill] sm:$0xff]  ;;  %v6547_v53 = vld [vmem:[#allocation5_spill] sm:$0xff]  ;;  %v6548_v34 = vld [vmem:[#allocation4_spill] sm:$0xff] }
 0x16c   :  { %v5399_v4 = vmul.f32 %v2108_v42, %v6542_v52  ;;  %v5402_v37 = vmul.f32 %v2111_v61, %v6543_v33  ;;  %v5405_v60 = vmul.f32 %v2107_v45, %v6544_v16  ;;  %v5408_v46 = vmul.f32 %v2110_v28, %v6545_v57  ;;  %v6549_v42 = vld [vmem:[#allocation6_spill] sm:$0xff]  ;;  %v6551_v45 = vld [vmem:[#allocation15_spill] sm:$0xff] }
 0x16d   :  { %v5411_v26 = vmul.f32 %v2114_v48, %v6546_v12  ;;  %v5414_v11 = vmul.f32 %v2117_v39, %v6547_v53  ;;  %v5417_v25 = vmul.f32 %v2113_v2, %v6548_v34  ;;  %v5420_v52 = vmul.f32 %v2116_v17, %v6549_v42  ;;  %v6550_v61 = vld [vmem:[#allocation14_spill] sm:$0xff]  ;;  %v6552_v28 = vld [vmem:[#allocation7_spill] sm:$0xff]  ;;  %v6553_v48 = vld [vmem:[#allocation17_spill] sm:$0xff] }
 0x16e   :  { %v5423_v33 = vmul.f32 %v2120_v7, %v6550_v61  ;;  %v5426_v16 = vmul.f32 %v2123_v8, %v6551_v45  ;;  %v5429_v57 = vmul.f32 %v2119_v14, %v6552_v28  ;;  %v5432_v12 = vmul.f32 %v2122_v10, %v6553_v48  ;;  %v6554_v39 = vld [vmem:[#allocation8_spill] sm:$0xff] }
 0x16f   :  { %v5435_v53 = vmul.f32 %v2126_v3, %v6554_v39  ;;  %v5438_v2 = vmul.f32 %v2129_v5, %v5198_v38  ;;  %v2194_v17 = vsel %vm1393_vm3, %v2164_v18, 0.0  ;;  %v2202_v7 = vsel %vm1393_vm3, %v2165_v31, 0.0 }
 0x170   :  { %v2210_v61 = vsel %vm1393_vm3, %v2168_v63, 0.0  ;;  %v2218_v8 = vsel %vm1393_vm3, %v2169_v36, 0.0  ;;  %v2195_v45 = vadd.f32 %v2194_v17, %v2162_v59  ;;  %v2203_v14 = vadd.f32 %v2202_v7, %v2163_v19 }
 0x171   :  { %v2211_v28 = vadd.f32 %v2210_v61, %v2166_v29  ;;  %v2219_v42 = vadd.f32 %v2218_v8, %v2167_v15  ;;  %v2226_v10 = vsel %vm1393_vm3, %v2172_v24, 0.0  ;;  %v2234_v3 = vsel %vm1393_vm3, %v2173_v44, 0.0 }
 0x172   :  { %v2242_v39 = vsel %vm1393_vm3, %v2176_v35, 0.0  ;;  %v2250_v5 = vsel %vm1393_vm3, %v2177_v40, 0.0  ;;  %v2196_v38 = vrot.slane %v2195_v45, 4  ;;  %v2204_v18 = vrot.slane %v2203_v14, 4 }
 0x173   :  { %v2212_v48 = vrot.slane %v2211_v28, 4  ;;  %v2220_v31 = vrot.slane %v2219_v42, 4  ;;  %v2227_v34 = vadd.f32 %v2226_v10, %v2170_v6  ;;  %v2235_v63 = vadd.f32 %v2234_v3, %v2171_v56 }
 0x174   :  { %v2243_v9 = vadd.f32 %v2242_v39, %v2174_v30  ;;  %v2251_v36 = vadd.f32 %v2250_v5, %v2175_v50  ;;  %v2197_v59 = vadd.f32 %v2196_v38, %v2195_v45  ;;  %v2205_v19 = vadd.f32 %v2204_v18, %v2203_v14 }
 0x175   :  { %v2213_v29 = vadd.f32 %v2212_v48, %v2211_v28  ;;  %v2221_v15 = vadd.f32 %v2220_v31, %v2219_v42  ;;  %v2228_v61 = vrot.slane %v2227_v34, 4  ;;  %v2236_v24 = vrot.slane %v2235_v63, 4 }
 0x176   :  { %v2244_v17 = vrot.slane %v2243_v9, 4  ;;  %v2252_v44 = vrot.slane %v2251_v36, 4  ;;  %v2198_v7 = vrot.slane %v2197_v59, 2  ;;  %v2206_v35 = vrot.slane %v2205_v19, 2 }
 0x177   :  { %v2214_v8 = vrot.slane %v2213_v29, 2  ;;  %v2222_v40 = vrot.slane %v2221_v15, 2  ;;  %v2229_v20 = vadd.f32 %v2228_v61, %v2227_v34  ;;  %v2237_v1 = vadd.f32 %v2236_v24, %v2235_v63 }
 0x178   :  { %v2245_v47 = vadd.f32 %v2244_v17, %v2243_v9  ;;  %v2253_v32 = vadd.f32 %v2252_v44, %v2251_v36  ;;  %v2199_v6 = vadd.f32 %v2198_v7, %v2197_v59  ;;  %v2207_v56 = vadd.f32 %v2206_v35, %v2205_v19  ;;  %v6555_v9 = vld [vmem:[#allocation16_spill] sm:$0xff] }
 0x179   :  { %v2215_v30 = vadd.f32 %v2214_v8, %v2213_v29  ;;  %v2223_v50 = vadd.f32 %v2222_v40, %v2221_v15  ;;  %v2230_v38 = vrot.slane %v2229_v20, 2  ;;  %v2238_v45 = vrot.slane %v2237_v1, 2 }
 0x17a   :  { %v2246_v28 = vrot.slane %v2245_v47, 2  ;;  %v2254_v42 = vrot.slane %v2253_v32, 2  ;;  %v2200_v48 = vrot.slane %v2199_v6, 1  ;;  %v2208_v39 = vrot.slane %v2207_v56, 1 }
 0x17b   :  { %v2216_v14 = vrot.slane %v2215_v30, 1  ;;  %v2224_v10 = vrot.slane %v2223_v50, 1  ;;  %v2231_v3 = vadd.f32 %v2230_v38, %v2229_v20  ;;  %v2239_v5 = vadd.f32 %v2238_v45, %v2237_v1 }
 0x17c   :  { %v5448_v18 = vadd.f32 %v2246_v28, %v2245_v47  ;;  %v5450_v34 = vadd.f32 %v2254_v42, %v2253_v32  ;;  %v2192_v31 = vmul.f32 %v5371_v21, %v6555_v9  ;;  %v2193_v63 = vmul.f32 %v5376_v49, %v5201_v51 }
 0x17d   :  { %v5456_v36 = vadd.f32 %v2200_v48, %v2199_v6  ;;  %v5458_v59 = vadd.f32 %v2208_v39, %v2207_v56  ;;  %v5460_v19 = vadd.f32 %v2216_v14, %v2215_v30  ;;  %v5462_v29 = vadd.f32 %v2224_v10, %v2223_v50 }
 0x17e   :  { %v2232_v20 = vrot.slane %v2231_v3, 1  ;;  %v2240_v1 = vrot.slane %v2239_v5, 1  ;;  %v2258_v32 = vsel %vm1393_vm3, %v5405_v60, 0.0  ;;  %v2266_v47 = vsel %vm1393_vm3, %v5408_v46, 0.0 }
 0x17f   :  { %6556 = vst [vmem:[#allocation16_spill] sm:$0xff] %v5456_v36  ;;  %6557 = vst [vmem:[#allocation39_spill] sm:$0xff] %v5458_v59  ;;  %v2274_v21 = vsel %vm1393_vm3, %v5417_v25, 0.0  ;;  %v2282_v49 = vsel %vm1393_vm3, %v5420_v52, 0.0  ;;  %v2248_v24 = vrot.slane %v5448_v18, 1  ;;  %v2256_v17 = vrot.slane %v5450_v34, 1 }
 0x180   :  { %6558 = vst [vmem:[#allocation40_spill] sm:$0xff] %v5460_v19  ;;  %6559 = vst [vmem:[#allocation41_spill] sm:$0xff] %v5462_v29  ;;  %v5472_v15 = vadd.f32 %v2232_v20, %v2231_v3  ;;  %v5474_v61 = vadd.f32 %v2240_v1, %v2239_v5  ;;  %v2259_v44 = vadd.f32 %v2258_v32, %v5399_v4  ;;  %v2290_v25 = vsel %vm1393_vm3, %v5429_v57, 0.0 }
 0x181   :  { %v2267_v60 = vadd.f32 %v2266_v47, %v5402_v37  ;;  %v2275_v46 = vadd.f32 %v2274_v21, %v5411_v26  ;;  %v2283_v7 = vadd.f32 %v2282_v49, %v5414_v11  ;;  %v2298_v52 = vsel %vm1393_vm3, %v5432_v12, 0.0 }
 0x182   :  { %6560 = vst [vmem:[#allocation42_spill] sm:$0xff] %v5472_v15  ;;  %6561 = vst [vmem:[#allocation43_spill] sm:$0xff] %v5474_v61  ;;  %v2306_v35 = vsel %vm1393_vm3, %v2192_v31, 0.0  ;;  %v2314_v8 = vsel %vm1393_vm3, %v2193_v63, 0.0  ;;  %v2260_v40 = vrot.slane %v2259_v44, 4  ;;  %v2291_v37 = vadd.f32 %v2290_v25, %v5423_v33 }
 0x183   :  { %v2268_v6 = vrot.slane %v2267_v60, 4  ;;  %v2276_v56 = vrot.slane %v2275_v46, 4  ;;  %v2284_v4 = vrot.slane %v2283_v7, 4  ;;  %v2299_v26 = vadd.f32 %v2298_v52, %v5426_v16 }
 0x184   :  { %v2307_v11 = vadd.f32 %v2306_v35, %v5435_v53  ;;  %v2315_v30 = vadd.f32 %v2314_v8, %v5438_v2  ;;  %v2261_v57 = vadd.f32 %v2260_v40, %v2259_v44  ;;  %v2292_v45 = vrot.slane %v2291_v37, 4  ;;  %v2322_v8 = vld [vmem:[%s6026_s2 + $0x10] sm:$0xee] }
 0x185   :  { %v2269_v50 = vadd.f32 %v2268_v6, %v2267_v60  ;;  %v2277_v38 = vadd.f32 %v2276_v56, %v2275_v46  ;;  %v2285_v12 = vadd.f32 %v2284_v4, %v2283_v7  ;;  %v2300_v28 = vrot.slane %v2299_v26, 4 }
 0x186   :  { %v2308_v42 = vrot.slane %v2307_v11, 4  ;;  %v2316_v48 = vrot.slane %v2315_v30, 4  ;;  %v2262_v39 = vrot.slane %v2261_v57, 2  ;;  %v2293_v5 = vadd.f32 %v2292_v45, %v2291_v37  ;;  %v2323_v37 = vld [vmem:[%s6026_s2 + $0x18] sm:$0x33] }
 0x187   :  { %v2270_v14 = vrot.slane %v2269_v50, 2  ;;  %v2278_v10 = vrot.slane %v2277_v38, 2  ;;  %v2286_v3 = vrot.slane %v2285_v12, 2  ;;  %v2301_v33 = vadd.f32 %v2300_v28, %v2299_v26 }
 0x188   :  { %v2309_v31 = vadd.f32 %v2308_v42, %v2307_v11  ;;  %v2317_v16 = vadd.f32 %v2316_v48, %v2315_v30  ;;  %v2263_v63 = vadd.f32 %v2262_v39, %v2261_v57  ;;  %v2294_v1 = vrot.slane %v2293_v5, 2  ;;  %v2327_v42 = vld [vmem:[%s6026_s2 + $0x68] sm:$0x33] }
 0x189   :  { %v2271_v53 = vadd.f32 %v2270_v14, %v2269_v50  ;;  %v2279_v20 = vadd.f32 %v2278_v10, %v2277_v38  ;;  %v2287_v2 = vadd.f32 %v2286_v3, %v2285_v12  ;;  %v2302_v32 = vrot.slane %v2301_v33, 2  ;;  %v2326_v50 = vld [vmem:[%s6026_s2 + $0x60] sm:$0xee]  ;;  %v2328_v48 = vld [vmem:[%s6026_s2 + $0x88] sm:$0xee] }
 0x18a   :  { %v2310_v47 = vrot.slane %v2309_v31, 2  ;;  %v2318_v21 = vrot.slane %v2317_v16, 2  ;;  %v2264_v49 = vrot.slane %v2263_v63, 1  ;;  %v2295_v7 = vadd.f32 %v2294_v1, %v2293_v5  ;;  %v2329_v5 = vld [vmem:[%s6026_s2 + $0x90] sm:$0x33] }
 0x18b   :  { %v2272_v44 = vrot.slane %v2271_v53, 1  ;;  %v2280_v60 = vrot.slane %v2279_v20, 1  ;;  %v2288_v46 = vrot.slane %v2287_v2, 1  ;;  %v2303_v25 = vadd.f32 %v2302_v32, %v2301_v33  ;;  %v2330_v33 = vld [vmem:[%s6026_s2 + $0xb0] sm:$0xee] }
 0x18c   :  { %v2311_v52 = vadd.f32 %v2310_v47, %v2309_v31  ;;  %v2319_v35 = vadd.f32 %v2318_v21, %v2317_v16  ;;  %v5496_v40 = vadd.f32 %v2248_v24, %v5448_v18  ;;  %v5499_v6 = vadd.f32 %v2256_v17, %v5450_v34  ;;  %v2324_v18 = vld [vmem:[%s6026_s2 + $0x38] sm:$0xee]  ;;  %v2325_v17 = vld [vmem:[%s6026_s2 + $0x40] sm:$0x33] }
 0x18d   :  { %v5501_v56 = vadd.f32 %v2264_v49, %v2263_v63  ;;  %v5503_v4 = vadd.f32 %v2272_v44, %v2271_v53  ;;  %v2296_v26 = vrot.slane %v2295_v7, 1  ;;  %v2304_v11 = vrot.slane %v2303_v25, 1  ;;  %v2331_v63 = vld [vmem:[%s6026_s2 + $0xb8] sm:$0x33]  ;;  %v2333_v47 = vld [vmem:[%s6026_s2 + $0xe0] sm:$0x33] }
 0x18e   :  { %6562 = vst [vmem:[#allocation44_spill] sm:$0xff] %v5496_v40  ;;  %6563 = vst [vmem:[#allocation45_spill] sm:$0xff] %v5499_v6  ;;  %v2312_v30 = vrot.slane %v2311_v52, 1  ;;  %v2320_v57 = vrot.slane %v2319_v35, 1  ;;  %v5511_v24 = vadd.f32 %v2280_v60, %v2279_v20  ;;  %v5513_v34 = vadd.f32 %v2288_v46, %v2287_v2  ;;  %v2332_v53 = vld [vmem:[%s6026_s2 + $0xd8] sm:$0xee] }
 0x18f   :  { %6564 = vst [vmem:[#allocation46_spill] sm:$0xff] %v5501_v56  ;;  %6565 = vst [vmem:[#allocation47_spill] sm:$0xff] %v5503_v4  ;;  %v2338_v38 = vunpack.c.l.bf16 %v2322_v8  ;;  %v2339_v12 = vunpack.c.h.bf16 %v2322_v8  ;;  %v5521_v45 = vadd.f32 %v2296_v26, %v2295_v7  ;;  %v5523_v28 = vadd.f32 %v2304_v11, %v2303_v25  ;;  %v2334_v21 = vld [vmem:[%s6026_s2 + $0x100] sm:$0xee]  ;;  %v2335_v7 = vld [vmem:[%s6026_s2 + $0x108] sm:$0x33] }
 0x190   :  { %6566 = vst [vmem:[#allocation48_spill] sm:$0xff] %v5511_v24  ;;  %6567 = vst [vmem:[#allocation49_spill] sm:$0xff] %v5513_v34  ;;  %v2340_v39 = vunpack.c.l.bf16 %v2323_v37  ;;  %v2341_v14 = vunpack.c.h.bf16 %v2323_v37  ;;  %v5531_v10 = vadd.f32 %v2312_v30, %v2311_v52  ;;  %v5533_v3 = vadd.f32 %v2320_v57, %v2319_v35  ;;  %v2336_v25 = vld [vmem:[%s6026_s2 + $0x128] sm:$0xee] }
 0x191   :  { %6568 = vst [vmem:[#allocation50_spill] sm:$0xff] %v5521_v45  ;;  %6569 = vst [vmem:[#allocation51_spill] sm:$0xff] %v5523_v28  ;;  %v2342_v31 = vunpack.c.l.bf16 %v2324_v18  ;;  %v2343_v16 = vunpack.c.h.bf16 %v2324_v18  ;;  %v2344_v20 = vunpack.c.l.bf16 %v2325_v17  ;;  %v2345_v2 = vunpack.c.h.bf16 %v2325_v17 }
 0x192   :  { %6570 = vst [vmem:[#allocation52_spill] sm:$0xff] %v5531_v10  ;;  %6571 = vst [vmem:[#allocation53_spill] sm:$0xff] %v5533_v3  ;;  %v2346_v1 = vunpack.c.l.bf16 %v2326_v50  ;;  %v2347_v32 = vunpack.c.h.bf16 %v2326_v50  ;;  %v2348_v49 = vunpack.c.l.bf16 %v2327_v42  ;;  %v2349_v44 = vunpack.c.h.bf16 %v2327_v42 }
 0x193   :  { %v2350_v60 = vunpack.c.l.bf16 %v2328_v48  ;;  %v2351_v46 = vunpack.c.h.bf16 %v2328_v48  ;;  %v2352_v52 = vunpack.c.l.bf16 %v2329_v5  ;;  %v2353_v35 = vunpack.c.h.bf16 %v2329_v5  ;;  %v2337_v48 = vld [vmem:[%s6026_s2 + $0x130] sm:$0x33] }
 0x194   :  { %v2354_v8 = vunpack.c.l.bf16 %v2330_v33  ;;  %v2355_v37 = vunpack.c.h.bf16 %v2330_v33  ;;  %v2356_v26 = vunpack.c.l.bf16 %v2331_v63  ;;  %v2357_v11 = vunpack.c.h.bf16 %v2331_v63 }
 0x195   :  { %v2358_v30 = vunpack.c.l.bf16 %v2332_v53  ;;  %v2359_v57 = vunpack.c.h.bf16 %v2332_v53  ;;  %v2360_v18 = vunpack.c.l.bf16 %v2333_v47  ;;  %v2361_v17 = vunpack.c.h.bf16 %v2333_v47 }
 0x196   :  { %v2362_v50 = vunpack.c.l.bf16 %v2334_v21  ;;  %v2363_v42 = vunpack.c.h.bf16 %v2334_v21  ;;  %v2364_v3 = vunpack.c.l.bf16 %v2335_v7  ;;  %v2365_v10 = vunpack.c.h.bf16 %v2335_v7 }
 0x197   :  { %v2366_v28 = vunpack.c.l.bf16 %v2336_v25  ;;  %v2367_v45 = vunpack.c.h.bf16 %v2336_v25  ;;  %v2402_v34 = vrot.slane %v2338_v38, 2  ;;  %v2403_v5 = vrot.slane %v2340_v39, 2 }
 0x198   :  { %v2405_v24 = vrot.slane %v2339_v12, 2  ;;  %v2406_v33 = vrot.slane %v2341_v14, 2  ;;  %v2408_v4 = vrot.slane %v2342_v31, 2  ;;  %v2409_v63 = vrot.slane %v2344_v20, 2 }
 0x199   :  { %v2411_v56 = vrot.slane %v2343_v16, 2  ;;  %v2412_v53 = vrot.slane %v2345_v2, 2  ;;  %v2368_v6 = vunpack.c.l.bf16 %v2337_v48  ;;  %v2369_v47 = vunpack.c.h.bf16 %v2337_v48 }
 0x19a   :  { %v2414_v40 = vrot.slane %v2346_v1, 2  ;;  %v2415_v21 = vrot.slane %v2348_v49, 2  ;;  %v2404_v61 = vsel %vm911_vm1, %v2402_v34, %v2403_v5  ;;  %v2407_v15 = vsel %vm911_vm1, %v2405_v24, %v2406_v33 }
 0x19b   :  { %v2417_v29 = vrot.slane %v2347_v32, 2  ;;  %v2418_v7 = vrot.slane %v2349_v44, 2  ;;  %v2410_v25 = vsel %vm911_vm1, %v2408_v4, %v2409_v63  ;;  %v2420_v38 = vrot.slane %v2350_v60, 2 }
 0x19c   :  { %v2421_v39 = vrot.slane %v2352_v52, 2  ;;  %v2423_v12 = vrot.slane %v2351_v46, 2  ;;  %v2413_v14 = vsel %vm911_vm1, %v2411_v56, %v2412_v53  ;;  %v2424_v31 = vrot.slane %v2353_v35, 2 }
 0x19d   :  { %v2426_v16 = vrot.slane %v2354_v8, 2  ;;  %v2427_v20 = vrot.slane %v2356_v26, 2  ;;  %v2416_v2 = vsel %vm911_vm1, %v2414_v40, %v2415_v21  ;;  %v2429_v1 = vrot.slane %v2355_v37, 2 }
 0x19e   :  { %v2430_v49 = vrot.slane %v2357_v11, 2  ;;  %v2432_v48 = vrot.slane %v2358_v30, 2  ;;  %v2419_v34 = vsel %vm911_vm1, %v2417_v29, %v2418_v7  ;;  %v2422_v24 = vsel %vm911_vm1, %v2420_v38, %v2421_v39 }
 0x19f   :  { %v2433_v32 = vrot.slane %v2360_v18, 2  ;;  %v2435_v44 = vrot.slane %v2359_v57, 2  ;;  %v2425_v4 = vsel %vm911_vm1, %v2423_v12, %v2424_v31  ;;  %v2436_v60 = vrot.slane %v2361_v17, 2 }
 0x1a0   :  { %v2438_v46 = vrot.slane %v2362_v50, 2  ;;  %v2439_v52 = vrot.slane %v2364_v3, 2  ;;  %v2428_v56 = vsel %vm911_vm1, %v2426_v16, %v2427_v20  ;;  %v2441_v35 = vrot.slane %v2363_v42, 2 }
 0x1a1   :  { %v2442_v8 = vrot.slane %v2365_v10, 2  ;;  %v2444_v26 = vrot.slane %v2366_v28, 2  ;;  %v2431_v40 = vsel %vm911_vm1, %v2429_v1, %v2430_v49  ;;  %v2434_v37 = vsel %vm911_vm1, %v2432_v48, %v2433_v32  ;;  %v6573_v48 = vld [vmem:[#allocation24_spill] sm:$0xff] }
 0x1a2   :  { %v5573_v11 = vrot.slane %v2368_v6, 2  ;;  %v2447_v29 = vrot.slane %v2367_v45, 2  ;;  %v2437_v30 = vsel %vm911_vm1, %v2435_v44, %v2436_v60  ;;  %v2440_v57 = vsel %vm911_vm1, %v2438_v46, %v2439_v52  ;;  %v6574_v46 = vld [vmem:[#allocation26_spill] sm:$0xff] }
 0x1a3   :  { %v2443_v18 = vsel %vm911_vm1, %v2441_v35, %v2442_v8  ;;  %v5578_v17 = vrot.slane %v2369_v47, 2  ;;  %v2482_v28 = vmul.f32 %v2404_v61, %v4997_v13  ;;  %v2483_v10 = vmul.f32 %v2407_v15, %v5033_v55  ;;  %v6575_v35 = vld [vmem:[#allocation25_spill] sm:$0xff] }
 0x1a4   :  { %v2446_v3 = vsel %vm911_vm1, %v2444_v26, %v5573_v11  ;;  %v2484_v50 = vmul.f32 %v2403_v5, %v5005_v43  ;;  %v2485_v45 = vmul.f32 %v2406_v33, %v5036_v41  ;;  %v2486_v42 = vmul.f32 %v2410_v25, %v5044_v62  ;;  %v6572_v5 = vld [vmem:[#allocation23_spill] sm:$0xff] }
 0x1a5   :  { %v2449_v6 = vsel %vm911_vm1, %v2447_v29, %v5578_v17  ;;  %v2487_v38 = vmul.f32 %v2413_v14, %v5048_v54  ;;  %v2488_v47 = vmul.f32 %v2409_v63, %v5051_v27  ;;  %v2489_v12 = vmul.f32 %v2412_v53, %v5054_v0  ;;  %v6576_v26 = vld [vmem:[#allocation27_spill] sm:$0xff]  ;;  %v6577_v29 = vld [vmem:[#allocation28_spill] sm:$0xff]  ;;  %v6578_v53 = vld [vmem:[#allocation30_spill] sm:$0xff] }
 0x1a6   :  { %v2490_v16 = vmul.f32 %v2416_v2, %v5057_v23  ;;  %v2491_v61 = vmul.f32 %v2419_v34, %v5066_v58  ;;  %v2492_v15 = vmul.f32 %v2415_v21, %v6536_v22  ;;  %v2493_v1 = vmul.f32 %v2418_v7, %v6572_v5  ;;  %v6579_v2 = vld [vmem:[#allocation29_spill] sm:$0xff]  ;;  %v6580_v21 = vld [vmem:[#allocation31_spill] sm:$0xff] }
 0x1a7   :  { %v2494_v44 = vmul.f32 %v2422_v24, %v6573_v48  ;;  %v2495_v33 = vmul.f32 %v2425_v4, %v6574_v46  ;;  %v2496_v25 = vmul.f32 %v2421_v39, %v6575_v35  ;;  %v2497_v14 = vmul.f32 %v2424_v31, %v6576_v26  ;;  %v6581_v7 = vld [vmem:[#allocation3_spill] sm:$0xff]  ;;  %v6582_v4 = vld [vmem:[#allocation5_spill] sm:$0xff]  ;;  %v6583_v39 = vld [vmem:[#allocation4_spill] sm:$0xff] }
 0x1a8   :  { %v5601_v63 = vmul.f32 %v2428_v56, %v6577_v29  ;;  %v5604_v19 = vmul.f32 %v2431_v40, %v6578_v53  ;;  %v5607_v34 = vmul.f32 %v2427_v20, %v6579_v2  ;;  %v5610_v59 = vmul.f32 %v2430_v49, %v6580_v21  ;;  %v6584_v56 = vld [vmem:[#allocation6_spill] sm:$0xff]  ;;  %v6586_v20 = vld [vmem:[#allocation15_spill] sm:$0xff] }
 0x1a9   :  { %v5613_v24 = vmul.f32 %v2434_v37, %v6581_v7  ;;  %v5616_v36 = vmul.f32 %v2437_v30, %v6582_v4  ;;  %v5619_v31 = vmul.f32 %v2433_v32, %v6583_v39  ;;  %v5622_v29 = vmul.f32 %v2436_v60, %v6584_v56  ;;  %v6585_v40 = vld [vmem:[#allocation14_spill] sm:$0xff]  ;;  %v6587_v49 = vld [vmem:[#allocation7_spill] sm:$0xff]  ;;  %v6588_v37 = vld [vmem:[#allocation17_spill] sm:$0xff] }
 0x1aa   :  { %v5625_v53 = vmul.f32 %v2440_v57, %v6585_v40  ;;  %v5628_v2 = vmul.f32 %v2443_v18, %v6586_v20  ;;  %v5631_v21 = vmul.f32 %v2439_v52, %v6587_v49  ;;  %v5634_v7 = vmul.f32 %v2442_v8, %v6588_v37  ;;  %v6589_v30 = vld [vmem:[#allocation8_spill] sm:$0xff]  ;;  %v6590_v32 = vld [vmem:[#allocation18_spill] sm:$0xff] }
 0x1ab   :  { %v5637_v4 = vmul.f32 %v2446_v3, %v6589_v30  ;;  %v5640_v39 = vmul.f32 %v2449_v6, %v6590_v32  ;;  %v2514_v60 = vsel %vm1393_vm3, %v2484_v50, 0.0  ;;  %v2522_v57 = vsel %vm1393_vm3, %v2485_v45, 0.0 }
 0x1ac   :  { %v2530_v40 = vsel %vm1393_vm3, %v2488_v47, 0.0  ;;  %v2538_v18 = vsel %vm1393_vm3, %v2489_v12, 0.0  ;;  %v2515_v20 = vadd.f32 %v2514_v60, %v2482_v28  ;;  %v2523_v52 = vadd.f32 %v2522_v57, %v2483_v10 }
 0x1ad   :  { %v2531_v49 = vadd.f32 %v2530_v40, %v2486_v42  ;;  %v2539_v56 = vadd.f32 %v2538_v18, %v2487_v38  ;;  %v2546_v8 = vsel %vm1393_vm3, %v2492_v15, 0.0  ;;  %v2554_v3 = vsel %vm1393_vm3, %v2493_v1, 0.0 }
 0x1ae   :  { %v2562_v30 = vsel %vm1393_vm3, %v2496_v25, 0.0  ;;  %v2570_v6 = vsel %vm1393_vm3, %v2497_v14, 0.0  ;;  %v2516_v32 = vrot.slane %v2515_v20, 4  ;;  %v2524_v50 = vrot.slane %v2523_v52, 4 }
 0x1af   :  { %v2532_v37 = vrot.slane %v2531_v49, 4  ;;  %v2540_v45 = vrot.slane %v2539_v56, 4  ;;  %v2547_v26 = vadd.f32 %v2546_v8, %v2490_v16  ;;  %v2555_v47 = vadd.f32 %v2554_v3, %v2491_v61 }
 0x1b0   :  { %v2563_v35 = vadd.f32 %v2562_v30, %v2494_v44  ;;  %v2571_v12 = vadd.f32 %v2570_v6, %v2495_v33  ;;  %v2517_v28 = vadd.f32 %v2516_v32, %v2515_v20  ;;  %v2525_v10 = vadd.f32 %v2524_v50, %v2523_v52 }
 0x1b1   :  { %v2533_v42 = vadd.f32 %v2532_v37, %v2531_v49  ;;  %v2541_v38 = vadd.f32 %v2540_v45, %v2539_v56  ;;  %v2548_v40 = vrot.slane %v2547_v26, 4  ;;  %v2556_v15 = vrot.slane %v2555_v47, 4 }
 0x1b2   :  { %v2564_v60 = vrot.slane %v2563_v35, 4  ;;  %v2572_v1 = vrot.slane %v2571_v12, 4  ;;  %v2518_v57 = vrot.slane %v2517_v28, 2  ;;  %v2526_v25 = vrot.slane %v2525_v10, 2 }
 0x1b3   :  { %v2534_v18 = vrot.slane %v2533_v42, 2  ;;  %v2542_v14 = vrot.slane %v2541_v38, 2  ;;  %v2549_v46 = vadd.f32 %v2548_v40, %v2547_v26  ;;  %v2557_v48 = vadd.f32 %v2556_v15, %v2555_v47 }
 0x1b4   :  { %v2565_v5 = vadd.f32 %v2564_v60, %v2563_v35  ;;  %v2573_v22 = vadd.f32 %v2572_v1, %v2571_v12  ;;  %v2519_v16 = vadd.f32 %v2518_v57, %v2517_v28  ;;  %v2527_v61 = vadd.f32 %v2526_v25, %v2525_v10 }
 0x1b5   :  { %v2535_v44 = vadd.f32 %v2534_v18, %v2533_v42  ;;  %v2543_v33 = vadd.f32 %v2542_v14, %v2541_v38  ;;  %v2550_v20 = vrot.slane %v2549_v46, 2  ;;  %v2558_v30 = vrot.slane %v2557_v48, 2 }
 0x1b6   :  { %v2566_v49 = vrot.slane %v2565_v5, 2  ;;  %v2574_v56 = vrot.slane %v2573_v22, 2  ;;  %v2520_v37 = vrot.slane %v2519_v16, 1  ;;  %v2528_v32 = vrot.slane %v2527_v61, 1 }
 0x1b7   :  { %v2536_v52 = vrot.slane %v2535_v44, 1  ;;  %v2544_v8 = vrot.slane %v2543_v33, 1  ;;  %v2551_v3 = vadd.f32 %v2550_v20, %v2549_v46  ;;  %v2559_v6 = vadd.f32 %v2558_v30, %v2557_v48 }
 0x1b8   :  { %v5650_v50 = vadd.f32 %v2566_v49, %v2565_v5  ;;  %v5652_v26 = vadd.f32 %v2574_v56, %v2573_v22  ;;  %v2512_v35 = vmul.f32 %v5573_v11, %v6555_v9  ;;  %v2513_v45 = vmul.f32 %v5578_v17, %v5201_v51 }
 0x1b9   :  { %v5658_v47 = vadd.f32 %v2520_v37, %v2519_v16  ;;  %v5660_v12 = vadd.f32 %v2528_v32, %v2527_v61  ;;  %v5662_v28 = vadd.f32 %v2536_v52, %v2535_v44  ;;  %v5664_v10 = vadd.f32 %v2544_v8, %v2543_v33 }
 0x1ba   :  { %v2552_v46 = vrot.slane %v2551_v3, 1  ;;  %v2560_v48 = vrot.slane %v2559_v6, 1  ;;  %v2578_v22 = vsel %vm1393_vm3, %v5607_v34, 0.0  ;;  %v2586_v5 = vsel %vm1393_vm3, %v5610_v59, 0.0 }
 0x1bb   :  { %v2594_v11 = vsel %vm1393_vm3, %v5619_v31, 0.0  ;;  %v2602_v17 = vsel %vm1393_vm3, %v5622_v29, 0.0  ;;  %v2568_v40 = vrot.slane %v5650_v50, 1  ;;  %v2576_v15 = vrot.slane %v5652_v26, 1 }
 0x1bc   :  { %v5674_v42 = vadd.f32 %v2552_v46, %v2551_v3  ;;  %v5676_v38 = vadd.f32 %v2560_v48, %v2559_v6  ;;  %v2579_v60 = vadd.f32 %v2578_v22, %v5601_v63  ;;  %v2587_v34 = vadd.f32 %v2586_v5, %v5604_v19 }
 0x1bd   :  { %v2595_v59 = vadd.f32 %v2594_v11, %v5613_v24  ;;  %v2603_v1 = vadd.f32 %v2602_v17, %v5616_v36  ;;  %v2610_v31 = vsel %vm1393_vm3, %v5631_v21, 0.0  ;;  %v2618_v29 = vsel %vm1393_vm3, %v5634_v7, 0.0 }
 0x1be   :  { %6591 = vst [vmem:[#allocation54_spill] sm:$0xff] %v5674_v42  ;;  %6592 = vst [vmem:[#allocation55_spill] sm:$0xff] %v5676_v38  ;;  %v2626_v57 = vsel %vm1393_vm3, %v2512_v35, 0.0  ;;  %v2634_v25 = vsel %vm1393_vm3, %v2513_v45, 0.0  ;;  %v2580_v18 = vrot.slane %v2579_v60, 4  ;;  %v2588_v14 = vrot.slane %v2587_v34, 4 }
 0x1bf   :  { %v2596_v16 = vrot.slane %v2595_v59, 4  ;;  %v2604_v63 = vrot.slane %v2603_v1, 4  ;;  %v2611_v19 = vadd.f32 %v2610_v31, %v5625_v53  ;;  %v2619_v24 = vadd.f32 %v2618_v29, %v5628_v2 }
 0x1c0   :  { %v2627_v36 = vadd.f32 %v2626_v57, %v5637_v4  ;;  %v2635_v61 = vadd.f32 %v2634_v25, %v5640_v39  ;;  %v2581_v21 = vadd.f32 %v2580_v18, %v2579_v60  ;;  %v2589_v44 = vadd.f32 %v2588_v14, %v2587_v34  ;;  %v2642_v57 = vld [vmem:[%s6026_s2 + $0x18] sm:$0xee] }
 0x1c1   :  { %v2597_v33 = vadd.f32 %v2596_v16, %v2595_v59  ;;  %v2605_v7 = vadd.f32 %v2604_v63, %v2603_v1  ;;  %v2612_v20 = vrot.slane %v2611_v19, 4  ;;  %v2620_v30 = vrot.slane %v2619_v24, 4  ;;  %v2643_v63 = vld [vmem:[%s6026_s2 + $0x20] sm:$0x33] }
 0x1c2   :  { %v2628_v49 = vrot.slane %v2627_v36, 4  ;;  %v2636_v56 = vrot.slane %v2635_v61, 4  ;;  %v2582_v37 = vrot.slane %v2581_v21, 2  ;;  %v2590_v32 = vrot.slane %v2589_v44, 2 }
 0x1c3   :  { %v2598_v52 = vrot.slane %v2597_v33, 2  ;;  %v2606_v8 = vrot.slane %v2605_v7, 2  ;;  %v2613_v3 = vadd.f32 %v2612_v20, %v2611_v19  ;;  %v2621_v53 = vadd.f32 %v2620_v30, %v2619_v24  ;;  %v2647_v30 = vld [vmem:[%s6026_s2 + $0x70] sm:$0x33] }
 0x1c4   :  { %v2629_v6 = vadd.f32 %v2628_v49, %v2627_v36  ;;  %v2637_v2 = vadd.f32 %v2636_v56, %v2635_v61  ;;  %v2583_v35 = vadd.f32 %v2582_v37, %v2581_v21  ;;  %v2591_v4 = vadd.f32 %v2590_v32, %v2589_v44  ;;  %v2646_v21 = vld [vmem:[%s6026_s2 + $0x68] sm:$0xee]  ;;  %v2648_v49 = vld [vmem:[%s6026_s2 + $0x90] sm:$0xee] }
 0x1c5   :  { %v2599_v45 = vadd.f32 %v2598_v52, %v2597_v33  ;;  %v2607_v39 = vadd.f32 %v2606_v8, %v2605_v7  ;;  %v2614_v46 = vrot.slane %v2613_v3, 2  ;;  %v2622_v48 = vrot.slane %v2621_v53, 2  ;;  %v2649_v8 = vld [vmem:[%s6026_s2 + $0x98] sm:$0x33] }
 0x1c6   :  { %v2630_v22 = vrot.slane %v2629_v6, 2  ;;  %v2638_v5 = vrot.slane %v2637_v2, 2  ;;  %v2584_v11 = vrot.slane %v2583_v35, 1  ;;  %v2592_v17 = vrot.slane %v2591_v4, 1 }
 0x1c7   :  { %v2600_v60 = vrot.slane %v2599_v45, 1  ;;  %v2608_v34 = vrot.slane %v2607_v39, 1  ;;  %v2615_v59 = vadd.f32 %v2614_v46, %v2613_v3  ;;  %v2623_v1 = vadd.f32 %v2622_v48, %v2621_v53  ;;  %v2650_v3 = vld [vmem:[%s6026_s2 + $0xb8] sm:$0xee]  ;;  %v2653_v48 = vld [vmem:[%s6026_s2 + $0xe8] sm:$0x33] }
 0x1c8   :  { %v2631_v31 = vadd.f32 %v2630_v22, %v2629_v6  ;;  %v2639_v29 = vadd.f32 %v2638_v5, %v2637_v2  ;;  %v5698_v25 = vadd.f32 %v2568_v40, %v5650_v50  ;;  %v5701_v18 = vadd.f32 %v2576_v15, %v5652_v26  ;;  %v2644_v50 = vld [vmem:[%s6026_s2 + $0x40] sm:$0xee]  ;;  %v2645_v15 = vld [vmem:[%s6026_s2 + $0x48] sm:$0x33] }
 0x1c9   :  { %v5703_v14 = vadd.f32 %v2584_v11, %v2583_v35  ;;  %v5705_v16 = vadd.f32 %v2592_v17, %v2591_v4  ;;  %v2616_v19 = vrot.slane %v2615_v59, 1  ;;  %v2624_v24 = vrot.slane %v2623_v1, 1  ;;  %v2651_v2 = vld [vmem:[%s6026_s2 + $0xc0] sm:$0x33]  ;;  %v2654_v22 = vld [vmem:[%s6026_s2 + $0x108] sm:$0xee] }
 0x1ca   :  { %6593 = vst [vmem:[#allocation56_spill] sm:$0xff] %v5698_v25  ;;  %6594 = vst [vmem:[#allocation57_spill] sm:$0xff] %v5701_v18  ;;  %v2632_v36 = vrot.slane %v2631_v31, 1  ;;  %v2640_v61 = vrot.slane %v2639_v29, 1  ;;  %v5713_v40 = vadd.f32 %v2600_v60, %v2599_v45  ;;  %v5715_v26 = vadd.f32 %v2608_v34, %v2607_v39  ;;  %v2652_v35 = vld [vmem:[%s6026_s2 + $0xe0] sm:$0xee] }
 0x1cb   :  { %6595 = vst [vmem:[#allocation58_spill] sm:$0xff] %v5703_v14  ;;  %6596 = vst [vmem:[#allocation59_spill] sm:$0xff] %v5705_v16  ;;  %v2658_v44 = vunpack.c.l.bf16 %v2642_v57  ;;  %v2659_v33 = vunpack.c.h.bf16 %v2642_v57  ;;  %v5723_v7 = vadd.f32 %v2616_v19, %v2615_v59  ;;  %v5725_v20 = vadd.f32 %v2624_v24, %v2623_v1  ;;  %v2655_v34 = vld [vmem:[%s6026_s2 + $0x110] sm:$0x33] }
 0x1cc   :  { %6597 = vst [vmem:[#allocation60_spill] sm:$0xff] %v5713_v40  ;;  %6598 = vst [vmem:[#allocation61_spill] sm:$0xff] %v5715_v26  ;;  %v2660_v56 = vunpack.c.l.bf16 %v2643_v63  ;;  %v2661_v37 = vunpack.c.h.bf16 %v2643_v63  ;;  %v5733_v32 = vadd.f32 %v2632_v36, %v2631_v31  ;;  %v5735_v52 = vadd.f32 %v2640_v61, %v2639_v29  ;;  %v2656_v59 = vld [vmem:[%s6026_s2 + $0x130] sm:$0xee] }
 0x1cd   :  { %6599 = vst [vmem:[#allocation62_spill] sm:$0xff] %v5723_v7  ;;  %6600 = vst [vmem:[#allocation63_spill] sm:$0xff] %v5725_v20  ;;  %v2662_v53 = vunpack.c.l.bf16 %v2644_v50  ;;  %v2663_v6 = vunpack.c.h.bf16 %v2644_v50  ;;  %v2664_v4 = vunpack.c.l.bf16 %v2645_v15  ;;  %v2665_v45 = vunpack.c.h.bf16 %v2645_v15 }
 0x1ce   :  { %6601 = vst [vmem:[#allocation64_spill] sm:$0xff] %v5733_v32  ;;  %6602 = vst [vmem:[#allocation65_spill] sm:$0xff] %v5735_v52  ;;  %v2666_v39 = vunpack.c.l.bf16 %v2646_v21  ;;  %v2667_v46 = vunpack.c.h.bf16 %v2646_v21  ;;  %v2668_v5 = vunpack.c.l.bf16 %v2647_v30  ;;  %v2669_v11 = vunpack.c.h.bf16 %v2647_v30  ;;  %v2657_v30 = vld [vmem:[%s6026_s2 + $0x138] sm:$0x33] }
 0x1cf   :  { %v2670_v17 = vunpack.c.l.bf16 %v2648_v49  ;;  %v2671_v60 = vunpack.c.h.bf16 %v2648_v49  ;;  %v2672_v1 = vunpack.c.l.bf16 %v2649_v8  ;;  %v2673_v31 = vunpack.c.h.bf16 %v2649_v8 }
 0x1d0   :  { %v2674_v29 = vunpack.c.l.bf16 %v2650_v3  ;;  %v2675_v57 = vunpack.c.h.bf16 %v2650_v3  ;;  %v2676_v63 = vunpack.c.l.bf16 %v2651_v2  ;;  %v2677_v19 = vunpack.c.h.bf16 %v2651_v2 }
 0x1d1   :  { %v2678_v24 = vunpack.c.l.bf16 %v2652_v35  ;;  %v2679_v36 = vunpack.c.h.bf16 %v2652_v35  ;;  %v2680_v61 = vunpack.c.l.bf16 %v2653_v48  ;;  %v2681_v50 = vunpack.c.h.bf16 %v2653_v48 }
 0x1d2   :  { %v2682_v15 = vunpack.c.l.bf16 %v2654_v22  ;;  %v2683_v21 = vunpack.c.h.bf16 %v2654_v22  ;;  %v2684_v49 = vunpack.c.l.bf16 %v2655_v34  ;;  %v2685_v52 = vunpack.c.h.bf16 %v2655_v34 }
 0x1d3   :  { %v2686_v32 = vunpack.c.l.bf16 %v2656_v59  ;;  %v2687_v20 = vunpack.c.h.bf16 %v2656_v59  ;;  %v2722_v7 = vrot.slane %v2658_v44, 3  ;;  %v2723_v8 = vrot.slane %v2660_v56, 3 }
 0x1d4   :  { %v2725_v26 = vrot.slane %v2659_v33, 3  ;;  %v2726_v3 = vrot.slane %v2661_v37, 3  ;;  %v2728_v40 = vrot.slane %v2662_v53, 3  ;;  %v2729_v2 = vrot.slane %v2664_v4, 3 }
 0x1d5   :  { %v2731_v16 = vrot.slane %v2663_v6, 3  ;;  %v2732_v35 = vrot.slane %v2665_v45, 3  ;;  %v2688_v14 = vunpack.c.l.bf16 %v2657_v30  ;;  %v2689_v48 = vunpack.c.h.bf16 %v2657_v30 }
 0x1d6   :  { %v2734_v18 = vrot.slane %v2666_v39, 3  ;;  %v2735_v22 = vrot.slane %v2668_v5, 3  ;;  %v2724_v25 = vsel %vm1280_vm2, %v2722_v7, %v2723_v8  ;;  %v2727_v38 = vsel %vm1280_vm2, %v2725_v26, %v2726_v3 }
 0x1d7   :  { %v2737_v42 = vrot.slane %v2667_v46, 3  ;;  %v2738_v34 = vrot.slane %v2669_v11, 3  ;;  %v2730_v59 = vsel %vm1280_vm2, %v2728_v40, %v2729_v2  ;;  %v2740_v44 = vrot.slane %v2670_v17, 3 }
 0x1d8   :  { %v2741_v56 = vrot.slane %v2672_v1, 3  ;;  %v2743_v33 = vrot.slane %v2671_v60, 3  ;;  %v2733_v37 = vsel %vm1280_vm2, %v2731_v16, %v2732_v35  ;;  %v2744_v53 = vrot.slane %v2673_v31, 3 }
 0x1d9   :  { %v2746_v6 = vrot.slane %v2674_v29, 3  ;;  %v2747_v4 = vrot.slane %v2676_v63, 3  ;;  %v2736_v45 = vsel %vm1280_vm2, %v2734_v18, %v2735_v22  ;;  %v2749_v39 = vrot.slane %v2675_v57, 3 }
 0x1da   :  { %v2750_v5 = vrot.slane %v2677_v19, 3  ;;  %v2752_v30 = vrot.slane %v2678_v24, 3  ;;  %v2739_v7 = vsel %vm1280_vm2, %v2737_v42, %v2738_v34  ;;  %v2742_v26 = vsel %vm1280_vm2, %v2740_v44, %v2741_v56 }
 0x1db   :  { %v2753_v46 = vrot.slane %v2680_v61, 3  ;;  %v2755_v11 = vrot.slane %v2679_v36, 3  ;;  %v2745_v40 = vsel %vm1280_vm2, %v2743_v33, %v2744_v53  ;;  %v2756_v17 = vrot.slane %v2681_v50, 3 }
 0x1dc   :  { %v2758_v60 = vrot.slane %v2682_v15, 3  ;;  %v2759_v1 = vrot.slane %v2684_v49, 3  ;;  %v2748_v16 = vsel %vm1280_vm2, %v2746_v6, %v2747_v4  ;;  %v2761_v31 = vrot.slane %v2683_v21, 3 }
 0x1dd   :  { %v2762_v29 = vrot.slane %v2685_v52, 3  ;;  %v2764_v63 = vrot.slane %v2686_v32, 3  ;;  %v2751_v18 = vsel %vm1280_vm2, %v2749_v39, %v2750_v5  ;;  %v2754_v57 = vsel %vm1280_vm2, %v2752_v30, %v2753_v46  ;;  %v6606_v30 = vld [vmem:[#allocation26_spill] sm:$0xff] }
 0x1de   :  { %v5775_v19 = vrot.slane %v2688_v14, 3  ;;  %v2767_v42 = vrot.slane %v2687_v20, 3  ;;  %v2757_v24 = vsel %vm1280_vm2, %v2755_v11, %v2756_v17  ;;  %v2760_v36 = vsel %vm1280_vm2, %v2758_v60, %v2759_v1  ;;  %v6616_v11 = vld [vmem:[#allocation6_spill] sm:$0xff] }
 0x1df   :  { %v2763_v61 = vsel %vm1280_vm2, %v2761_v31, %v2762_v29  ;;  %v5780_v50 = vrot.slane %v2689_v48, 3  ;;  %v2802_v32 = vmul.f32 %v2724_v25, %v4997_v13  ;;  %v2803_v52 = vmul.f32 %v2727_v38, %v5033_v55  ;;  %v6603_v55 = vld [vmem:[#allocation2_spill] sm:$0xff] }
 0x1e0   :  { %v2766_v15 = vsel %vm1280_vm2, %v2764_v63, %v5775_v19  ;;  %v2804_v21 = vmul.f32 %v2723_v8, %v5005_v43  ;;  %v2805_v20 = vmul.f32 %v2726_v3, %v5036_v41  ;;  %v2806_v49 = vmul.f32 %v2730_v59, %v5044_v62  ;;  %v6604_v43 = vld [vmem:[#allocation23_spill] sm:$0xff]  ;;  %v6605_v8 = vld [vmem:[#allocation24_spill] sm:$0xff]  ;;  %v6607_v3 = vld [vmem:[#allocation25_spill] sm:$0xff] }
 0x1e1   :  { %v2769_v14 = vsel %vm1280_vm2, %v2767_v42, %v5780_v50  ;;  %v2807_v44 = vmul.f32 %v2733_v37, %v5048_v54  ;;  %v2808_v48 = vmul.f32 %v2729_v2, %v5051_v27  ;;  %v2809_v33 = vmul.f32 %v2732_v35, %v5054_v0  ;;  %v6608_v59 = vld [vmem:[#allocation27_spill] sm:$0xff]  ;;  %v6609_v37 = vld [vmem:[#allocation28_spill] sm:$0xff]  ;;  %v6610_v0 = vld [vmem:[#allocation30_spill] sm:$0xff] }
 0x1e2   :  { %v2810_v6 = vmul.f32 %v2736_v45, %v5057_v23  ;;  %v2811_v13 = vmul.f32 %v2739_v7, %v5066_v58  ;;  %v2812_v38 = vmul.f32 %v2735_v22, %v6603_v55  ;;  %v2813_v25 = vmul.f32 %v2738_v34, %v6604_v43  ;;  %v6611_v23 = vld [vmem:[#allocation29_spill] sm:$0xff]  ;;  %v6612_v35 = vld [vmem:[#allocation31_spill] sm:$0xff]  ;;  %v6617_v60 = vld [vmem:[#allocation14_spill] sm:$0xff] }
 0x1e3   :  { %v2814_v39 = vmul.f32 %v2742_v26, %v6605_v8  ;;  %v2815_v41 = vmul.f32 %v2745_v40, %v6606_v30  ;;  %v2816_v62 = vmul.f32 %v2741_v56, %v6607_v3  ;;  %v2817_v54 = vmul.f32 %v2744_v53, %v6608_v59  ;;  %v6613_v34 = vld [vmem:[#allocation3_spill] sm:$0xff]  ;;  %v6614_v7 = vld [vmem:[#allocation5_spill] sm:$0xff]  ;;  %v6615_v56 = vld [vmem:[#allocation4_spill] sm:$0xff] }
 0x1e4   :  { %v5803_v27 = vmul.f32 %v2748_v16, %v6609_v37  ;;  %v5806_v2 = vmul.f32 %v2751_v18, %v6610_v0  ;;  %v5809_v58 = vmul.f32 %v2747_v4, %v6611_v23  ;;  %v5812_v22 = vmul.f32 %v2750_v5, %v6612_v35  ;;  %v6618_v4 = vld [vmem:[#allocation15_spill] sm:$0xff]  ;;  %v6620_v18 = vld [vmem:[#allocation17_spill] sm:$0xff]  ;;  %v6621_v42 = vld [vmem:[#allocation8_spill] sm:$0xff] }
 0x1e5   :  { %v5815_v45 = vmul.f32 %v2754_v57, %v6613_v34  ;;  %v5818_v26 = vmul.f32 %v2757_v24, %v6614_v7  ;;  %v5821_v53 = vmul.f32 %v2753_v46, %v6615_v56  ;;  %v5824_v40 = vmul.f32 %v2756_v17, %v6616_v11  ;;  %v6619_v5 = vld [vmem:[#allocation7_spill] sm:$0xff]  ;;  %v6622_v46 = vld [vmem:[#allocation18_spill] sm:$0xff] }
 0x1e6   :  { %v5827_v16 = vmul.f32 %v2760_v36, %v6617_v60  ;;  %v5830_v31 = vmul.f32 %v2763_v61, %v6618_v4  ;;  %v5833_v63 = vmul.f32 %v2759_v1, %v6619_v5  ;;  %v5836_v57 = vmul.f32 %v2762_v29, %v6620_v18 }
 0x1e7   :  { %v5839_v24 = vmul.f32 %v2766_v15, %v6621_v42  ;;  %v5842_v55 = vmul.f32 %v2769_v14, %v6622_v46  ;;  %v2834_v17 = vsel %vm1393_vm3, %v2804_v21, 0.0  ;;  %v2842_v36 = vsel %vm1393_vm3, %v2805_v20, 0.0 }
 0x1e8   :  { %v2850_v43 = vsel %vm1393_vm3, %v2808_v48, 0.0  ;;  %v2858_v61 = vsel %vm1393_vm3, %v2809_v33, 0.0  ;;  %v2835_v8 = vadd.f32 %v2834_v17, %v2802_v32  ;;  %v2843_v1 = vadd.f32 %v2842_v36, %v2803_v52 }
 0x1e9   :  { %v2851_v30 = vadd.f32 %v2850_v43, %v2806_v49  ;;  %v2859_v3 = vadd.f32 %v2858_v61, %v2807_v44  ;;  %v2866_v29 = vsel %vm1393_vm3, %v2812_v38, 0.0  ;;  %v2874_v15 = vsel %vm1393_vm3, %v2813_v25, 0.0 }
 0x1ea   :  { %v2882_v59 = vsel %vm1393_vm3, %v2816_v62, 0.0  ;;  %v2890_v14 = vsel %vm1393_vm3, %v2817_v54, 0.0  ;;  %v2836_v37 = vrot.slane %v2835_v8, 4  ;;  %v2844_v21 = vrot.slane %v2843_v1, 4 }
 0x1eb   :  { %v2852_v0 = vrot.slane %v2851_v30, 4  ;;  %v2860_v20 = vrot.slane %v2859_v3, 4  ;;  %v2867_v23 = vadd.f32 %v2866_v29, %v2810_v6  ;;  %v2875_v48 = vadd.f32 %v2874_v15, %v2811_v13 }
 0x1ec   :  { %v2883_v35 = vadd.f32 %v2882_v59, %v2814_v39  ;;  %v2891_v33 = vadd.f32 %v2890_v14, %v2815_v41  ;;  %v2837_v32 = vadd.f32 %v2836_v37, %v2835_v8  ;;  %v2845_v52 = vadd.f32 %v2844_v21, %v2843_v1 }
 0x1ed   :  { %v2853_v49 = vadd.f32 %v2852_v0, %v2851_v30  ;;  %v2861_v44 = vadd.f32 %v2860_v20, %v2859_v3  ;;  %v2868_v34 = vrot.slane %v2867_v23, 4  ;;  %v2876_v38 = vrot.slane %v2875_v48, 4 }
 0x1ee   :  { %v2884_v7 = vrot.slane %v2883_v35, 4  ;;  %v2892_v25 = vrot.slane %v2891_v33, 4  ;;  %v2838_v56 = vrot.slane %v2837_v32, 2  ;;  %v2846_v62 = vrot.slane %v2845_v52, 2 }
 0x1ef   :  { %v2854_v11 = vrot.slane %v2853_v49, 2  ;;  %v2862_v54 = vrot.slane %v2861_v44, 2  ;;  %v2869_v60 = vadd.f32 %v2868_v34, %v2867_v23  ;;  %v2877_v4 = vadd.f32 %v2876_v38, %v2875_v48 }
 0x1f0   :  { %v2885_v5 = vadd.f32 %v2884_v7, %v2883_v35  ;;  %v2893_v18 = vadd.f32 %v2892_v25, %v2891_v33  ;;  %v2839_v6 = vadd.f32 %v2838_v56, %v2837_v32  ;;  %v2847_v13 = vadd.f32 %v2846_v62, %v2845_v52 }
 0x1f1   :  { %v2855_v39 = vadd.f32 %v2854_v11, %v2853_v49  ;;  %v2863_v41 = vadd.f32 %v2862_v54, %v2861_v44  ;;  %v2870_v42 = vrot.slane %v2869_v60, 2  ;;  %v2878_v46 = vrot.slane %v2877_v4, 2 }
 0x1f2   :  { %v2886_v17 = vrot.slane %v2885_v5, 2  ;;  %v2894_v36 = vrot.slane %v2893_v18, 2  ;;  %v2840_v43 = vrot.slane %v2839_v6, 1  ;;  %v2848_v61 = vrot.slane %v2847_v13, 1 }
 0x1f3   :  { %v2856_v8 = vrot.slane %v2855_v39, 1  ;;  %v2864_v1 = vrot.slane %v2863_v41, 1  ;;  %v2871_v30 = vadd.f32 %v2870_v42, %v2869_v60  ;;  %v2879_v3 = vadd.f32 %v2878_v46, %v2877_v4 }
 0x1f4   :  { %v5852_v29 = vadd.f32 %v2886_v17, %v2885_v5  ;;  %v5854_v15 = vadd.f32 %v2894_v36, %v2893_v18  ;;  %v2832_v59 = vmul.f32 %v5775_v19, %v6555_v9  ;;  %v2833_v14 = vmul.f32 %v5780_v50, %v5201_v51 }
 0x1f5   :  { %v5860_v37 = vadd.f32 %v2840_v43, %v2839_v6  ;;  %v5862_v21 = vadd.f32 %v2848_v61, %v2847_v13  ;;  %v5864_v0 = vadd.f32 %v2856_v8, %v2855_v39  ;;  %v5866_v20 = vadd.f32 %v2864_v1, %v2863_v41 }
 0x1f6   :  { %v2872_v23 = vrot.slane %v2871_v30, 1  ;;  %v2880_v48 = vrot.slane %v2879_v3, 1  ;;  %v2898_v35 = vsel %vm1393_vm3, %v5809_v58, 0.0  ;;  %v2906_v33 = vsel %vm1393_vm3, %v5812_v22, 0.0 }
 0x1f7   :  { %v2914_v9 = vsel %vm1393_vm3, %v5821_v53, 0.0  ;;  %v2922_v51 = vsel %vm1393_vm3, %v5824_v40, 0.0  ;;  %v2888_v32 = vrot.slane %v5852_v29, 1  ;;  %v2896_v52 = vrot.slane %v5854_v15, 1 }
 0x1f8   :  { %v5876_v19 = vadd.f32 %v2872_v23, %v2871_v30  ;;  %v5878_v50 = vadd.f32 %v2880_v48, %v2879_v3  ;;  %v2899_v49 = vadd.f32 %v2898_v35, %v5803_v27  ;;  %v2907_v58 = vadd.f32 %v2906_v33, %v5806_v2 }
 0x1f9   :  { %v2915_v22 = vadd.f32 %v2914_v9, %v5815_v45  ;;  %v2923_v44 = vadd.f32 %v2922_v51, %v5818_v26  ;;  %v2930_v53 = vsel %vm1393_vm3, %v5833_v63, 0.0  ;;  %v2938_v40 = vsel %vm1393_vm3, %v5836_v57, 0.0 }
 0x1fa   :  { %v2946_v34 = vsel %vm1393_vm3, %v2832_v59, 0.0  ;;  %v2954_v38 = vsel %vm1393_vm3, %v2833_v14, 0.0  ;;  %v2900_v7 = vrot.slane %v2899_v49, 4  ;;  %v2908_v25 = vrot.slane %v2907_v58, 4 }
 0x1fb   :  { %v2916_v56 = vrot.slane %v2915_v22, 4  ;;  %v2924_v27 = vrot.slane %v2923_v44, 4  ;;  %v2931_v2 = vadd.f32 %v2930_v53, %v5827_v16  ;;  %v2939_v45 = vadd.f32 %v2938_v40, %v5830_v31 }
 0x1fc   :  { %v2947_v26 = vadd.f32 %v2946_v34, %v5839_v24  ;;  %v2955_v62 = vadd.f32 %v2954_v38, %v5842_v55  ;;  %v2901_v63 = vadd.f32 %v2900_v7, %v2899_v49  ;;  %v2909_v11 = vadd.f32 %v2908_v25, %v2907_v58  ;;  %v6623_v7 = vld [vmem:[#allocation16_spill] sm:$0xff]  ;;  %v6624_v25 = vld [vmem:[#allocation9_spill] sm:$0xff] }
 0x1fd   :  { %v2917_v54 = vadd.f32 %v2916_v56, %v2915_v22  ;;  %v2925_v57 = vadd.f32 %v2924_v27, %v2923_v44  ;;  %v2932_v60 = vrot.slane %v2931_v2, 4  ;;  %v2940_v4 = vrot.slane %v2939_v45, 4  ;;  %v6625_v27 = vld [vmem:[#allocation39_spill] sm:$0xff] }
 0x1fe   :  { %v2948_v5 = vrot.slane %v2947_v26, 4  ;;  %v2956_v18 = vrot.slane %v2955_v62, 4  ;;  %v2902_v6 = vrot.slane %v2901_v63, 2  ;;  %v2910_v13 = vrot.slane %v2909_v11, 2 }
 0x1ff   :  { %v2918_v39 = vrot.slane %v2917_v54, 2  ;;  %v2926_v41 = vrot.slane %v2925_v57, 2  ;;  %v2933_v42 = vadd.f32 %v2932_v60, %v2931_v2  ;;  %v2941_v16 = vadd.f32 %v2940_v4, %v2939_v45  ;;  %v6626_v2 = vld [vmem:[#allocation19_spill] sm:$0xff]  ;;  %v6631_v60 = vld [vmem:[#allocation42_spill] sm:$0xff]  ;;  %v6632_v4 = vld [vmem:[#allocation21_spill] sm:$0xff] }
 0x200   :  { %v2949_v46 = vadd.f32 %v2948_v5, %v2947_v26  ;;  %v2957_v31 = vadd.f32 %v2956_v18, %v2955_v62  ;;  %v2903_v17 = vadd.f32 %v2902_v6, %v2901_v63  ;;  %v2911_v24 = vadd.f32 %v2910_v13, %v2909_v11  ;;  %v6629_v62 = vld [vmem:[#allocation41_spill] sm:$0xff]  ;;  %v6630_v63 = vld [vmem:[#allocation10_spill] sm:$0xff]  ;;  %v6633_v18 = vld [vmem:[#allocation43_spill] sm:$0xff] }
 0x201   :  { %v2919_v36 = vadd.f32 %v2918_v39, %v2917_v54  ;;  %v2927_v55 = vadd.f32 %v2926_v41, %v2925_v57  ;;  %v2934_v43 = vrot.slane %v2933_v42, 2  ;;  %v2942_v61 = vrot.slane %v2941_v16, 2  ;;  %v6634_v6 = vld [vmem:[#allocation11_spill] sm:$0xff]  ;;  %v6635_v39 = vld [vmem:[#allocation44_spill] sm:$0xff]  ;;  %v6636_v41 = vld [vmem:[#allocation22_spill] sm:$0xff] }
 0x202   :  { %v2950_v8 = vrot.slane %v2949_v46, 2  ;;  %v2958_v1 = vrot.slane %v2957_v31, 2  ;;  %v2904_v30 = vrot.slane %v2903_v17, 1  ;;  %v2912_v3 = vrot.slane %v2911_v24, 1 }
 0x203   :  { %v2920_v59 = vrot.slane %v2919_v36, 1  ;;  %v2928_v14 = vrot.slane %v2927_v55, 1  ;;  %v2935_v23 = vadd.f32 %v2934_v43, %v2933_v42  ;;  %v2943_v48 = vadd.f32 %v2942_v61, %v2941_v16  ;;  %v6637_v16 = vld [vmem:[#allocation45_spill] sm:$0xff]  ;;  %v6642_v43 = vld [vmem:[#allocation32_spill] sm:$0xff] }
 0x204   :  { %v2951_v35 = vadd.f32 %v2950_v8, %v2949_v46  ;;  %v2959_v33 = vadd.f32 %v2958_v1, %v2957_v31  ;;  %v2889_v9 = vadd.f32 %v2888_v32, %v5852_v29  ;;  %v2897_v51 = vadd.f32 %v2896_v52, %v5854_v15  ;;  %v6627_v32 = vld [vmem:[#allocation40_spill] sm:$0xff]  ;;  %v6644_v1 = vld [vmem:[#allocation33_spill] sm:$0xff] }
 0x205   :  { %v2905_v49 = vadd.f32 %v2904_v30, %v2903_v17  ;;  %v2913_v58 = vadd.f32 %v2912_v3, %v2911_v24  ;;  %v2936_v22 = vrot.slane %v2935_v23, 1  ;;  %v2944_v44 = vrot.slane %v2943_v48, 1  ;;  %v6628_v15 = vld [vmem:[#allocation20_spill] sm:$0xff]  ;;  %v6639_v17 = vld [vmem:[#allocation46_spill] sm:$0xff]  ;;  %v6640_v24 = vld [vmem:[#allocation13_spill] sm:$0xff] }
 0x206   :  { %v2952_v53 = vrot.slane %v2951_v35, 1  ;;  %v2960_v40 = vrot.slane %v2959_v33, 1  ;;  %v2921_v34 = vadd.f32 %v2920_v59, %v2919_v36  ;;  %v2929_v38 = vadd.f32 %v2928_v14, %v2927_v55  ;;  %v6638_v46 = vld [vmem:[#allocation12_spill] sm:$0xff]  ;;  %v6641_v55 = vld [vmem:[#allocation47_spill] sm:$0xff]  ;;  %v6645_v3 = vld [vmem:[#allocation49_spill] sm:$0xff] }
 0x207   :  { %v2962_v56 = vsel %vm1393_vm3, %v6624_v25, %v6623_v7  ;;  %v2963_v45 = vsel %vm1393_vm3, %v6626_v2, %v6625_v27  ;;  %v2937_v26 = vadd.f32 %v2936_v22, %v2935_v23  ;;  %v2945_v29 = vadd.f32 %v2944_v44, %v2943_v48  ;;  %v6643_v8 = vld [vmem:[#allocation48_spill] sm:$0xff]  ;;  %v6646_v59 = vld [vmem:[#allocation34_spill] sm:$0xff]  ;;  %v6648_v48 = vld [vmem:[#allocation35_spill] sm:$0xff] }
 0x208   :  { %v2964_v52 = vsel %vm1393_vm3, %v6628_v15, %v6627_v32  ;;  %v2965_v11 = vsel %vm1393_vm3, %v6630_v63, %v6629_v62  ;;  %v2953_v54 = vadd.f32 %v2952_v53, %v2951_v35  ;;  %v2961_v57 = vadd.f32 %v2960_v40, %v2959_v33  ;;  %v6647_v23 = vld [vmem:[#allocation50_spill] sm:$0xff]  ;;  %v6649_v33 = vld [vmem:[#allocation51_spill] sm:$0xff]  ;;  %v6650_v22 = vld [vmem:[#allocation36_spill] sm:$0xff] }
 0x209   :  { %v2966_v5 = vsel %vm1393_vm3, %v6632_v4, %v6631_v60  ;;  %v2967_v13 = vsel %vm1393_vm3, %v6634_v6, %v6633_v18  ;;  %v2968_v42 = vsel %vm1393_vm3, %v6636_v41, %v6635_v39  ;;  %v2969_v31 = vsel %vm1393_vm3, %v6638_v46, %v6637_v16  ;;  %v6651_v53 = vld [vmem:[#allocation52_spill] sm:$0xff]  ;;  %v6652_v40 = vld [vmem:[#allocation37_spill] sm:$0xff]  ;;  %v6654_v27 = vld [vmem:[#allocation38_spill] sm:$0xff] }
 0x20a   :  { %v2970_v36 = vsel %vm1393_vm3, %v6640_v24, %v6639_v17  ;;  %v2971_v61 = vsel %vm1393_vm3, %v6642_v43, %v6641_v55  ;;  %v2972_v30 = vsel %vm1393_vm3, %v6644_v1, %v6643_v8  ;;  %v2973_v14 = vsel %vm1393_vm3, %v6646_v59, %v6645_v3  ;;  %v6653_v25 = vld [vmem:[#allocation53_spill] sm:$0xff]  ;;  %v6655_v60 = vld [vmem:[#allocation54_spill] sm:$0xff]  ;;  %v6656_v18 = vld [vmem:[#allocation55_spill] sm:$0xff] }
 0x20b   :  { %v2974_v35 = vsel %vm1393_vm3, %v6648_v48, %v6647_v23  ;;  %v2975_v44 = vsel %vm1393_vm3, %v6650_v22, %v6649_v33  ;;  %v2976_v7 = vsel %vm1393_vm3, %v6652_v40, %v6651_v53  ;;  %v2977_v2 = vsel %vm1393_vm3, %v6654_v27, %v6653_v25  ;;  %v6657_v39 = vld [vmem:[#allocation56_spill] sm:$0xff]  ;;  %v6658_v16 = vld [vmem:[#allocation57_spill] sm:$0xff]  ;;  %v6663_v46 = vld [vmem:[#allocation62_spill] sm:$0xff] }
 0x20c   :  { %v2979_v32 = vsel %vm2978_vm4, %v2962_v56, %v5658_v47  ;;  %v2980_v15 = vsel %vm2978_vm4, %v2963_v45, %v5660_v12  ;;  %v2981_v62 = vsel %vm2978_vm4, %v2964_v52, %v5662_v28  ;;  %v2982_v63 = vsel %vm2978_vm4, %v2965_v11, %v5664_v10  ;;  %v6659_v56 = vld [vmem:[#allocation58_spill] sm:$0xff]  ;;  %v6660_v45 = vld [vmem:[#allocation59_spill] sm:$0xff]  ;;  %v6661_v52 = vld [vmem:[#allocation60_spill] sm:$0xff] }
 0x20d   :  { %v2983_v4 = vsel %vm2978_vm4, %v2966_v5, %v6655_v60  ;;  %v2984_v6 = vsel %vm2978_vm4, %v2967_v13, %v6656_v18  ;;  %v2985_v41 = vsel %vm2978_vm4, %v2968_v42, %v6657_v39  ;;  %v2986_v47 = vsel %vm2978_vm4, %v2969_v31, %v6658_v16  ;;  %v6662_v11 = vld [vmem:[#allocation61_spill] sm:$0xff]  ;;  %v6664_v17 = vld [vmem:[#allocation63_spill] sm:$0xff]  ;;  %v6665_v24 = vld [vmem:[#allocation64_spill] sm:$0xff] }
 0x20e   :  { %v2987_v12 = vsel %vm2978_vm4, %v2970_v36, %v6659_v56  ;;  %v2988_v28 = vsel %vm2978_vm4, %v2971_v61, %v6660_v45  ;;  %v2989_v10 = vsel %vm2978_vm4, %v2972_v30, %v6661_v52  ;;  %v2990_v5 = vsel %vm2978_vm4, %v2973_v14, %v6662_v11  ;;  %v6666_v55 = vld [vmem:[#allocation65_spill] sm:$0xff] }
 0x20f   :  { %v2991_v13 = vsel %vm2978_vm4, %v2974_v35, %v6663_v46  ;;  %v2992_v42 = vsel %vm2978_vm4, %v2975_v44, %v6664_v17  ;;  %v2993_v31 = vsel %vm2978_vm4, %v2976_v7, %v6665_v24  ;;  %v2994_v36 = vsel %vm2978_vm4, %v2977_v2, %v6666_v55 }
 0x210   :  { %v2996_v43 = vsel %vm2995_vm5, %v2979_v32, %v5860_v37  ;;  %v2997_v61 = vsel %vm2995_vm5, %v2980_v15, %v5862_v21  ;;  %v2998_v8 = vsel %vm2995_vm5, %v2981_v62, %v5864_v0  ;;  %v2999_v1 = vsel %vm2995_vm5, %v2982_v63, %v5866_v20 }
 0x211   :  { %v3000_v30 = vsel %vm2995_vm5, %v2983_v4, %v5876_v19  ;;  %v3001_v3 = vsel %vm2995_vm5, %v2984_v6, %v5878_v50  ;;  %v3002_v59 = vsel %vm2995_vm5, %v2985_v41, %v2889_v9  ;;  %v3003_v14 = vsel %vm2995_vm5, %v2986_v47, %v2897_v51 }
 0x212   :  { %v3004_v37 = vsel %vm2995_vm5, %v2987_v12, %v2905_v49  ;;  %v3005_v21 = vsel %vm2995_vm5, %v2988_v28, %v2913_v58  ;;  %v3006_v23 = vsel %vm2995_vm5, %v2989_v10, %v2921_v34  ;;  %v3007_v0 = vsel %vm2995_vm5, %v2990_v5, %v2929_v38 }
 0x213   :  { %v3008_v20 = vsel %vm2995_vm5, %v2991_v13, %v2937_v26  ;;  %v3009_v48 = vsel %vm2995_vm5, %v2992_v42, %v2945_v29  ;;  %v3010_v19 = vsel %vm2995_vm5, %v2993_v31, %v2953_v54  ;;  %v3011_v50 = vsel %vm2995_vm5, %v2994_v36, %v2961_v57 }
 0x214   :  { %v3028_v35 = vcombine.low %v2996_v43, %v2997_v61  ;;  %v3029_v9 = vcombine.low %v2998_v8, %v2999_v1  ;;  %v3030_v33 = vcombine.low %v3000_v30, %v3001_v3  ;;  %v3031_v51 = vcombine.low %v3002_v59, %v3003_v14 }
 0x215   :  { %v3032_v22 = vcombine.low %v3004_v37, %v3005_v21  ;;  %v3033_v49 = vcombine.low %v3006_v23, %v3007_v0  ;;  %v3034_v44 = vcombine.low %v3008_v20, %v3009_v48  ;;  %v3035_v58 = vcombine.low %v3010_v19, %v3011_v50 }
 0x216   :  { %3044 = vst [vmem:[%s6027_s3] sm:$0xff] %v3028_v35  ;;  %3045 = vst [vmem:[%s6027_s3 + $0x8] sm:$0xff] %v3029_v9 }
 0x217   :  { %3046 = vst [vmem:[%s6027_s3 + $0x10] sm:$0xff] %v3030_v33  ;;  %3047 = vst [vmem:[%s6027_s3 + $0x18] sm:$0xff] %v3031_v51 }
 0x218   :  { %3048 = vst [vmem:[%s6027_s3 + $0x20] sm:$0xff] %v3032_v22  ;;  %3049 = vst [vmem:[%s6027_s3 + $0x28] sm:$0xff] %v3033_v49 }
 0x219   :  { %3050 = vst [vmem:[%s6027_s3 + $0x30] sm:$0xff] %v3034_v44  ;;  %3051 = vst [vmem:[%s6027_s3 + $0x38] sm:$0xff] %v3035_v58 }

</bundles_post_ra>
